<compile_context>
chip_gen: v6e
topology: v6e:2x2x1
jax: 0.10.0
libtpu: 0.0.40
codegen_flags: <defaults>
</compile_context>

<pallas_src>
import functools

import numpy as np
import jax
import jax.numpy as jnp
from jax.experimental import pallas as pl
from jax.experimental.pallas import tpu as pltpu


# ----------------------------------------------------------------------------
# helpers used inside kernels
# ----------------------------------------------------------------------------

def _ln_rows(x, g, b, eps):
    """LayerNorm over last axis. x: (M, D) f32, g/b: (1, D) f32."""
    mu = jnp.mean(x, axis=-1, keepdims=True)
    var = jnp.mean(jnp.square(x - mu), axis=-1, keepdims=True)
    return (x - mu) * jax.lax.rsqrt(var + eps) * g + b


def _layer_body(x,
                ln1g_ref, ln1b_ref, wq_ref, wkT_ref, wv_ref, wo_ref, bo_ref,
                ln2g_ref, ln2b_ref, wff1_ref, bff1_ref, wff2_ref, bff2_ref,
                *, heads, dim_head, eps):
    """One PreNorm attention + PreNorm feedforward layer on an (M, D) f32 activation."""
    f32 = jnp.float32
    scale = dim_head ** -0.5

    # ---- attention (PreNorm); per-head weights were split at trace time ----
    xn = _ln_rows(x, ln1g_ref[0].astype(f32), ln1b_ref[0].astype(f32), eps)
    wq = wq_ref[0].astype(f32)    # (heads, D, dh)
    wkT = wkT_ref[0].astype(f32)  # (heads, dh, D)   (pre-transposed k weight)
    wv = wv_ref[0].astype(f32)    # (heads, D, dh)
    wo = wo_ref[0].astype(f32)    # (heads, dh, D)
    attn = bo_ref[0].astype(f32)  # (1, D), broadcasts over rows
    for h in range(heads):
        q = jnp.dot(xn, wq[h], preferred_element_type=f32)                     # (M, dh)
        # k^T directly: (dh, D) x (M, D) contracted on D -> (dh, M); no activation transpose
        kt = jax.lax.dot_general(wkT[h], xn, (((1,), (1,)), ((), ())),
                                 preferred_element_type=f32)                    # (dh, M)
        v = jnp.dot(xn, wv[h], preferred_element_type=f32)                     # (M, dh)
        s = jnp.dot(q, kt, preferred_element_type=f32) * scale                  # (M, M)
        s = s - jnp.max(s, axis=-1, keepdims=True)
        p = jnp.exp(s)
        p = p * pl.reciprocal(jnp.sum(p, axis=-1, keepdims=True), approx=True)
        # fold the head concat into the output projection: sum_h (p@v) @ w_o[h]
        attn = attn + jnp.dot(jnp.dot(p, v, preferred_element_type=f32), wo[h],
                              preferred_element_type=f32)
    x = x + attn

    # ---- feedforward (PreNorm) ----
    xn = _ln_rows(x, ln2g_ref[0].astype(f32), ln2b_ref[0].astype(f32), eps)
    h1 = jnp.dot(xn, wff1_ref[0].astype(f32),
                 preferred_element_type=f32) + bff1_ref[0].astype(f32)
    # TODO(synk): nn.GELU defaults to exact erf; tanh approximation used for lowering safety.
    h1 = jax.nn.gelu(h1, approximate=True)
    x = x + jnp.dot(h1, wff2_ref[0].astype(f32),
                    preferred_element_type=f32) + bff2_ref[0].astype(f32)
    return x


# ----------------------------------------------------------------------------
# BlockSpec helpers
# ----------------------------------------------------------------------------

_LAYER_KEYS = ("ln1g", "ln1b", "wq", "wkT", "wv", "wo", "bo",
               "ln2g", "ln2b", "wff1", "bff1", "wff2", "bff2")


def _per_batch_spec(arr):
    nrest = arr.ndim - 1
    def imap(b, l, _n=nrest):
        return (b,) + (0,) * _n
    return pl.BlockSpec((1,) + tuple(arr.shape[1:]), imap)


def _per_layer_spec(arr):
    nrest = arr.ndim - 1
    def imap(b, l, _n=nrest):
        return (l,) + (0,) * _n
    return pl.BlockSpec((1,) + tuple(arr.shape[1:]), imap)


def _shared_spec(arr):
    nd = arr.ndim
    def imap(b, l, _n=nd):
        return (0,) * _n
    return pl.BlockSpec(tuple(arr.shape), imap)


# ----------------------------------------------------------------------------
# Encoder mega-kernel: embed + pos + gather(unmasked) + all layers + final LN
# grid = (batch, depth); batch "parallel", depth "arbitrary"
# ----------------------------------------------------------------------------

def _enc_kernel(skel_ref, selu_ref, wpe_ref, bpe_ref, pos_ref,
                ln1g_ref, ln1b_ref, wq_ref, wkT_ref, wv_ref, wo_ref, bo_ref,
                ln2g_ref, ln2b_ref, wff1_ref, bff1_ref, wff2_ref, bff2_ref,
                fg_ref, fb_ref,
                o_ref, x_scr,
                *, heads, dim_head, eps):
    f32 = jnp.float32
    l = pl.program_id(1)
    last = pl.num_programs(1) - 1

    @pl.when(l == 0)
    def _():
        # patch embedding + bias + positional embedding for all patches
        tok = jnp.dot(skel_ref[0].astype(f32), wpe_ref[...].astype(f32),
                      preferred_element_type=f32)
        tok = tok + bpe_ref[...].astype(f32) + pos_ref[0].astype(f32)          # (N, D)
        # gather the unmasked rows via a one-hot selection matmul
        x_scr[...] = jnp.dot(selu_ref[0].astype(f32), tok,
                             preferred_element_type=f32)                        # (n_unmask, D)

    x = _layer_body(x_scr[...],
                    ln1g_ref, ln1b_ref, wq_ref, wkT_ref, wv_ref, wo_ref, bo_ref,
                    ln2g_ref, ln2b_ref, wff1_ref, bff1_ref, wff2_ref, bff2_ref,
                    heads=heads, dim_head=dim_head, eps=eps)
    x_scr[...] = x

    @pl.when(l == last)
    def _():
        y = _ln_rows(x, fg_ref[...].astype(f32), fb_ref[...].astype(f32), eps)
        o_ref[0] = y.astype(o_ref.dtype)


def encoder_stack_call(skel, sel_u, kp, cfg, eps=1e-5):
    B, N, P = skel.shape
    D = kp["w_pe"].shape[1]
    n_unmask = sel_u.shape[1]
    lw = kp["enc_lw"]
    depth = lw["wq"].shape[0]
    layer_arrays = [lw[k] for k in _LAYER_KEYS]

    kernel = functools.partial(_enc_kernel, heads=cfg["enc_heads"],
                               dim_head=cfg["enc_dim_head"], eps=eps)
    return pl.pallas_call(
        kernel,
        out_shape=jax.ShapeDtypeStruct((B, n_unmask, D), skel.dtype),
        grid=(B, depth),
        in_specs=([_per_batch_spec(skel), _per_batch_spec(sel_u),
                   _shared_spec(kp["w_pe"]), _shared_spec(kp["b_pe"]),
                   _shared_spec(kp["pos_embedding"])]
                  + [_per_layer_spec(a) for a in layer_arrays]
                  + [_shared_spec(kp["enc_fg"]), _shared_spec(kp["enc_fb"])]),
        out_specs=pl.BlockSpec((1, n_unmask, D), lambda b, l: (b, 0, 0)),
        scratch_shapes=[pltpu.VMEM((n_unmask, D), jnp.float32)],
        compiler_params=pltpu.CompilerParams(
            dimension_semantics=("parallel", "arbitrary")),
    )(skel, sel_u, kp["w_pe"], kp["b_pe"], kp["pos_embedding"],
      *layer_arrays, kp["enc_fg"], kp["enc_fb"])


# ----------------------------------------------------------------------------
# Decoder mega-kernel: e2d proj + dec pos + mask tokens + concat + all layers
#                      + final LN + prediction head + skel_masked gather + MSE partials
# grid = (batch, depth); batch "parallel", depth "arbitrary"
# ----------------------------------------------------------------------------

def _dec_kernel(enc_ref, skel_ref, sel_ref, e_ref, mind_ref,
                we2d_ref, be2d_ref, mtok_ref, dpos_ref,
                ln1g_ref, ln1b_ref, wq_ref, wkT_ref, wv_ref, wo_ref, bo_ref,
                ln2g_ref, ln2b_ref, wff1_ref, bff1_ref, wff2_ref, bff2_ref,
                fg_ref, fb_ref, wpred_ref, bpred_ref,
                pred_ref, skm_ref, loss_ref, x_scr,
                *, heads, dim_head, eps, n_mask):
    f32 = jnp.float32
    l = pl.program_id(1)
    last = pl.num_programs(1) - 1

    @pl.when(l == 0)
    def _():
        # enc -> dec projection
        enc = enc_ref[0].astype(f32)                                            # (n_unmask, De)
        dec_tok = jnp.dot(enc, we2d_ref[...].astype(f32),
                          preferred_element_type=f32) + be2d_ref[...].astype(f32)
        dpos = dpos_ref[...].astype(f32)                                        # (N, Dd)
        # decoder input in [masked ; unmasked] order, built from aligned matmuls:
        #   rows < n_mask : mask_token + dec_pos[masked_idx]
        #   rows >= n_mask: dec_tok    + dec_pos[unmasked_idx]
        x0 = jnp.dot(sel_ref[0].astype(f32), dpos, preferred_element_type=f32)   # pos part
        x0 = x0 + jnp.dot(e_ref[...].astype(f32), dec_tok,
                          preferred_element_type=f32)                            # placed dec_tok
        x0 = x0 + mind_ref[...].astype(f32) * mtok_ref[...].astype(f32)          # mask token rows
        x_scr[...] = x0

    x = _layer_body(x_scr[...],
                    ln1g_ref, ln1b_ref, wq_ref, wkT_ref, wv_ref, wo_ref, bo_ref,
                    ln2g_ref, ln2b_ref, wff1_ref, bff1_ref, wff2_ref, bff2_ref,
                    heads=heads, dim_head=dim_head, eps=eps)
    x_scr[...] = x

    @pl.when(l == last)
    def _():
        # final LN is row-wise, so slice the masked rows first, then normalize
        y = _ln_rows(x[0:n_mask, :], fg_ref[...].astype(f32), fb_ref[...].astype(f32), eps)
        pred = jnp.dot(y, wpred_ref[...].astype(f32),
                       preferred_element_type=f32) + bpred_ref[...].astype(f32)  # (n_mask, P)
        pred_ref[0] = pred.astype(pred_ref.dtype)
        # gather the masked ground-truth patches (first n_mask rows of the selection matrix)
        skm = jnp.dot(sel_ref[0].astype(f32)[0:n_mask, :], skel_ref[0].astype(f32),
                      preferred_element_type=f32)                                # (n_mask, P)
        skm_ref[0] = skm.astype(skm_ref.dtype)
        # per-batch partial sum of squared errors (batch axis is parallel -> combine outside)
        d = pred - skm
        loss_ref[0] = jnp.sum(d * d, keepdims=True)


def decoder_stack_call(encoded, skel, sel_all, kp, cfg, n_mask, eps=1e-5):
    B, N, P = skel.shape
    n_unmask = encoded.shape[1]
    Dd = kp["w_e2d"].shape[1]
    lw = kp["dec_lw"]
    depth = lw["wq"].shape[0]
    layer_arrays = [lw[k] for k in _LAYER_KEYS]

    # host constants (baked into the jit program): placement matrix for the unmasked tokens
    # and the masked-row indicator used to broadcast the mask token.
    E_np = np.zeros((N, n_unmask), np.float32)
    E_np[n_mask:, :] = np.eye(n_unmask, dtype=np.float32)
    mind_np = np.zeros((N, 1), np.float32)
    mind_np[:n_mask, 0] = 1.0
    E = jnp.asarray(E_np)
    m_ind = jnp.asarray(mind_np)

    kernel = functools.partial(_dec_kernel, heads=cfg["dec_heads"],
                               dim_head=cfg["dec_dim_head"], eps=eps, n_mask=n_mask)
    out_shapes = (jax.ShapeDtypeStruct((B, n_mask, P), skel.dtype),
                  jax.ShapeDtypeStruct((B, n_mask, P), skel.dtype),
                  jax.ShapeDtypeStruct((B, 1, 1), jnp.float32))
    out_specs = (pl.BlockSpec((1, n_mask, P), lambda b, l: (b, 0, 0)),
                 pl.BlockSpec((1, n_mask, P), lambda b, l: (b, 0, 0)),
                 pl.BlockSpec((1, 1, 1), lambda b, l: (b, 0, 0)))
    return pl.pallas_call(
        kernel,
        out_shape=out_shapes,
        grid=(B, depth),
        in_specs=([_per_batch_spec(encoded), _per_batch_spec(skel), _per_batch_spec(sel_all),
                   _shared_spec(E), _shared_spec(m_ind),
                   _shared_spec(kp["w_e2d"]), _shared_spec(kp["b_e2d"]),
                   _shared_spec(kp["mask_token"]), _shared_spec(kp["dec_pos_table"])]
                  + [_per_layer_spec(a) for a in layer_arrays]
                  + [_shared_spec(kp["dec_fg"]), _shared_spec(kp["dec_fb"]),
                     _shared_spec(kp["w_pred"]), _shared_spec(kp["b_pred"])]),
        out_specs=out_specs,
        scratch_shapes=[pltpu.VMEM((N, Dd), jnp.float32)],
        compiler_params=pltpu.CompilerParams(
            dimension_semantics=("parallel", "arbitrary")),
    )(encoded, skel, sel_all, E, m_ind, kp["w_e2d"], kp["b_e2d"],
      kp["mask_token"], kp["dec_pos_table"], *layer_arrays,
      kp["dec_fg"], kp["dec_fb"], kp["w_pred"], kp["b_pred"])


# ----------------------------------------------------------------------------
# Param preparation (done once, outside the jitted forward): per-head weight split,
# k-weight pre-transpose, per-layer stacking, bias reshapes.
# ----------------------------------------------------------------------------

def _prep_layer_stack(layers, heads, dim_head):
    depth = len(layers)
    D = layers[0]["w_qkv"].shape[0]
    inner = heads * dim_head
    mlp = layers[0]["w_ff1"].shape[1]

    def stack(key):
        return jnp.stack([lp[key] for lp in layers])

    w_qkv = stack("w_qkv")                                                       # (depth, D, 3*inner)
    wq = w_qkv[:, :, :inner].reshape(depth, D, heads, dim_head).transpose(0, 2, 1, 3)
    wkT = w_qkv[:, :, inner:2 * inner].reshape(depth, D, heads, dim_head).transpose(0, 2, 3, 1)
    wv = w_qkv[:, :, 2 * inner:].reshape(depth, D, heads, dim_head).transpose(0, 2, 1, 3)
    wo = stack("w_out").reshape(depth, heads, dim_head, D)
    return dict(
        ln1g=stack("attn_ln_g").reshape(depth, 1, D),
        ln1b=stack("attn_ln_b").reshape(depth, 1, D),
        wq=wq, wkT=wkT, wv=wv, wo=wo,
        bo=stack("b_out").reshape(depth, 1, D),
        ln2g=stack("ff_ln_g").reshape(depth, 1, D),
        ln2b=stack("ff_ln_b").reshape(depth, 1, D),
        wff1=stack("w_ff1"),
        bff1=stack("b_ff1").reshape(depth, 1, mlp),
        wff2=stack("w_ff2"),
        bff2=stack("b_ff2").reshape(depth, 1, D),
    )


def prepare_kernel_params(params, cfg):
    enc_dim = params["w_pe"].shape[1]
    dec_dim = params["w_e2d"].shape[1]
    patch_dim = params["w_pred"].shape[1]
    return dict(
        w_pe=params["w_pe"],
        b_pe=params["b_pe"].reshape(1, enc_dim),
        pos_embedding=params["pos_embedding"],
        enc_lw=_prep_layer_stack(params["enc_layers"], cfg["enc_heads"], cfg["enc_dim_head"]),
        enc_fg=params["enc_final_g"].reshape(1, enc_dim),
        enc_fb=params["enc_final_b"].reshape(1, enc_dim),
        w_e2d=params["w_e2d"],
        b_e2d=params["b_e2d"].reshape(1, dec_dim),
        mask_token=params["mask_token"].reshape(1, dec_dim),
        dec_pos_table=params["dec_pos_table"],
        dec_lw=_prep_layer_stack(params["dec_layers"], cfg["dec_heads"], cfg["dec_dim_head"]),
        dec_fg=params["dec_final_g"].reshape(1, dec_dim),
        dec_fb=params["dec_final_b"].reshape(1, dec_dim),
        w_pred=params["w_pred"],
        b_pred=params["b_pred"].reshape(1, patch_dim),
    )


# ----------------------------------------------------------------------------
# DMaeV5 forward (Pallas): 2 pallas_calls + tiny one_hot / final-sum glue
# ----------------------------------------------------------------------------

def dmae_forward(kp, skel_data, masked_indices, unmasked_indices, cfg):
    B, N, P = skel_data.shape
    n_mask = masked_indices.shape[1]

    # tiny selection matrices derived from the (runtime) index arrays
    sel_u = jax.nn.one_hot(unmasked_indices, N, dtype=jnp.float32)               # (B, n_unmask, N)
    order = jnp.concatenate([masked_indices, unmasked_indices], axis=1)          # (B, N)
    sel_all = jax.nn.one_hot(order, N, dtype=jnp.float32)                        # (B, N, N)

    encoded = encoder_stack_call(skel_data, sel_u, kp, cfg)                      # (B, n_unmask, enc_dim)
    pred, skel_masked, loss_parts = decoder_stack_call(encoded, skel_data, sel_all,
                                                       kp, cfg, n_mask)
    recon_loss = jnp.sum(loss_parts) / float(B * n_mask * P)
    return pred, skel_masked, masked_indices, recon_loss


# ----------------------------------------------------------------------------
# Pure-JAX reference (for correctness check)
# ----------------------------------------------------------------------------

def _ref_linear(x, w, b=None, activation=None):
    y = jnp.einsum("...k,kn->...n", x, w, precision=jax.lax.Precision.HIGHEST)
    if b is not None:
        y = y + b
    if activation == "gelu":
        y = jax.nn.gelu(y, approximate=True)
    return y


def _ref_layernorm(x, g, b, eps=1e-5):
    mu = jnp.mean(x, -1, keepdims=True)
    var = jnp.mean((x - mu) ** 2, -1, keepdims=True)
    return (x - mu) * jax.lax.rsqrt(var + eps) * g + b


def _ref_transformer(x, layers, fg, fb, heads, dim_head):
    B, N, D = x.shape
    scale = dim_head ** -0.5
    for lp in layers:
        xn = _ref_layernorm(x, lp["attn_ln_g"], lp["attn_ln_b"])
        qkv = _ref_linear(xn, lp["w_qkv"]).reshape(B, N, 3, heads, dim_head)
        q = jnp.transpose(qkv[:, :, 0], (0, 2, 1, 3))
        k = jnp.transpose(qkv[:, :, 1], (0, 2, 1, 3))
        v = jnp.transpose(qkv[:, :, 2], (0, 2, 1, 3))
        s = jnp.einsum("bhqd,bhkd->bhqk", q, k, precision=jax.lax.Precision.HIGHEST) * scale
        p = jax.nn.softmax(s, axis=-1)
        o = jnp.einsum("bhqk,bhkd->bhqd", p, v, precision=jax.lax.Precision.HIGHEST)
        o = jnp.transpose(o, (0, 2, 1, 3)).reshape(B, N, heads * dim_head)
        x = x + _ref_linear(o, lp["w_out"], lp["b_out"])
        xn = _ref_layernorm(x, lp["ff_ln_g"], lp["ff_ln_b"])
        x = x + _ref_linear(_ref_linear(xn, lp["w_ff1"], lp["b_ff1"], activation="gelu"),
                            lp["w_ff2"], lp["b_ff2"])
    return _ref_layernorm(x, fg, fb)


def ref_forward(params, skel_data, masked_indices, unmasked_indices, cfg):
    B, N, P = skel_data.shape
    num_masked = masked_indices.shape[1]
    batch_range = jnp.arange(B)[:, None]
    tokens = _ref_linear(skel_data, params["w_pe"], params["b_pe"]) + params["pos_embedding"]
    unmasked_tokens = tokens[batch_range, unmasked_indices]
    skel_masked = skel_data[batch_range, masked_indices]
    encoded = _ref_transformer(unmasked_tokens, params["enc_layers"],
                               params["enc_final_g"], params["enc_final_b"],
                               cfg["enc_heads"], cfg["enc_dim_head"])
    dec_tokens = _ref_linear(encoded, params["w_e2d"], params["b_e2d"])
    dec_tokens = dec_tokens + params["dec_pos_table"][unmasked_indices]
    mask_tokens = params["mask_token"][None, None, :] + params["dec_pos_table"][masked_indices]
    dec_in = jnp.concatenate([mask_tokens, dec_tokens], axis=1)
    decoded = _ref_transformer(dec_in, params["dec_layers"],
                               params["dec_final_g"], params["dec_final_b"],
                               cfg["dec_heads"], cfg["dec_dim_head"])
    pred = _ref_linear(decoded[:, :num_masked], params["w_pred"], params["b_pred"])
    loss = jnp.mean((pred - skel_masked) ** 2)
    return pred, skel_masked, masked_indices, loss


# ----------------------------------------------------------------------------
# Deterministic parameter init (synthetic; no checkpoint loading)
# ----------------------------------------------------------------------------

def init_params(key, *, num_patches, patch_dim, enc_dim, dec_dim,
                enc_depth, enc_heads, enc_dim_head,
                dec_depth, dec_heads, dec_dim_head):
    keys = iter(jax.random.split(key, 128))

    def dense(din, dout, scale=0.02):
        return scale * jax.random.normal(next(keys), (din, dout), jnp.float32)

    def vec(d, scale=0.02):
        return scale * jax.random.normal(next(keys), (d,), jnp.float32)

    def tx(dim, depth, heads, dim_head, mlp_dim):
        layers = []
        inner = heads * dim_head
        for _ in range(depth):
            layers.append(dict(
                attn_ln_g=jnp.ones((dim,), jnp.float32),
                attn_ln_b=jnp.zeros((dim,), jnp.float32),
                w_qkv=dense(dim, 3 * inner),
                w_out=dense(inner, dim),
                b_out=vec(dim),
                ff_ln_g=jnp.ones((dim,), jnp.float32),
                ff_ln_b=jnp.zeros((dim,), jnp.float32),
                w_ff1=dense(dim, mlp_dim),
                b_ff1=vec(mlp_dim),
                w_ff2=dense(mlp_dim, dim),
                b_ff2=vec(dim),
            ))
        return layers

    params = dict(
        w_pe=dense(patch_dim, enc_dim),
        b_pe=vec(enc_dim),
        pos_embedding=0.02 * jax.random.normal(next(keys), (1, num_patches, enc_dim), jnp.float32),
        enc_layers=tx(enc_dim, enc_depth, enc_heads, enc_dim_head, enc_dim * 4),
        enc_final_g=jnp.ones((enc_dim,), jnp.float32),
        enc_final_b=jnp.zeros((enc_dim,), jnp.float32),
        w_e2d=dense(enc_dim, dec_dim),
        b_e2d=vec(dec_dim),
        mask_token=jax.random.normal(next(keys), (dec_dim,), jnp.float32),
        dec_layers=tx(dec_dim, dec_depth, dec_heads, dec_dim_head, dec_dim * 4),
        dec_final_g=jnp.ones((dec_dim,), jnp.float32),
        dec_final_b=jnp.zeros((dec_dim,), jnp.float32),
        dec_pos_table=0.02 * jax.random.normal(next(keys), (num_patches, dec_dim), jnp.float32),
        w_pred=dense(dec_dim, patch_dim),
        b_pred=vec(patch_dim),
    )
    return params


# ----------------------------------------------------------------------------
# Main
# ----------------------------------------------------------------------------

if __name__ == "__main__":
    # small shapes consistent with DMaeV5's forward
    B, NUM_PATCHES, PATCH_DIM = 2, 16, 24
    ENC_DIM, DEC_DIM = 32, 24
    MASKING_RATIO = 0.75
    cfg = dict(enc_heads=4, enc_dim_head=8, dec_heads=4, dec_dim_head=8)

    num_masked = int(MASKING_RATIO * NUM_PATCHES)      # 12

    key = jax.random.PRNGKey(0)
    k_data, k_mask, k_param = jax.random.split(key, 3)

    skel_data = jax.random.normal(k_data, (B, NUM_PATCHES, PATCH_DIM), jnp.float32)

    # random masking (torch.rand(...).argsort equivalent) — plain-JAX glue
    rand = jax.random.uniform(k_mask, (B, NUM_PATCHES))
    rand_indices = jnp.argsort(rand, axis=-1).astype(jnp.int32)
    masked_indices = rand_indices[:, :num_masked]
    unmasked_indices = rand_indices[:, num_masked:]

    params = init_params(k_param, num_patches=NUM_PATCHES, patch_dim=PATCH_DIM,
                         enc_dim=ENC_DIM, dec_dim=DEC_DIM,
                         enc_depth=1, enc_heads=cfg["enc_heads"], enc_dim_head=cfg["enc_dim_head"],
                         dec_depth=1, dec_heads=cfg["dec_heads"], dec_dim_head=cfg["dec_dim_head"])

    # one-time restructuring of weights into kernel-ready layout (outside the jitted forward)
    kparams = prepare_kernel_params(params, cfg)

    fwd = jax.jit(functools.partial(dmae_forward, cfg=cfg))
    pred, skel_masked, m_idx, loss = fwd(kparams, skel_data, masked_indices, unmasked_indices)
    jax.block_until_ready((pred, skel_masked, m_idx, loss))

    # correctness check against pure-JAX reference
    r_pred, r_masked, _, r_loss = ref_forward(params, skel_data, masked_indices, unmasked_indices, cfg)
    np.testing.assert_allclose(np.asarray(pred), np.asarray(r_pred), rtol=2e-2, atol=2e-3)
    np.testing.assert_allclose(np.asarray(skel_masked), np.asarray(r_masked), rtol=1e-6, atol=1e-6)
    np.testing.assert_allclose(float(loss), float(r_loss), rtol=2e-2, atol=2e-3)

    print("KERNEL_OK")
</pallas_src>

<mosaic_0001>
module attributes {stable_mosaic.version = 11 : i64} {
  func.func @_enc_kernel(%arg0: i32, %arg1: i32, %arg2: memref<1x16x24xf32, #tpu.memory_space<vmem>>, %arg3: memref<1x4x16xf32, #tpu.memory_space<vmem>>, %arg4: memref<24x32xf32, #tpu.memory_space<vmem>>, %arg5: memref<1x32xf32, #tpu.memory_space<vmem>>, %arg6: memref<1x16x32xf32, #tpu.memory_space<vmem>>, %arg7: memref<1x1x32xf32, #tpu.memory_space<vmem>>, %arg8: memref<1x1x32xf32, #tpu.memory_space<vmem>>, %arg9: memref<1x4x32x8xf32, #tpu.memory_space<vmem>>, %arg10: memref<1x4x8x32xf32, #tpu.memory_space<vmem>>, %arg11: memref<1x4x32x8xf32, #tpu.memory_space<vmem>>, %arg12: memref<1x4x8x32xf32, #tpu.memory_space<vmem>>, %arg13: memref<1x1x32xf32, #tpu.memory_space<vmem>>, %arg14: memref<1x1x32xf32, #tpu.memory_space<vmem>>, %arg15: memref<1x1x32xf32, #tpu.memory_space<vmem>>, %arg16: memref<1x32x128xf32, #tpu.memory_space<vmem>>, %arg17: memref<1x1x128xf32, #tpu.memory_space<vmem>>, %arg18: memref<1x128x32xf32, #tpu.memory_space<vmem>>, %arg19: memref<1x1x32xf32, #tpu.memory_space<vmem>>, %arg20: memref<1x32xf32, #tpu.memory_space<vmem>>, %arg21: memref<1x32xf32, #tpu.memory_space<vmem>>, %arg22: memref<1x4x32xf32, #tpu.memory_space<vmem>>, %arg23: memref<4x32xf32, #tpu.memory_space<vmem>>) attributes {dimension_semantics = [#tpu.dimension_semantics<parallel>, #tpu.dimension_semantics<arbitrary>], iteration_bounds = array<i64: 2, 1>, scalar_prefetch = 0 : i64, scratch_operands = 1 : i64, tpu.core_type = #tpu.core_type<tc>, window_params = [{transform_indices = @transform_0, window_bounds = array<i64: 1, 16, 24>}, {transform_indices = @transform_1, window_bounds = array<i64: 1, 4, 16>}, {pipeline_mode = #tpu.pipeline_mode<synchronous>, transform_indices = @transform_2, window_bounds = array<i64: 24, 32>}, {pipeline_mode = #tpu.pipeline_mode<synchronous>, transform_indices = @transform_3, window_bounds = array<i64: 1, 32>}, {pipeline_mode = #tpu.pipeline_mode<synchronous>, transform_indices = @transform_4, window_bounds = array<i64: 1, 16, 32>}, {transform_indices = @transform_5, window_bounds = array<i64: 1, 1, 32>}, {transform_indices = @transform_6, window_bounds = array<i64: 1, 1, 32>}, {transform_indices = @transform_7, window_bounds = array<i64: 1, 4, 32, 8>}, {transform_indices = @transform_8, window_bounds = array<i64: 1, 4, 8, 32>}, {transform_indices = @transform_9, window_bounds = array<i64: 1, 4, 32, 8>}, {transform_indices = @transform_10, window_bounds = array<i64: 1, 4, 8, 32>}, {transform_indices = @transform_11, window_bounds = array<i64: 1, 1, 32>}, {transform_indices = @transform_12, window_bounds = array<i64: 1, 1, 32>}, {transform_indices = @transform_13, window_bounds = array<i64: 1, 1, 32>}, {transform_indices = @transform_14, window_bounds = array<i64: 1, 32, 128>}, {transform_indices = @transform_15, window_bounds = array<i64: 1, 1, 128>}, {transform_indices = @transform_16, window_bounds = array<i64: 1, 128, 32>}, {transform_indices = @transform_17, window_bounds = array<i64: 1, 1, 32>}, {pipeline_mode = #tpu.pipeline_mode<synchronous>, transform_indices = @transform_18, window_bounds = array<i64: 1, 32>}, {pipeline_mode = #tpu.pipeline_mode<synchronous>, transform_indices = @transform_19, window_bounds = array<i64: 1, 32>}, {transform_indices = @transform_20, window_bounds = array<i64: 1, 4, 32>}]} {
    %c0_i32 = arith.constant 0 : i32
    %0 = arith.cmpi eq, %arg1, %c0_i32 : i32
    %1 = arith.extui %0 : i1 to i32
    %c0_i32_0 = arith.constant 0 : i32
    %2 = arith.cmpi ne, %1, %c0_i32_0 : i32
    scf.if %2 {
      %c0_100 = arith.constant 0 : index
      %c0_101 = arith.constant 0 : index
      %c0_102 = arith.constant 0 : index
      %208 = vector.load %arg2[%c0_100, %c0_101, %c0_102] : memref<1x16x24xf32, #tpu.memory_space<vmem>>, vector<1x16x24xf32>
      %209 = vector.shape_cast %208 : vector<1x16x24xf32> to vector<16x24xf32>
      %c0_103 = arith.constant 0 : index
      %c0_104 = arith.constant 0 : index
      %210 = vector.load %arg4[%c0_103, %c0_104] : memref<24x32xf32, #tpu.memory_space<vmem>>, vector<24x32xf32>
      %cst_105 = arith.constant dense<0.000000e+00> : vector<16x32xf32>
      %211 = tpu.matmul %209, %210, %cst_105 {dimension_numbers = #tpu.dot_dimension_numbers<[1], [0], [0], [1], [0, 0, 1, 1], [], []>} : vector<16x24xf32>, vector<24x32xf32>, vector<16x32xf32> -> vector<16x32xf32>
      %c0_106 = arith.constant 0 : index
      %c0_107 = arith.constant 0 : index
      %212 = vector.load %arg5[%c0_106, %c0_107] : memref<1x32xf32, #tpu.memory_space<vmem>>, vector<1x32xf32>
      %213 = vector.broadcast %212 : vector<1x32xf32> to vector<16x32xf32>
      %214 = arith.addf %211, %213 : vector<16x32xf32>
      %c0_108 = arith.constant 0 : index
      %c0_109 = arith.constant 0 : index
      %c0_110 = arith.constant 0 : index
      %215 = vector.load %arg6[%c0_108, %c0_109, %c0_110] : memref<1x16x32xf32, #tpu.memory_space<vmem>>, vector<1x16x32xf32>
      %216 = vector.shape_cast %215 : vector<1x16x32xf32> to vector<16x32xf32>
      %217 = arith.addf %214, %216 : vector<16x32xf32>
      %c0_111 = arith.constant 0 : index
      %c0_112 = arith.constant 0 : index
      %c0_113 = arith.constant 0 : index
      %218 = vector.load %arg3[%c0_111, %c0_112, %c0_113] : memref<1x4x16xf32, #tpu.memory_space<vmem>>, vector<1x4x16xf32>
      %219 = vector.shape_cast %218 : vector<1x4x16xf32> to vector<4x16xf32>
      %cst_114 = arith.constant dense<0.000000e+00> : vector<4x32xf32>
      %220 = tpu.matmul %219, %217, %cst_114 {dimension_numbers = #tpu.dot_dimension_numbers<[1], [0], [0], [1], [0, 0, 1, 1], [], []>} : vector<4x16xf32>, vector<16x32xf32>, vector<4x32xf32> -> vector<4x32xf32>
      %c0_115 = arith.constant 0 : index
      %c0_116 = arith.constant 0 : index
      %221 = vector.load %arg23[%c0_115, %c0_116] : memref<4x32xf32, #tpu.memory_space<vmem>>, vector<4x32xf32>
      tpu.vector_store %arg23[%c0_115, %c0_116], %220 {strides = array<i32>} : memref<4x32xf32, #tpu.memory_space<vmem>>, vector<4x32xf32>,
    } else {
    }
    %c0 = arith.constant 0 : index
    %c0_1 = arith.constant 0 : index
    %3 = vector.load %arg23[%c0, %c0_1] : memref<4x32xf32, #tpu.memory_space<vmem>>, vector<4x32xf32>
    %c0_2 = arith.constant 0 : index
    %c0_3 = arith.constant 0 : index
    %c0_4 = arith.constant 0 : index
    %4 = vector.load %arg7[%c0_2, %c0_3, %c0_4] : memref<1x1x32xf32, #tpu.memory_space<vmem>>, vector<1x1x32xf32>
    %5 = vector.shape_cast %4 : vector<1x1x32xf32> to vector<1x32xf32>
    %c0_5 = arith.constant 0 : index
    %c0_6 = arith.constant 0 : index
    %c0_7 = arith.constant 0 : index
    %6 = vector.load %arg8[%c0_5, %c0_6, %c0_7] : memref<1x1x32xf32, #tpu.memory_space<vmem>>, vector<1x1x32xf32>
    %7 = vector.shape_cast %6 : vector<1x1x32xf32> to vector<1x32xf32>
    %cst = arith.constant dense<0.000000e+00> : vector<4xf32>
    %8 = vector.multi_reduction <add>, %3, %cst [1] : vector<4x32xf32> to vector<4xf32>
    %9 = vector.shape_cast %8 : vector<4xf32> to vector<4x1xf32>
    %cst_8 = arith.constant 3.200000e+01 : f32
    %10 = vector.broadcast %cst_8 : f32 to vector<4x1xf32>
    %11 = arith.divf %9, %10 : vector<4x1xf32>
    %12 = vector.broadcast %11 : vector<4x1xf32> to vector<4x32xf32>
    %13 = arith.subf %3, %12 : vector<4x32xf32>
    %14 = arith.mulf %13, %13 : vector<4x32xf32>
    %cst_9 = arith.constant dense<0.000000e+00> : vector<4xf32>
    %15 = vector.multi_reduction <add>, %14, %cst_9 [1] : vector<4x32xf32> to vector<4xf32>
    %16 = vector.shape_cast %15 : vector<4xf32> to vector<4x1xf32>
    %cst_10 = arith.constant 3.200000e+01 : f32
    %17 = vector.broadcast %cst_10 : f32 to vector<4x1xf32>
    %18 = arith.divf %16, %17 : vector<4x1xf32>
    %19 = vector.broadcast %11 : vector<4x1xf32> to vector<4x32xf32>
    %20 = arith.subf %3, %19 : vector<4x32xf32>
    %cst_11 = arith.constant 9.99999974E-6 : f32
    %21 = vector.broadcast %cst_11 : f32 to vector<4x1xf32>
    %22 = arith.addf %18, %21 : vector<4x1xf32>
    %23 = math.rsqrt %22 : vector<4x1xf32>
    %24 = vector.broadcast %23 : vector<4x1xf32> to vector<4x32xf32>
    %25 = arith.mulf %20, %24 : vector<4x32xf32>
    %26 = vector.broadcast %5 : vector<1x32xf32> to vector<4x32xf32>
    %27 = arith.mulf %25, %26 : vector<4x32xf32>
    %28 = vector.broadcast %7 : vector<1x32xf32> to vector<4x32xf32>
    %29 = arith.addf %27, %28 : vector<4x32xf32>
    %c0_12 = arith.constant 0 : index
    %c0_13 = arith.constant 0 : index
    %c0_14 = arith.constant 0 : index
    %c0_15 = arith.constant 0 : index
    %30 = vector.load %arg9[%c0_12, %c0_13, %c0_14, %c0_15] : memref<1x4x32x8xf32, #tpu.memory_space<vmem>>, vector<1x4x32x8xf32>
    %31 = vector.shape_cast %30 : vector<1x4x32x8xf32> to vector<4x32x8xf32>
    %c0_16 = arith.constant 0 : index
    %c0_17 = arith.constant 0 : index
    %c0_18 = arith.constant 0 : index
    %c0_19 = arith.constant 0 : index
    %32 = vector.load %arg10[%c0_16, %c0_17, %c0_18, %c0_19] : memref<1x4x8x32xf32, #tpu.memory_space<vmem>>, vector<1x4x8x32xf32>
    %33 = vector.shape_cast %32 : vector<1x4x8x32xf32> to vector<4x8x32xf32>
    %c0_20 = arith.constant 0 : index
    %c0_21 = arith.constant 0 : index
    %c0_22 = arith.constant 0 : index
    %c0_23 = arith.constant 0 : index
    %34 = vector.load %arg11[%c0_20, %c0_21, %c0_22, %c0_23] : memref<1x4x32x8xf32, #tpu.memory_space<vmem>>, vector<1x4x32x8xf32>
    %35 = vector.shape_cast %34 : vector<1x4x32x8xf32> to vector<4x32x8xf32>
    %c0_24 = arith.constant 0 : index
    %c0_25 = arith.constant 0 : index
    %c0_26 = arith.constant 0 : index
    %c0_27 = arith.constant 0 : index
    %36 = vector.load %arg12[%c0_24, %c0_25, %c0_26, %c0_27] : memref<1x4x8x32xf32, #tpu.memory_space<vmem>>, vector<1x4x8x32xf32>
    %37 = vector.shape_cast %36 : vector<1x4x8x32xf32> to vector<4x8x32xf32>
    %c0_28 = arith.constant 0 : index
    %c0_29 = arith.constant 0 : index
    %c0_30 = arith.constant 0 : index
    %38 = vector.load %arg13[%c0_28, %c0_29, %c0_30] : memref<1x1x32xf32, #tpu.memory_space<vmem>>, vector<1x1x32xf32>
    %39 = vector.shape_cast %38 : vector<1x1x32xf32> to vector<1x32xf32>
    %40 = vector.extract_strided_slice %31 {offsets = [0, 0, 0], sizes = [1, 32, 8], strides = [1, 1, 1]} : vector<4x32x8xf32> to vector<1x32x8xf32>
    %41 = vector.shape_cast %40 : vector<1x32x8xf32> to vector<32x8xf32>
    %cst_31 = arith.constant dense<0.000000e+00> : vector<4x8xf32>
    %42 = tpu.matmul %29, %41, %cst_31 {dimension_numbers = #tpu.dot_dimension_numbers<[1], [0], [0], [1], [0, 0, 1, 1], [], []>} : vector<4x32xf32>, vector<32x8xf32>, vector<4x8xf32> -> vector<4x8xf32>
    %43 = vector.extract_strided_slice %33 {offsets = [0, 0, 0], sizes = [1, 8, 32], strides = [1, 1, 1]} : vector<4x8x32xf32> to vector<1x8x32xf32>
    %44 = vector.shape_cast %43 : vector<1x8x32xf32> to vector<8x32xf32>
    %cst_32 = arith.constant dense<0.000000e+00> : vector<8x4xf32>
    %45 = tpu.matmul %44, %29, %cst_32 {dimension_numbers = #tpu.dot_dimension_numbers<[1], [1], [0], [0], [0, 0, 1, 0], [], []>} : vector<8x32xf32>, vector<4x32xf32>, vector<8x4xf32> -> vector<8x4xf32>
    %46 = vector.extract_strided_slice %35 {offsets = [0, 0, 0], sizes = [1, 32, 8], strides = [1, 1, 1]} : vector<4x32x8xf32> to vector<1x32x8xf32>
    %47 = vector.shape_cast %46 : vector<1x32x8xf32> to vector<32x8xf32>
    %cst_33 = arith.constant dense<0.000000e+00> : vector<4x8xf32>
    %48 = tpu.matmul %29, %47, %cst_33 {dimension_numbers = #tpu.dot_dimension_numbers<[1], [0], [0], [1], [0, 0, 1, 1], [], []>} : vector<4x32xf32>, vector<32x8xf32>, vector<4x8xf32> -> vector<4x8xf32>
    %cst_34 = arith.constant dense<0.000000e+00> : vector<4x4xf32>
    %49 = tpu.matmul %42, %45, %cst_34 {dimension_numbers = #tpu.dot_dimension_numbers<[1], [0], [0], [1], [0, 0, 1, 1], [], []>} : vector<4x8xf32>, vector<8x4xf32>, vector<4x4xf32> -> vector<4x4xf32>
    %cst_35 = arith.constant 0.353553385 : f32
    %50 = vector.broadcast %cst_35 : f32 to vector<4x4xf32>
    %51 = arith.mulf %49, %50 : vector<4x4xf32>
    %cst_36 = arith.constant dense<0xFF800000> : vector<4xf32>
    %52 = vector.multi_reduction <maximumf>, %51, %cst_36 [1] : vector<4x4xf32> to vector<4xf32>
    %53 = vector.shape_cast %52 : vector<4xf32> to vector<4x1xf32>
    %54 = vector.broadcast %53 : vector<4x1xf32> to vector<4x4xf32>
    %55 = arith.subf %51, %54 : vector<4x4xf32>
    %56 = math.exp %55 : vector<4x4xf32>
    %cst_37 = arith.constant dense<0.000000e+00> : vector<4xf32>
    %57 = vector.multi_reduction <add>, %56, %cst_37 [1] : vector<4x4xf32> to vector<4xf32>
    %58 = vector.shape_cast %57 : vector<4xf32> to vector<4x1xf32>
    %59 = tpu.reciprocal %58 {approx = true} : vector<4x1xf32> -> vector<4x1xf32>
    %60 = vector.broadcast %59 : vector<4x1xf32> to vector<4x4xf32>
    %61 = arith.mulf %56, %60 : vector<4x4xf32>
    %cst_38 = arith.constant dense<0.000000e+00> : vector<4x8xf32>
    %62 = tpu.matmul %61, %48, %cst_38 {dimension_numbers = #tpu.dot_dimension_numbers<[1], [0], [0], [1], [0, 0, 1, 1], [], []>} : vector<4x4xf32>, vector<4x8xf32>, vector<4x8xf32> -> vector<4x8xf32>
    %63 = vector.extract_strided_slice %37 {offsets = [0, 0, 0], sizes = [1, 8, 32], strides = [1, 1, 1]} : vector<4x8x32xf32> to vector<1x8x32xf32>
    %64 = vector.shape_cast %63 : vector<1x8x32xf32> to vector<8x32xf32>
    %cst_39 = arith.constant dense<0.000000e+00> : vector<4x32xf32>
    %65 = tpu.matmul %62, %64, %cst_39 {dimension_numbers = #tpu.dot_dimension_numbers<[1], [0], [0], [1], [0, 0, 1, 1], [], []>} : vector<4x8xf32>, vector<8x32xf32>, vector<4x32xf32> -> vector<4x32xf32>
    %66 = vector.broadcast %39 : vector<1x32xf32> to vector<4x32xf32>
    %67 = arith.addf %66, %65 : vector<4x32xf32>
    %68 = vector.extract_strided_slice %31 {offsets = [1, 0, 0], sizes = [1, 32, 8], strides = [1, 1, 1]} : vector<4x32x8xf32> to vector<1x32x8xf32>
    %69 = vector.shape_cast %68 : vector<1x32x8xf32> to vector<32x8xf32>
    %cst_40 = arith.constant dense<0.000000e+00> : vector<4x8xf32>
    %70 = tpu.matmul %29, %69, %cst_40 {dimension_numbers = #tpu.dot_dimension_numbers<[1], [0], [0], [1], [0, 0, 1, 1], [], []>} : vector<4x32xf32>, vector<32x8xf32>, vector<4x8xf32> -> vector<4x8xf32>
    %71 = vector.extract_strided_slice %33 {offsets = [1, 0, 0], sizes = [1, 8, 32], strides = [1, 1, 1]} : vector<4x8x32xf32> to vector<1x8x32xf32>
    %72 = vector.shape_cast %71 : vector<1x8x32xf32> to vector<8x32xf32>
    %cst_41 = arith.constant dense<0.000000e+00> : vector<8x4xf32>
    %73 = tpu.matmul %72, %29, %cst_41 {dimension_numbers = #tpu.dot_dimension_numbers<[1], [1], [0], [0], [0, 0, 1, 0], [], []>} : vector<8x32xf32>, vector<4x32xf32>, vector<8x4xf32> -> vector<8x4xf32>
    %74 = vector.extract_strided_slice %35 {offsets = [1, 0, 0], sizes = [1, 32, 8], strides = [1, 1, 1]} : vector<4x32x8xf32> to vector<1x32x8xf32>
    %75 = vector.shape_cast %74 : vector<1x32x8xf32> to vector<32x8xf32>
    %cst_42 = arith.constant dense<0.000000e+00> : vector<4x8xf32>
    %76 = tpu.matmul %29, %75, %cst_42 {dimension_numbers = #tpu.dot_dimension_numbers<[1], [0], [0], [1], [0, 0, 1, 1], [], []>} : vector<4x32xf32>, vector<32x8xf32>, vector<4x8xf32> -> vector<4x8xf32>
    %cst_43 = arith.constant dense<0.000000e+00> : vector<4x4xf32>
    %77 = tpu.matmul %70, %73, %cst_43 {dimension_numbers = #tpu.dot_dimension_numbers<[1], [0], [0], [1], [0, 0, 1, 1], [], []>} : vector<4x8xf32>, vector<8x4xf32>, vector<4x4xf32> -> vector<4x4xf32>
    %cst_44 = arith.constant 0.353553385 : f32
    %78 = vector.broadcast %cst_44 : f32 to vector<4x4xf32>
    %79 = arith.mulf %77, %78 : vector<4x4xf32>
    %cst_45 = arith.constant dense<0xFF800000> : vector<4xf32>
    %80 = vector.multi_reduction <maximumf>, %79, %cst_45 [1] : vector<4x4xf32> to vector<4xf32>
    %81 = vector.shape_cast %80 : vector<4xf32> to vector<4x1xf32>
    %82 = vector.broadcast %81 : vector<4x1xf32> to vector<4x4xf32>
    %83 = arith.subf %79, %82 : vector<4x4xf32>
    %84 = math.exp %83 : vector<4x4xf32>
    %cst_46 = arith.constant dense<0.000000e+00> : vector<4xf32>
    %85 = vector.multi_reduction <add>, %84, %cst_46 [1] : vector<4x4xf32> to vector<4xf32>
    %86 = vector.shape_cast %85 : vector<4xf32> to vector<4x1xf32>
    %87 = tpu.reciprocal %86 {approx = true} : vector<4x1xf32> -> vector<4x1xf32>
    %88 = vector.broadcast %87 : vector<4x1xf32> to vector<4x4xf32>
    %89 = arith.mulf %84, %88 : vector<4x4xf32>
    %cst_47 = arith.constant dense<0.000000e+00> : vector<4x8xf32>
    %90 = tpu.matmul %89, %76, %cst_47 {dimension_numbers = #tpu.dot_dimension_numbers<[1], [0], [0], [1], [0, 0, 1, 1], [], []>} : vector<4x4xf32>, vector<4x8xf32>, vector<4x8xf32> -> vector<4x8xf32>
    %91 = vector.extract_strided_slice %37 {offsets = [1, 0, 0], sizes = [1, 8, 32], strides = [1, 1, 1]} : vector<4x8x32xf32> to vector<1x8x32xf32>
    %92 = vector.shape_cast %91 : vector<1x8x32xf32> to vector<8x32xf32>
    %cst_48 = arith.constant dense<0.000000e+00> : vector<4x32xf32>
    %93 = tpu.matmul %90, %92, %cst_48 {dimension_numbers = #tpu.dot_dimension_numbers<[1], [0], [0], [1], [0, 0, 1, 1], [], []>} : vector<4x8xf32>, vector<8x32xf32>, vector<4x32xf32> -> vector<4x32xf32>
    %94 = arith.addf %67, %93 : vector<4x32xf32>
    %95 = vector.extract_strided_slice %31 {offsets = [2, 0, 0], sizes = [1, 32, 8], strides = [1, 1, 1]} : vector<4x32x8xf32> to vector<1x32x8xf32>
    %96 = vector.shape_cast %95 : vector<1x32x8xf32> to vector<32x8xf32>
    %cst_49 = arith.constant dense<0.000000e+00> : vector<4x8xf32>
    %97 = tpu.matmul %29, %96, %cst_49 {dimension_numbers = #tpu.dot_dimension_numbers<[1], [0], [0], [1], [0, 0, 1, 1], [], []>} : vector<4x32xf32>, vector<32x8xf32>, vector<4x8xf32> -> vector<4x8xf32>
    %98 = vector.extract_strided_slice %33 {offsets = [2, 0, 0], sizes = [1, 8, 32], strides = [1, 1, 1]} : vector<4x8x32xf32> to vector<1x8x32xf32>
    %99 = vector.shape_cast %98 : vector<1x8x32xf32> to vector<8x32xf32>
    %cst_50 = arith.constant dense<0.000000e+00> : vector<8x4xf32>
    %100 = tpu.matmul %99, %29, %cst_50 {dimension_numbers = #tpu.dot_dimension_numbers<[1], [1], [0], [0], [0, 0, 1, 0], [], []>} : vector<8x32xf32>, vector<4x32xf32>, vector<8x4xf32> -> vector<8x4xf32>
    %101 = vector.extract_strided_slice %35 {offsets = [2, 0, 0], sizes = [1, 32, 8], strides = [1, 1, 1]} : vector<4x32x8xf32> to vector<1x32x8xf32>
    %102 = vector.shape_cast %101 : vector<1x32x8xf32> to vector<32x8xf32>
    %cst_51 = arith.constant dense<0.000000e+00> : vector<4x8xf32>
    %103 = tpu.matmul %29, %102, %cst_51 {dimension_numbers = #tpu.dot_dimension_numbers<[1], [0], [0], [1], [0, 0, 1, 1], [], []>} : vector<4x32xf32>, vector<32x8xf32>, vector<4x8xf32> -> vector<4x8xf32>
    %cst_52 = arith.constant dense<0.000000e+00> : vector<4x4xf32>
    %104 = tpu.matmul %97, %100, %cst_52 {dimension_numbers = #tpu.dot_dimension_numbers<[1], [0], [0], [1], [0, 0, 1, 1], [], []>} : vector<4x8xf32>, vector<8x4xf32>, vector<4x4xf32> -> vector<4x4xf32>
    %cst_53 = arith.constant 0.353553385 : f32
    %105 = vector.broadcast %cst_53 : f32 to vector<4x4xf32>
    %106 = arith.mulf %104, %105 : vector<4x4xf32>
    %cst_54 = arith.constant dense<0xFF800000> : vector<4xf32>
    %107 = vector.multi_reduction <maximumf>, %106, %cst_54 [1] : vector<4x4xf32> to vector<4xf32>
    %108 = vector.shape_cast %107 : vector<4xf32> to vector<4x1xf32>
    %109 = vector.broadcast %108 : vector<4x1xf32> to vector<4x4xf32>
    %110 = arith.subf %106, %109 : vector<4x4xf32>
    %111 = math.exp %110 : vector<4x4xf32>
    %cst_55 = arith.constant dense<0.000000e+00> : vector<4xf32>
    %112 = vector.multi_reduction <add>, %111, %cst_55 [1] : vector<4x4xf32> to vector<4xf32>
    %113 = vector.shape_cast %112 : vector<4xf32> to vector<4x1xf32>
    %114 = tpu.reciprocal %113 {approx = true} : vector<4x1xf32> -> vector<4x1xf32>
    %115 = vector.broadcast %114 : vector<4x1xf32> to vector<4x4xf32>
    %116 = arith.mulf %111, %115 : vector<4x4xf32>
    %cst_56 = arith.constant dense<0.000000e+00> : vector<4x8xf32>
    %117 = tpu.matmul %116, %103, %cst_56 {dimension_numbers = #tpu.dot_dimension_numbers<[1], [0], [0], [1], [0, 0, 1, 1], [], []>} : vector<4x4xf32>, vector<4x8xf32>, vector<4x8xf32> -> vector<4x8xf32>
    %118 = vector.extract_strided_slice %37 {offsets = [2, 0, 0], sizes = [1, 8, 32], strides = [1, 1, 1]} : vector<4x8x32xf32> to vector<1x8x32xf32>
    %119 = vector.shape_cast %118 : vector<1x8x32xf32> to vector<8x32xf32>
    %cst_57 = arith.constant dense<0.000000e+00> : vector<4x32xf32>
    %120 = tpu.matmul %117, %119, %cst_57 {dimension_numbers = #tpu.dot_dimension_numbers<[1], [0], [0], [1], [0, 0, 1, 1], [], []>} : vector<4x8xf32>, vector<8x32xf32>, vector<4x32xf32> -> vector<4x32xf32>
    %121 = arith.addf %94, %120 : vector<4x32xf32>
    %122 = vector.extract_strided_slice %31 {offsets = [3, 0, 0], sizes = [1, 32, 8], strides = [1, 1, 1]} : vector<4x32x8xf32> to vector<1x32x8xf32>
    %123 = vector.shape_cast %122 : vector<1x32x8xf32> to vector<32x8xf32>
    %cst_58 = arith.constant dense<0.000000e+00> : vector<4x8xf32>
    %124 = tpu.matmul %29, %123, %cst_58 {dimension_numbers = #tpu.dot_dimension_numbers<[1], [0], [0], [1], [0, 0, 1, 1], [], []>} : vector<4x32xf32>, vector<32x8xf32>, vector<4x8xf32> -> vector<4x8xf32>
    %125 = vector.extract_strided_slice %33 {offsets = [3, 0, 0], sizes = [1, 8, 32], strides = [1, 1, 1]} : vector<4x8x32xf32> to vector<1x8x32xf32>
    %126 = vector.shape_cast %125 : vector<1x8x32xf32> to vector<8x32xf32>
    %cst_59 = arith.constant dense<0.000000e+00> : vector<8x4xf32>
    %127 = tpu.matmul %126, %29, %cst_59 {dimension_numbers = #tpu.dot_dimension_numbers<[1], [1], [0], [0], [0, 0, 1, 0], [], []>} : vector<8x32xf32>, vector<4x32xf32>, vector<8x4xf32> -> vector<8x4xf32>
    %128 = vector.extract_strided_slice %35 {offsets = [3, 0, 0], sizes = [1, 32, 8], strides = [1, 1, 1]} : vector<4x32x8xf32> to vector<1x32x8xf32>
    %129 = vector.shape_cast %128 : vector<1x32x8xf32> to vector<32x8xf32>
    %cst_60 = arith.constant dense<0.000000e+00> : vector<4x8xf32>
    %130 = tpu.matmul %29, %129, %cst_60 {dimension_numbers = #tpu.dot_dimension_numbers<[1], [0], [0], [1], [0, 0, 1, 1], [], []>} : vector<4x32xf32>, vector<32x8xf32>, vector<4x8xf32> -> vector<4x8xf32>
    %cst_61 = arith.constant dense<0.000000e+00> : vector<4x4xf32>
    %131 = tpu.matmul %124, %127, %cst_61 {dimension_numbers = #tpu.dot_dimension_numbers<[1], [0], [0], [1], [0, 0, 1, 1], [], []>} : vector<4x8xf32>, vector<8x4xf32>, vector<4x4xf32> -> vector<4x4xf32>
    %cst_62 = arith.constant 0.353553385 : f32
    %132 = vector.broadcast %cst_62 : f32 to vector<4x4xf32>
    %133 = arith.mulf %131, %132 : vector<4x4xf32>
    %cst_63 = arith.constant dense<0xFF800000> : vector<4xf32>
    %134 = vector.multi_reduction <maximumf>, %133, %cst_63 [1] : vector<4x4xf32> to vector<4xf32>
    %135 = vector.shape_cast %134 : vector<4xf32> to vector<4x1xf32>
    %136 = vector.broadcast %135 : vector<4x1xf32> to vector<4x4xf32>
    %137 = arith.subf %133, %136 : vector<4x4xf32>
    %138 = math.exp %137 : vector<4x4xf32>
    %cst_64 = arith.constant dense<0.000000e+00> : vector<4xf32>
    %139 = vector.multi_reduction <add>, %138, %cst_64 [1] : vector<4x4xf32> to vector<4xf32>
    %140 = vector.shape_cast %139 : vector<4xf32> to vector<4x1xf32>
    %141 = tpu.reciprocal %140 {approx = true} : vector<4x1xf32> -> vector<4x1xf32>
    %142 = vector.broadcast %141 : vector<4x1xf32> to vector<4x4xf32>
    %143 = arith.mulf %138, %142 : vector<4x4xf32>
    %cst_65 = arith.constant dense<0.000000e+00> : vector<4x8xf32>
    %144 = tpu.matmul %143, %130, %cst_65 {dimension_numbers = #tpu.dot_dimension_numbers<[1], [0], [0], [1], [0, 0, 1, 1], [], []>} : vector<4x4xf32>, vector<4x8xf32>, vector<4x8xf32> -> vector<4x8xf32>
    %145 = vector.extract_strided_slice %37 {offsets = [3, 0, 0], sizes = [1, 8, 32], strides = [1, 1, 1]} : vector<4x8x32xf32> to vector<1x8x32xf32>
    %146 = vector.shape_cast %145 : vector<1x8x32xf32> to vector<8x32xf32>
    %cst_66 = arith.constant dense<0.000000e+00> : vector<4x32xf32>
    %147 = tpu.matmul %144, %146, %cst_66 {dimension_numbers = #tpu.dot_dimension_numbers<[1], [0], [0], [1], [0, 0, 1, 1], [], []>} : vector<4x8xf32>, vector<8x32xf32>, vector<4x32xf32> -> vector<4x32xf32>
    %148 = arith.addf %121, %147 : vector<4x32xf32>
    %149 = arith.addf %3, %148 : vector<4x32xf32>
    %c0_67 = arith.constant 0 : index
    %c0_68 = arith.constant 0 : index
    %c0_69 = arith.constant 0 : index
    %150 = vector.load %arg14[%c0_67, %c0_68, %c0_69] : memref<1x1x32xf32, #tpu.memory_space<vmem>>, vector<1x1x32xf32>
    %151 = vector.shape_cast %150 : vector<1x1x32xf32> to vector<1x32xf32>
    %c0_70 = arith.constant 0 : index
    %c0_71 = arith.constant 0 : index
    %c0_72 = arith.constant 0 : index
    %152 = vector.load %arg15[%c0_70, %c0_71, %c0_72] : memref<1x1x32xf32, #tpu.memory_space<vmem>>, vector<1x1x32xf32>
    %153 = vector.shape_cast %152 : vector<1x1x32xf32> to vector<1x32xf32>
    %cst_73 = arith.constant dense<0.000000e+00> : vector<4xf32>
    %154 = vector.multi_reduction <add>, %149, %cst_73 [1] : vector<4x32xf32> to vector<4xf32>
    %155 = vector.shape_cast %154 : vector<4xf32> to vector<4x1xf32>
    %cst_74 = arith.constant 3.200000e+01 : f32
    %156 = vector.broadcast %cst_74 : f32 to vector<4x1xf32>
    %157 = arith.divf %155, %156 : vector<4x1xf32>
    %158 = vector.broadcast %157 : vector<4x1xf32> to vector<4x32xf32>
    %159 = arith.subf %149, %158 : vector<4x32xf32>
    %160 = arith.mulf %159, %159 : vector<4x32xf32>
    %cst_75 = arith.constant dense<0.000000e+00> : vector<4xf32>
    %161 = vector.multi_reduction <add>, %160, %cst_75 [1] : vector<4x32xf32> to vector<4xf32>
    %162 = vector.shape_cast %161 : vector<4xf32> to vector<4x1xf32>
    %cst_76 = arith.constant 3.200000e+01 : f32
    %163 = vector.broadcast %cst_76 : f32 to vector<4x1xf32>
    %164 = arith.divf %162, %163 : vector<4x1xf32>
    %165 = vector.broadcast %157 : vector<4x1xf32> to vector<4x32xf32>
    %166 = arith.subf %149, %165 : vector<4x32xf32>
    %cst_77 = arith.constant 9.99999974E-6 : f32
    %167 = vector.broadcast %cst_77 : f32 to vector<4x1xf32>
    %168 = arith.addf %164, %167 : vector<4x1xf32>
    %169 = math.rsqrt %168 : vector<4x1xf32>
    %170 = vector.broadcast %169 : vector<4x1xf32> to vector<4x32xf32>
    %171 = arith.mulf %166, %170 : vector<4x32xf32>
    %172 = vector.broadcast %151 : vector<1x32xf32> to vector<4x32xf32>
    %173 = arith.mulf %171, %172 : vector<4x32xf32>
    %174 = vector.broadcast %153 : vector<1x32xf32> to vector<4x32xf32>
    %175 = arith.addf %173, %174 : vector<4x32xf32>
    %c0_78 = arith.constant 0 : index
    %c0_79 = arith.constant 0 : index
    %c0_80 = arith.constant 0 : index
    %176 = vector.load %arg16[%c0_78, %c0_79, %c0_80] : memref<1x32x128xf32, #tpu.memory_space<vmem>>, vector<1x32x128xf32>
    %177 = vector.shape_cast %176 : vector<1x32x128xf32> to vector<32x128xf32>
    %cst_81 = arith.constant dense<0.000000e+00> : vector<4x128xf32>
    %178 = tpu.matmul %175, %177, %cst_81 {dimension_numbers = #tpu.dot_dimension_numbers<[1], [0], [0], [1], [0, 0, 1, 1], [], []>} : vector<4x32xf32>, vector<32x128xf32>, vector<4x128xf32> -> vector<4x128xf32>
    %c0_82 = arith.constant 0 : index
    %c0_83 = arith.constant 0 : index
    %c0_84 = arith.constant 0 : index
    %179 = vector.load %arg17[%c0_82, %c0_83, %c0_84] : memref<1x1x128xf32, #tpu.memory_space<vmem>>, vector<1x1x128xf32>
    %180 = vector.shape_cast %179 : vector<1x1x128xf32> to vector<1x128xf32>
    %181 = vector.broadcast %180 : vector<1x128xf32> to vector<4x128xf32>
    %182 = arith.addf %178, %181 : vector<4x128xf32>
    %183 = arith.mulf %182, %182 : vector<4x128xf32>
    %184 = arith.mulf %182, %183 : vector<4x128xf32>
    %cst_85 = arith.constant 4.471500e-02 : f32
    %185 = vector.broadcast %cst_85 : f32 to vector<4x128xf32>
    %186 = arith.mulf %185, %184 : vector<4x128xf32>
    %187 = arith.addf %182, %186 : vector<4x128xf32>
    %cst_86 = arith.constant 0.797884583 : f32
    %188 = vector.broadcast %cst_86 : f32 to vector<4x128xf32>
    %189 = arith.mulf %188, %187 : vector<4x128xf32>
    %190 = math.tanh %189 : vector<4x128xf32>
    %cst_87 = arith.constant 1.000000e+00 : f32
    %191 = vector.broadcast %cst_87 : f32 to vector<4x128xf32>
    %192 = arith.addf %191, %190 : vector<4x128xf32>
    %cst_88 = arith.constant 5.000000e-01 : f32
    %193 = vector.broadcast %cst_88 : f32 to vector<4x128xf32>
    %194 = arith.mulf %193, %192 : vector<4x128xf32>
    %195 = arith.mulf %182, %194 : vector<4x128xf32>
    %c0_89 = arith.constant 0 : index
    %c0_90 = arith.constant 0 : index
    %c0_91 = arith.constant 0 : index
    %196 = vector.load %arg18[%c0_89, %c0_90, %c0_91] : memref<1x128x32xf32, #tpu.memory_space<vmem>>, vector<1x128x32xf32>
    %197 = vector.shape_cast %196 : vector<1x128x32xf32> to vector<128x32xf32>
    %cst_92 = arith.constant dense<0.000000e+00> : vector<4x32xf32>
    %198 = tpu.matmul %195, %197, %cst_92 {dimension_numbers = #tpu.dot_dimension_numbers<[1], [0], [0], [1], [0, 0, 1, 1], [], []>} : vector<4x128xf32>, vector<128x32xf32>, vector<4x32xf32> -> vector<4x32xf32>
    %199 = arith.addf %149, %198 : vector<4x32xf32>
    %c0_93 = arith.constant 0 : index
    %c0_94 = arith.constant 0 : index
    %c0_95 = arith.constant 0 : index
    %200 = vector.load %arg19[%c0_93, %c0_94, %c0_95] : memref<1x1x32xf32, #tpu.memory_space<vmem>>, vector<1x1x32xf32>
    %201 = vector.shape_cast %200 : vector<1x1x32xf32> to vector<1x32xf32>
    %202 = vector.broadcast %201 : vector<1x32xf32> to vector<4x32xf32>
    %203 = arith.addf %199, %202 : vector<4x32xf32>
    %c0_96 = arith.constant 0 : index
    %c0_97 = arith.constant 0 : index
    %204 = vector.load %arg23[%c0_96, %c0_97] : memref<4x32xf32, #tpu.memory_space<vmem>>, vector<4x32xf32>
    tpu.vector_store %arg23[%c0_96, %c0_97], %203 {strides = array<i32>} : memref<4x32xf32, #tpu.memory_space<vmem>>, vector<4x32xf32>,
    %c0_i32_98 = arith.constant 0 : i32
    %205 = arith.cmpi eq, %arg1, %c0_i32_98 : i32
    %206 = arith.extui %205 : i1 to i32
    %c0_i32_99 = arith.constant 0 : i32
    %207 = arith.cmpi ne, %206, %c0_i32_99 : i32
    scf.if %207 {
      %c0_100 = arith.constant 0 : index
      %c0_101 = arith.constant 0 : index
      %208 = vector.load %arg20[%c0_100, %c0_101] : memref<1x32xf32, #tpu.memory_space<vmem>>, vector<1x32xf32>
      %c0_102 = arith.constant 0 : index
      %c0_103 = arith.constant 0 : index
      %209 = vector.load %arg21[%c0_102, %c0_103] : memref<1x32xf32, #tpu.memory_space<vmem>>, vector<1x32xf32>
      %cst_104 = arith.constant dense<0.000000e+00> : vector<4xf32>
      %210 = vector.multi_reduction <add>, %203, %cst_104 [1] : vector<4x32xf32> to vector<4xf32>
      %211 = vector.shape_cast %210 : vector<4xf32> to vector<4x1xf32>
      %cst_105 = arith.constant 3.200000e+01 : f32
      %212 = vector.broadcast %cst_105 : f32 to vector<4x1xf32>
      %213 = arith.divf %211, %212 : vector<4x1xf32>
      %214 = vector.broadcast %213 : vector<4x1xf32> to vector<4x32xf32>
      %215 = arith.subf %203, %214 : vector<4x32xf32>
      %216 = arith.mulf %215, %215 : vector<4x32xf32>
      %cst_106 = arith.constant dense<0.000000e+00> : vector<4xf32>
      %217 = vector.multi_reduction <add>, %216, %cst_106 [1] : vector<4x32xf32> to vector<4xf32>
      %218 = vector.shape_cast %217 : vector<4xf32> to vector<4x1xf32>
      %cst_107 = arith.constant 3.200000e+01 : f32
      %219 = vector.broadcast %cst_107 : f32 to vector<4x1xf32>
      %220 = arith.divf %218, %219 : vector<4x1xf32>
      %221 = vector.broadcast %213 : vector<4x1xf32> to vector<4x32xf32>
      %222 = arith.subf %203, %221 : vector<4x32xf32>
      %cst_108 = arith.constant 9.99999974E-6 : f32
      %223 = vector.broadcast %cst_108 : f32 to vector<4x1xf32>
      %224 = arith.addf %220, %223 : vector<4x1xf32>
      %225 = math.rsqrt %224 : vector<4x1xf32>
      %226 = vector.broadcast %225 : vector<4x1xf32> to vector<4x32xf32>
      %227 = arith.mulf %222, %226 : vector<4x32xf32>
      %228 = vector.broadcast %208 : vector<1x32xf32> to vector<4x32xf32>
      %229 = arith.mulf %227, %228 : vector<4x32xf32>
      %230 = vector.broadcast %209 : vector<1x32xf32> to vector<4x32xf32>
      %231 = arith.addf %229, %230 : vector<4x32xf32>
      %c0_109 = arith.constant 0 : index
      %c0_110 = arith.constant 0 : index
      %c0_111 = arith.constant 0 : index
      %232 = vector.load %arg22[%c0_109, %c0_110, %c0_111] : memref<1x4x32xf32, #tpu.memory_space<vmem>>, vector<1x4x32xf32>
      %233 = vector.shape_cast %232 : vector<1x4x32xf32> to vector<4x32xf32>
      %234 = vector.shape_cast %231 : vector<4x32xf32> to vector<1x4x32xf32>
      tpu.vector_store %arg22[%c0_109, %c0_110, %c0_111], %234 {strides = array<i32>} : memref<1x4x32xf32, #tpu.memory_space<vmem>>, vector<1x4x32xf32>,
    } else {
    }
    return
  }
  func.func @transform_0(%arg0: i32, %arg1: i32) -> (i32, i32, i32) {
    %c0_i32 = arith.constant 0 : i32
    %c0_i32_0 = arith.constant 0 : i32
    %c0_i32_1 = arith.constant 0 : i32
    return %arg0, %c0_i32, %c0_i32_0 : i32, i32, i32
  }
  func.func @transform_1(%arg0: i32, %arg1: i32) -> (i32, i32, i32) {
    %c0_i32 = arith.constant 0 : i32
    %c0_i32_0 = arith.constant 0 : i32
    %c0_i32_1 = arith.constant 0 : i32
    return %arg0, %c0_i32, %c0_i32_0 : i32, i32, i32
  }
  func.func @transform_2(%arg0: i32, %arg1: i32) -> (i32, i32) {
    %c0_i32 = arith.constant 0 : i32
    %c0_i32_0 = arith.constant 0 : i32
    %c0_i32_1 = arith.constant 0 : i32
    return %c0_i32, %c0_i32_0 : i32, i32
  }
  func.func @transform_3(%arg0: i32, %arg1: i32) -> (i32, i32) {
    %c0_i32 = arith.constant 0 : i32
    %c0_i32_0 = arith.constant 0 : i32
    %c0_i32_1 = arith.constant 0 : i32
    return %c0_i32, %c0_i32_0 : i32, i32
  }
  func.func @transform_4(%arg0: i32, %arg1: i32) -> (i32, i32, i32) {
    %c0_i32 = arith.constant 0 : i32
    %c0_i32_0 = arith.constant 0 : i32
    %c0_i32_1 = arith.constant 0 : i32
    %c0_i32_2 = arith.constant 0 : i32
    return %c0_i32, %c0_i32_0, %c0_i32_1 : i32, i32, i32
  }
  func.func @transform_5(%arg0: i32, %arg1: i32) -> (i32, i32, i32) {
    %c0_i32 = arith.constant 0 : i32
    %c0_i32_0 = arith.constant 0 : i32
    %c0_i32_1 = arith.constant 0 : i32
    return %arg1, %c0_i32, %c0_i32_0 : i32, i32, i32
  }
  func.func @transform_6(%arg0: i32, %arg1: i32) -> (i32, i32, i32) {
    %c0_i32 = arith.constant 0 : i32
    %c0_i32_0 = arith.constant 0 : i32
    %c0_i32_1 = arith.constant 0 : i32
    return %arg1, %c0_i32, %c0_i32_0 : i32, i32, i32
  }
  func.func @transform_7(%arg0: i32, %arg1: i32) -> (i32, i32, i32, i32) {
    %c0_i32 = arith.constant 0 : i32
    %c0_i32_0 = arith.constant 0 : i32
    %c0_i32_1 = arith.constant 0 : i32
    %c0_i32_2 = arith.constant 0 : i32
    return %arg1, %c0_i32, %c0_i32_0, %c0_i32_1 : i32, i32, i32, i32
  }
  func.func @transform_8(%arg0: i32, %arg1: i32) -> (i32, i32, i32, i32) {
    %c0_i32 = arith.constant 0 : i32
    %c0_i32_0 = arith.constant 0 : i32
    %c0_i32_1 = arith.constant 0 : i32
    %c0_i32_2 = arith.constant 0 : i32
    return %arg1, %c0_i32, %c0_i32_0, %c0_i32_1 : i32, i32, i32, i32
  }
  func.func @transform_9(%arg0: i32, %arg1: i32) -> (i32, i32, i32, i32) {
    %c0_i32 = arith.constant 0 : i32
    %c0_i32_0 = arith.constant 0 : i32
    %c0_i32_1 = arith.constant 0 : i32
    %c0_i32_2 = arith.constant 0 : i32
    return %arg1, %c0_i32, %c0_i32_0, %c0_i32_1 : i32, i32, i32, i32
  }
  func.func @transform_10(%arg0: i32, %arg1: i32) -> (i32, i32, i32, i32) {
    %c0_i32 = arith.constant 0 : i32
    %c0_i32_0 = arith.constant 0 : i32
    %c0_i32_1 = arith.constant 0 : i32
    %c0_i32_2 = arith.constant 0 : i32
    return %arg1, %c0_i32, %c0_i32_0, %c0_i32_1 : i32, i32, i32, i32
  }
  func.func @transform_11(%arg0: i32, %arg1: i32) -> (i32, i32, i32) {
    %c0_i32 = arith.constant 0 : i32
    %c0_i32_0 = arith.constant 0 : i32
    %c0_i32_1 = arith.constant 0 : i32
    return %arg1, %c0_i32, %c0_i32_0 : i32, i32, i32
  }
  func.func @transform_12(%arg0: i32, %arg1: i32) -> (i32, i32, i32) {
    %c0_i32 = arith.constant 0 : i32
    %c0_i32_0 = arith.constant 0 : i32
    %c0_i32_1 = arith.constant 0 : i32
    return %arg1, %c0_i32, %c0_i32_0 : i32, i32, i32
  }
  func.func @transform_13(%arg0: i32, %arg1: i32) -> (i32, i32, i32) {
    %c0_i32 = arith.constant 0 : i32
    %c0_i32_0 = arith.constant 0 : i32
    %c0_i32_1 = arith.constant 0 : i32
    return %arg1, %c0_i32, %c0_i32_0 : i32, i32, i32
  }
  func.func @transform_14(%arg0: i32, %arg1: i32) -> (i32, i32, i32) {
    %c0_i32 = arith.constant 0 : i32
    %c0_i32_0 = arith.constant 0 : i32
    %c0_i32_1 = arith.constant 0 : i32
    return %arg1, %c0_i32, %c0_i32_0 : i32, i32, i32
  }
  func.func @transform_15(%arg0: i32, %arg1: i32) -> (i32, i32, i32) {
    %c0_i32 = arith.constant 0 : i32
    %c0_i32_0 = arith.constant 0 : i32
    %c0_i32_1 = arith.constant 0 : i32
    return %arg1, %c0_i32, %c0_i32_0 : i32, i32, i32
  }
  func.func @transform_16(%arg0: i32, %arg1: i32) -> (i32, i32, i32) {
    %c0_i32 = arith.constant 0 : i32
    %c0_i32_0 = arith.constant 0 : i32
    %c0_i32_1 = arith.constant 0 : i32
    return %arg1, %c0_i32, %c0_i32_0 : i32, i32, i32
  }
  func.func @transform_17(%arg0: i32, %arg1: i32) -> (i32, i32, i32) {
    %c0_i32 = arith.constant 0 : i32
    %c0_i32_0 = arith.constant 0 : i32
    %c0_i32_1 = arith.constant 0 : i32
    return %arg1, %c0_i32, %c0_i32_0 : i32, i32, i32
  }
  func.func @transform_18(%arg0: i32, %arg1: i32) -> (i32, i32) {
    %c0_i32 = arith.constant 0 : i32
    %c0_i32_0 = arith.constant 0 : i32
    %c0_i32_1 = arith.constant 0 : i32
    return %c0_i32, %c0_i32_0 : i32, i32
  }
  func.func @transform_19(%arg0: i32, %arg1: i32) -> (i32, i32) {
    %c0_i32 = arith.constant 0 : i32
    %c0_i32_0 = arith.constant 0 : i32
    %c0_i32_1 = arith.constant 0 : i32
    return %c0_i32, %c0_i32_0 : i32, i32
  }
  func.func @transform_20(%arg0: i32, %arg1: i32) -> (i32, i32, i32) {
    %c0_i32 = arith.constant 0 : i32
    %c0_i32_0 = arith.constant 0 : i32
    %c0_i32_1 = arith.constant 0 : i32
    return %arg0, %c0_i32, %c0_i32_0 : i32, i32, i32
  }
}

module attributes {stable_mosaic.version = 11 : i64} {
  func.func @_dec_kernel(%arg0: i32, %arg1: i32, %arg2: memref<1x4x32xf32, #tpu.memory_space<vmem>>, %arg3: memref<1x16x24xf32, #tpu.memory_space<vmem>>, %arg4: memref<1x16x16xf32, #tpu.memory_space<vmem>>, %arg5: memref<16x4xf32, #tpu.memory_space<vmem>>, %arg6: memref<16x1xf32, #tpu.memory_space<vmem>>, %arg7: memref<32x24xf32, #tpu.memory_space<vmem>>, %arg8: memref<1x24xf32, #tpu.memory_space<vmem>>, %arg9: memref<1x24xf32, #tpu.memory_space<vmem>>, %arg10: memref<16x24xf32, #tpu.memory_space<vmem>>, %arg11: memref<1x1x24xf32, #tpu.memory_space<vmem>>, %arg12: memref<1x1x24xf32, #tpu.memory_space<vmem>>, %arg13: memref<1x4x24x8xf32, #tpu.memory_space<vmem>>, %arg14: memref<1x4x8x24xf32, #tpu.memory_space<vmem>>, %arg15: memref<1x4x24x8xf32, #tpu.memory_space<vmem>>, %arg16: memref<1x4x8x24xf32, #tpu.memory_space<vmem>>, %arg17: memref<1x1x24xf32, #tpu.memory_space<vmem>>, %arg18: memref<1x1x24xf32, #tpu.memory_space<vmem>>, %arg19: memref<1x1x24xf32, #tpu.memory_space<vmem>>, %arg20: memref<1x24x96xf32, #tpu.memory_space<vmem>>, %arg21: memref<1x1x96xf32, #tpu.memory_space<vmem>>, %arg22: memref<1x96x24xf32, #tpu.memory_space<vmem>>, %arg23: memref<1x1x24xf32, #tpu.memory_space<vmem>>, %arg24: memref<1x24xf32, #tpu.memory_space<vmem>>, %arg25: memref<1x24xf32, #tpu.memory_space<vmem>>, %arg26: memref<24x24xf32, #tpu.memory_space<vmem>>, %arg27: memref<1x24xf32, #tpu.memory_space<vmem>>, %arg28: memref<1x12x24xf32, #tpu.memory_space<vmem>>, %arg29: memref<1x12x24xf32, #tpu.memory_space<vmem>>, %arg30: memref<1x1x1xf32, #tpu.memory_space<vmem>>, %arg31: memref<16x24xf32, #tpu.memory_space<vmem>>) attributes {dimension_semantics = [#tpu.dimension_semantics<parallel>, #tpu.dimension_semantics<arbitrary>], iteration_bounds = array<i64: 2, 1>, scalar_prefetch = 0 : i64, scratch_operands = 1 : i64, tpu.core_type = #tpu.core_type<tc>, window_params = [{transform_indices = @transform_0, window_bounds = array<i64: 1, 4, 32>}, {transform_indices = @transform_1, window_bounds = array<i64: 1, 16, 24>}, {transform_indices = @transform_2, window_bounds = array<i64: 1, 16, 16>}, {pipeline_mode = #tpu.pipeline_mode<synchronous>, transform_indices = @transform_3, window_bounds = array<i64: 16, 4>}, {pipeline_mode = #tpu.pipeline_mode<synchronous>, transform_indices = @transform_4, window_bounds = array<i64: 16, 1>}, {pipeline_mode = #tpu.pipeline_mode<synchronous>, transform_indices = @transform_5, window_bounds = array<i64: 32, 24>}, {pipeline_mode = #tpu.pipeline_mode<synchronous>, transform_indices = @transform_6, window_bounds = array<i64: 1, 24>}, {pipeline_mode = #tpu.pipeline_mode<synchronous>, transform_indices = @transform_7, window_bounds = array<i64: 1, 24>}, {pipeline_mode = #tpu.pipeline_mode<synchronous>, transform_indices = @transform_8, window_bounds = array<i64: 16, 24>}, {transform_indices = @transform_9, window_bounds = array<i64: 1, 1, 24>}, {transform_indices = @transform_10, window_bounds = array<i64: 1, 1, 24>}, {transform_indices = @transform_11, window_bounds = array<i64: 1, 4, 24, 8>}, {transform_indices = @transform_12, window_bounds = array<i64: 1, 4, 8, 24>}, {transform_indices = @transform_13, window_bounds = array<i64: 1, 4, 24, 8>}, {transform_indices = @transform_14, window_bounds = array<i64: 1, 4, 8, 24>}, {transform_indices = @transform_15, window_bounds = array<i64: 1, 1, 24>}, {transform_indices = @transform_16, window_bounds = array<i64: 1, 1, 24>}, {transform_indices = @transform_17, window_bounds = array<i64: 1, 1, 24>}, {transform_indices = @transform_18, window_bounds = array<i64: 1, 24, 96>}, {transform_indices = @transform_19, window_bounds = array<i64: 1, 1, 96>}, {transform_indices = @transform_20, window_bounds = array<i64: 1, 96, 24>}, {transform_indices = @transform_21, window_bounds = array<i64: 1, 1, 24>}, {pipeline_mode = #tpu.pipeline_mode<synchronous>, transform_indices = @transform_22, window_bounds = array<i64: 1, 24>}, {pipeline_mode = #tpu.pipeline_mode<synchronous>, transform_indices = @transform_23, window_bounds = array<i64: 1, 24>}, {pipeline_mode = #tpu.pipeline_mode<synchronous>, transform_indices = @transform_24, window_bounds = array<i64: 24, 24>}, {pipeline_mode = #tpu.pipeline_mode<synchronous>, transform_indices = @transform_25, window_bounds = array<i64: 1, 24>}, {transform_indices = @transform_26, window_bounds = array<i64: 1, 12, 24>}, {transform_indices = @transform_27, window_bounds = array<i64: 1, 12, 24>}, {transform_indices = @transform_28, window_bounds = array<i64: 1, 1, 1>}]} {
    %c0_i32 = arith.constant 0 : i32
    %0 = arith.cmpi eq, %arg1, %c0_i32 : i32
    %1 = arith.extui %0 : i1 to i32
    %c0_i32_0 = arith.constant 0 : i32
    %2 = arith.cmpi ne, %1, %c0_i32_0 : i32
    scf.if %2 {
      %c0_100 = arith.constant 0 : index
      %c0_101 = arith.constant 0 : index
      %c0_102 = arith.constant 0 : index
      %208 = vector.load %arg2[%c0_100, %c0_101, %c0_102] : memref<1x4x32xf32, #tpu.memory_space<vmem>>, vector<1x4x32xf32>
      %209 = vector.shape_cast %208 : vector<1x4x32xf32> to vector<4x32xf32>
      %c0_103 = arith.constant 0 : index
      %c0_104 = arith.constant 0 : index
      %210 = vector.load %arg7[%c0_103, %c0_104] : memref<32x24xf32, #tpu.memory_space<vmem>>, vector<32x24xf32>
      %cst_105 = arith.constant dense<0.000000e+00> : vector<4x24xf32>
      %211 = tpu.matmul %209, %210, %cst_105 {dimension_numbers = #tpu.dot_dimension_numbers<[1], [0], [0], [1], [0, 0, 1, 1], [], []>} : vector<4x32xf32>, vector<32x24xf32>, vector<4x24xf32> -> vector<4x24xf32>
      %c0_106 = arith.constant 0 : index
      %c0_107 = arith.constant 0 : index
      %212 = vector.load %arg8[%c0_106, %c0_107] : memref<1x24xf32, #tpu.memory_space<vmem>>, vector<1x24xf32>
      %213 = vector.broadcast %212 : vector<1x24xf32> to vector<4x24xf32>
      %214 = arith.addf %211, %213 : vector<4x24xf32>
      %c0_108 = arith.constant 0 : index
      %c0_109 = arith.constant 0 : index
      %215 = vector.load %arg10[%c0_108, %c0_109] : memref<16x24xf32, #tpu.memory_space<vmem>>, vector<16x24xf32>
      %c0_110 = arith.constant 0 : index
      %c0_111 = arith.constant 0 : index
      %c0_112 = arith.constant 0 : index
      %216 = vector.load %arg4[%c0_110, %c0_111, %c0_112] : memref<1x16x16xf32, #tpu.memory_space<vmem>>, vector<1x16x16xf32>
      %217 = vector.shape_cast %216 : vector<1x16x16xf32> to vector<16x16xf32>
      %cst_113 = arith.constant dense<0.000000e+00> : vector<16x24xf32>
      %218 = tpu.matmul %217, %215, %cst_113 {dimension_numbers = #tpu.dot_dimension_numbers<[1], [0], [0], [1], [0, 0, 1, 1], [], []>} : vector<16x16xf32>, vector<16x24xf32>, vector<16x24xf32> -> vector<16x24xf32>
      %c0_114 = arith.constant 0 : index
      %c0_115 = arith.constant 0 : index
      %219 = vector.load %arg5[%c0_114, %c0_115] : memref<16x4xf32, #tpu.memory_space<vmem>>, vector<16x4xf32>
      %cst_116 = arith.constant dense<0.000000e+00> : vector<16x24xf32>
      %220 = tpu.matmul %219, %214, %cst_116 {dimension_numbers = #tpu.dot_dimension_numbers<[1], [0], [0], [1], [0, 0, 1, 1], [], []>} : vector<16x4xf32>, vector<4x24xf32>, vector<16x24xf32> -> vector<16x24xf32>
      %221 = arith.addf %218, %220 : vector<16x24xf32>
      %c0_117 = arith.constant 0 : index
      %c0_118 = arith.constant 0 : index
      %222 = vector.load %arg6[%c0_117, %c0_118] : memref<16x1xf32, #tpu.memory_space<vmem>>, vector<16x1xf32>
      %c0_119 = arith.constant 0 : index
      %c0_120 = arith.constant 0 : index
      %223 = vector.load %arg9[%c0_119, %c0_120] : memref<1x24xf32, #tpu.memory_space<vmem>>, vector<1x24xf32>
      %224 = vector.broadcast %222 : vector<16x1xf32> to vector<16x24xf32>
      %225 = vector.broadcast %223 : vector<1x24xf32> to vector<16x24xf32>
      %226 = arith.mulf %224, %225 : vector<16x24xf32>
      %227 = arith.addf %221, %226 : vector<16x24xf32>
      %c0_121 = arith.constant 0 : index
      %c0_122 = arith.constant 0 : index
      %228 = vector.load %arg31[%c0_121, %c0_122] : memref<16x24xf32, #tpu.memory_space<vmem>>, vector<16x24xf32>
      tpu.vector_store %arg31[%c0_121, %c0_122], %227 {strides = array<i32>} : memref<16x24xf32, #tpu.memory_space<vmem>>, vector<16x24xf32>,
    } else {
    }
    %c0 = arith.constant 0 : index
    %c0_1 = arith.constant 0 : index
    %3 = vector.load %arg31[%c0, %c0_1] : memref<16x24xf32, #tpu.memory_space<vmem>>, vector<16x24xf32>
    %c0_2 = arith.constant 0 : index
    %c0_3 = arith.constant 0 : index
    %c0_4 = arith.constant 0 : index
    %4 = vector.load %arg11[%c0_2, %c0_3, %c0_4] : memref<1x1x24xf32, #tpu.memory_space<vmem>>, vector<1x1x24xf32>
    %5 = vector.shape_cast %4 : vector<1x1x24xf32> to vector<1x24xf32>
    %c0_5 = arith.constant 0 : index
    %c0_6 = arith.constant 0 : index
    %c0_7 = arith.constant 0 : index
    %6 = vector.load %arg12[%c0_5, %c0_6, %c0_7] : memref<1x1x24xf32, #tpu.memory_space<vmem>>, vector<1x1x24xf32>
    %7 = vector.shape_cast %6 : vector<1x1x24xf32> to vector<1x24xf32>
    %cst = arith.constant dense<0.000000e+00> : vector<16xf32>
    %8 = vector.multi_reduction <add>, %3, %cst [1] : vector<16x24xf32> to vector<16xf32>
    %9 = vector.shape_cast %8 : vector<16xf32> to vector<16x1xf32>
    %cst_8 = arith.constant 2.400000e+01 : f32
    %10 = vector.broadcast %cst_8 : f32 to vector<16x1xf32>
    %11 = arith.divf %9, %10 : vector<16x1xf32>
    %12 = vector.broadcast %11 : vector<16x1xf32> to vector<16x24xf32>
    %13 = arith.subf %3, %12 : vector<16x24xf32>
    %14 = arith.mulf %13, %13 : vector<16x24xf32>
    %cst_9 = arith.constant dense<0.000000e+00> : vector<16xf32>
    %15 = vector.multi_reduction <add>, %14, %cst_9 [1] : vector<16x24xf32> to vector<16xf32>
    %16 = vector.shape_cast %15 : vector<16xf32> to vector<16x1xf32>
    %cst_10 = arith.constant 2.400000e+01 : f32
    %17 = vector.broadcast %cst_10 : f32 to vector<16x1xf32>
    %18 = arith.divf %16, %17 : vector<16x1xf32>
    %19 = vector.broadcast %11 : vector<16x1xf32> to vector<16x24xf32>
    %20 = arith.subf %3, %19 : vector<16x24xf32>
    %cst_11 = arith.constant 9.99999974E-6 : f32
    %21 = vector.broadcast %cst_11 : f32 to vector<16x1xf32>
    %22 = arith.addf %18, %21 : vector<16x1xf32>
    %23 = math.rsqrt %22 : vector<16x1xf32>
    %24 = vector.broadcast %23 : vector<16x1xf32> to vector<16x24xf32>
    %25 = arith.mulf %20, %24 : vector<16x24xf32>
    %26 = vector.broadcast %5 : vector<1x24xf32> to vector<16x24xf32>
    %27 = arith.mulf %25, %26 : vector<16x24xf32>
    %28 = vector.broadcast %7 : vector<1x24xf32> to vector<16x24xf32>
    %29 = arith.addf %27, %28 : vector<16x24xf32>
    %c0_12 = arith.constant 0 : index
    %c0_13 = arith.constant 0 : index
    %c0_14 = arith.constant 0 : index
    %c0_15 = arith.constant 0 : index
    %30 = vector.load %arg13[%c0_12, %c0_13, %c0_14, %c0_15] : memref<1x4x24x8xf32, #tpu.memory_space<vmem>>, vector<1x4x24x8xf32>
    %31 = vector.shape_cast %30 : vector<1x4x24x8xf32> to vector<4x24x8xf32>
    %c0_16 = arith.constant 0 : index
    %c0_17 = arith.constant 0 : index
    %c0_18 = arith.constant 0 : index
    %c0_19 = arith.constant 0 : index
    %32 = vector.load %arg14[%c0_16, %c0_17, %c0_18, %c0_19] : memref<1x4x8x24xf32, #tpu.memory_space<vmem>>, vector<1x4x8x24xf32>
    %33 = vector.shape_cast %32 : vector<1x4x8x24xf32> to vector<4x8x24xf32>
    %c0_20 = arith.constant 0 : index
    %c0_21 = arith.constant 0 : index
    %c0_22 = arith.constant 0 : index
    %c0_23 = arith.constant 0 : index
    %34 = vector.load %arg15[%c0_20, %c0_21, %c0_22, %c0_23] : memref<1x4x24x8xf32, #tpu.memory_space<vmem>>, vector<1x4x24x8xf32>
    %35 = vector.shape_cast %34 : vector<1x4x24x8xf32> to vector<4x24x8xf32>
    %c0_24 = arith.constant 0 : index
    %c0_25 = arith.constant 0 : index
    %c0_26 = arith.constant 0 : index
    %c0_27 = arith.constant 0 : index
    %36 = vector.load %arg16[%c0_24, %c0_25, %c0_26, %c0_27] : memref<1x4x8x24xf32, #tpu.memory_space<vmem>>, vector<1x4x8x24xf32>
    %37 = vector.shape_cast %36 : vector<1x4x8x24xf32> to vector<4x8x24xf32>
    %c0_28 = arith.constant 0 : index
    %c0_29 = arith.constant 0 : index
    %c0_30 = arith.constant 0 : index
    %38 = vector.load %arg17[%c0_28, %c0_29, %c0_30] : memref<1x1x24xf32, #tpu.memory_space<vmem>>, vector<1x1x24xf32>
    %39 = vector.shape_cast %38 : vector<1x1x24xf32> to vector<1x24xf32>
    %40 = vector.extract_strided_slice %31 {offsets = [0, 0, 0], sizes = [1, 24, 8], strides = [1, 1, 1]} : vector<4x24x8xf32> to vector<1x24x8xf32>
    %41 = vector.shape_cast %40 : vector<1x24x8xf32> to vector<24x8xf32>
    %cst_31 = arith.constant dense<0.000000e+00> : vector<16x8xf32>
    %42 = tpu.matmul %29, %41, %cst_31 {dimension_numbers = #tpu.dot_dimension_numbers<[1], [0], [0], [1], [0, 0, 1, 1], [], []>} : vector<16x24xf32>, vector<24x8xf32>, vector<16x8xf32> -> vector<16x8xf32>
    %43 = vector.extract_strided_slice %33 {offsets = [0, 0, 0], sizes = [1, 8, 24], strides = [1, 1, 1]} : vector<4x8x24xf32> to vector<1x8x24xf32>
    %44 = vector.shape_cast %43 : vector<1x8x24xf32> to vector<8x24xf32>
    %cst_32 = arith.constant dense<0.000000e+00> : vector<8x16xf32>
    %45 = tpu.matmul %44, %29, %cst_32 {dimension_numbers = #tpu.dot_dimension_numbers<[1], [1], [0], [0], [0, 0, 1, 0], [], []>} : vector<8x24xf32>, vector<16x24xf32>, vector<8x16xf32> -> vector<8x16xf32>
    %46 = vector.extract_strided_slice %35 {offsets = [0, 0, 0], sizes = [1, 24, 8], strides = [1, 1, 1]} : vector<4x24x8xf32> to vector<1x24x8xf32>
    %47 = vector.shape_cast %46 : vector<1x24x8xf32> to vector<24x8xf32>
    %cst_33 = arith.constant dense<0.000000e+00> : vector<16x8xf32>
    %48 = tpu.matmul %29, %47, %cst_33 {dimension_numbers = #tpu.dot_dimension_numbers<[1], [0], [0], [1], [0, 0, 1, 1], [], []>} : vector<16x24xf32>, vector<24x8xf32>, vector<16x8xf32> -> vector<16x8xf32>
    %cst_34 = arith.constant dense<0.000000e+00> : vector<16x16xf32>
    %49 = tpu.matmul %42, %45, %cst_34 {dimension_numbers = #tpu.dot_dimension_numbers<[1], [0], [0], [1], [0, 0, 1, 1], [], []>} : vector<16x8xf32>, vector<8x16xf32>, vector<16x16xf32> -> vector<16x16xf32>
    %cst_35 = arith.constant 0.353553385 : f32
    %50 = vector.broadcast %cst_35 : f32 to vector<16x16xf32>
    %51 = arith.mulf %49, %50 : vector<16x16xf32>
    %cst_36 = arith.constant dense<0xFF800000> : vector<16xf32>
    %52 = vector.multi_reduction <maximumf>, %51, %cst_36 [1] : vector<16x16xf32> to vector<16xf32>
    %53 = vector.shape_cast %52 : vector<16xf32> to vector<16x1xf32>
    %54 = vector.broadcast %53 : vector<16x1xf32> to vector<16x16xf32>
    %55 = arith.subf %51, %54 : vector<16x16xf32>
    %56 = math.exp %55 : vector<16x16xf32>
    %cst_37 = arith.constant dense<0.000000e+00> : vector<16xf32>
    %57 = vector.multi_reduction <add>, %56, %cst_37 [1] : vector<16x16xf32> to vector<16xf32>
    %58 = vector.shape_cast %57 : vector<16xf32> to vector<16x1xf32>
    %59 = tpu.reciprocal %58 {approx = true} : vector<16x1xf32> -> vector<16x1xf32>
    %60 = vector.broadcast %59 : vector<16x1xf32> to vector<16x16xf32>
    %61 = arith.mulf %56, %60 : vector<16x16xf32>
    %cst_38 = arith.constant dense<0.000000e+00> : vector<16x8xf32>
    %62 = tpu.matmul %61, %48, %cst_38 {dimension_numbers = #tpu.dot_dimension_numbers<[1], [0], [0], [1], [0, 0, 1, 1], [], []>} : vector<16x16xf32>, vector<16x8xf32>, vector<16x8xf32> -> vector<16x8xf32>
    %63 = vector.extract_strided_slice %37 {offsets = [0, 0, 0], sizes = [1, 8, 24], strides = [1, 1, 1]} : vector<4x8x24xf32> to vector<1x8x24xf32>
    %64 = vector.shape_cast %63 : vector<1x8x24xf32> to vector<8x24xf32>
    %cst_39 = arith.constant dense<0.000000e+00> : vector<16x24xf32>
    %65 = tpu.matmul %62, %64, %cst_39 {dimension_numbers = #tpu.dot_dimension_numbers<[1], [0], [0], [1], [0, 0, 1, 1], [], []>} : vector<16x8xf32>, vector<8x24xf32>, vector<16x24xf32> -> vector<16x24xf32>
    %66 = vector.broadcast %39 : vector<1x24xf32> to vector<16x24xf32>
    %67 = arith.addf %66, %65 : vector<16x24xf32>
    %68 = vector.extract_strided_slice %31 {offsets = [1, 0, 0], sizes = [1, 24, 8], strides = [1, 1, 1]} : vector<4x24x8xf32> to vector<1x24x8xf32>
    %69 = vector.shape_cast %68 : vector<1x24x8xf32> to vector<24x8xf32>
    %cst_40 = arith.constant dense<0.000000e+00> : vector<16x8xf32>
    %70 = tpu.matmul %29, %69, %cst_40 {dimension_numbers = #tpu.dot_dimension_numbers<[1], [0], [0], [1], [0, 0, 1, 1], [], []>} : vector<16x24xf32>, vector<24x8xf32>, vector<16x8xf32> -> vector<16x8xf32>
    %71 = vector.extract_strided_slice %33 {offsets = [1, 0, 0], sizes = [1, 8, 24], strides = [1, 1, 1]} : vector<4x8x24xf32> to vector<1x8x24xf32>
    %72 = vector.shape_cast %71 : vector<1x8x24xf32> to vector<8x24xf32>
    %cst_41 = arith.constant dense<0.000000e+00> : vector<8x16xf32>
    %73 = tpu.matmul %72, %29, %cst_41 {dimension_numbers = #tpu.dot_dimension_numbers<[1], [1], [0], [0], [0, 0, 1, 0], [], []>} : vector<8x24xf32>, vector<16x24xf32>, vector<8x16xf32> -> vector<8x16xf32>
    %74 = vector.extract_strided_slice %35 {offsets = [1, 0, 0], sizes = [1, 24, 8], strides = [1, 1, 1]} : vector<4x24x8xf32> to vector<1x24x8xf32>
    %75 = vector.shape_cast %74 : vector<1x24x8xf32> to vector<24x8xf32>
    %cst_42 = arith.constant dense<0.000000e+00> : vector<16x8xf32>
    %76 = tpu.matmul %29, %75, %cst_42 {dimension_numbers = #tpu.dot_dimension_numbers<[1], [0], [0], [1], [0, 0, 1, 1], [], []>} : vector<16x24xf32>, vector<24x8xf32>, vector<16x8xf32> -> vector<16x8xf32>
    %cst_43 = arith.constant dense<0.000000e+00> : vector<16x16xf32>
    %77 = tpu.matmul %70, %73, %cst_43 {dimension_numbers = #tpu.dot_dimension_numbers<[1], [0], [0], [1], [0, 0, 1, 1], [], []>} : vector<16x8xf32>, vector<8x16xf32>, vector<16x16xf32> -> vector<16x16xf32>
    %cst_44 = arith.constant 0.353553385 : f32
    %78 = vector.broadcast %cst_44 : f32 to vector<16x16xf32>
    %79 = arith.mulf %77, %78 : vector<16x16xf32>
    %cst_45 = arith.constant dense<0xFF800000> : vector<16xf32>
    %80 = vector.multi_reduction <maximumf>, %79, %cst_45 [1] : vector<16x16xf32> to vector<16xf32>
    %81 = vector.shape_cast %80 : vector<16xf32> to vector<16x1xf32>
    %82 = vector.broadcast %81 : vector<16x1xf32> to vector<16x16xf32>
    %83 = arith.subf %79, %82 : vector<16x16xf32>
    %84 = math.exp %83 : vector<16x16xf32>
    %cst_46 = arith.constant dense<0.000000e+00> : vector<16xf32>
    %85 = vector.multi_reduction <add>, %84, %cst_46 [1] : vector<16x16xf32> to vector<16xf32>
    %86 = vector.shape_cast %85 : vector<16xf32> to vector<16x1xf32>
    %87 = tpu.reciprocal %86 {approx = true} : vector<16x1xf32> -> vector<16x1xf32>
    %88 = vector.broadcast %87 : vector<16x1xf32> to vector<16x16xf32>
    %89 = arith.mulf %84, %88 : vector<16x16xf32>
    %cst_47 = arith.constant dense<0.000000e+00> : vector<16x8xf32>
    %90 = tpu.matmul %89, %76, %cst_47 {dimension_numbers = #tpu.dot_dimension_numbers<[1], [0], [0], [1], [0, 0, 1, 1], [], []>} : vector<16x16xf32>, vector<16x8xf32>, vector<16x8xf32> -> vector<16x8xf32>
    %91 = vector.extract_strided_slice %37 {offsets = [1, 0, 0], sizes = [1, 8, 24], strides = [1, 1, 1]} : vector<4x8x24xf32> to vector<1x8x24xf32>
    %92 = vector.shape_cast %91 : vector<1x8x24xf32> to vector<8x24xf32>
    %cst_48 = arith.constant dense<0.000000e+00> : vector<16x24xf32>
    %93 = tpu.matmul %90, %92, %cst_48 {dimension_numbers = #tpu.dot_dimension_numbers<[1], [0], [0], [1], [0, 0, 1, 1], [], []>} : vector<16x8xf32>, vector<8x24xf32>, vector<16x24xf32> -> vector<16x24xf32>
    %94 = arith.addf %67, %93 : vector<16x24xf32>
    %95 = vector.extract_strided_slice %31 {offsets = [2, 0, 0], sizes = [1, 24, 8], strides = [1, 1, 1]} : vector<4x24x8xf32> to vector<1x24x8xf32>
    %96 = vector.shape_cast %95 : vector<1x24x8xf32> to vector<24x8xf32>
    %cst_49 = arith.constant dense<0.000000e+00> : vector<16x8xf32>
    %97 = tpu.matmul %29, %96, %cst_49 {dimension_numbers = #tpu.dot_dimension_numbers<[1], [0], [0], [1], [0, 0, 1, 1], [], []>} : vector<16x24xf32>, vector<24x8xf32>, vector<16x8xf32> -> vector<16x8xf32>
    %98 = vector.extract_strided_slice %33 {offsets = [2, 0, 0], sizes = [1, 8, 24], strides = [1, 1, 1]} : vector<4x8x24xf32> to vector<1x8x24xf32>
    %99 = vector.shape_cast %98 : vector<1x8x24xf32> to vector<8x24xf32>
    %cst_50 = arith.constant dense<0.000000e+00> : vector<8x16xf32>
    %100 = tpu.matmul %99, %29, %cst_50 {dimension_numbers = #tpu.dot_dimension_numbers<[1], [1], [0], [0], [0, 0, 1, 0], [], []>} : vector<8x24xf32>, vector<16x24xf32>, vector<8x16xf32> -> vector<8x16xf32>
    %101 = vector.extract_strided_slice %35 {offsets = [2, 0, 0], sizes = [1, 24, 8], strides = [1, 1, 1]} : vector<4x24x8xf32> to vector<1x24x8xf32>
    %102 = vector.shape_cast %101 : vector<1x24x8xf32> to vector<24x8xf32>
    %cst_51 = arith.constant dense<0.000000e+00> : vector<16x8xf32>
    %103 = tpu.matmul %29, %102, %cst_51 {dimension_numbers = #tpu.dot_dimension_numbers<[1], [0], [0], [1], [0, 0, 1, 1], [], []>} : vector<16x24xf32>, vector<24x8xf32>, vector<16x8xf32> -> vector<16x8xf32>
    %cst_52 = arith.constant dense<0.000000e+00> : vector<16x16xf32>
    %104 = tpu.matmul %97, %100, %cst_52 {dimension_numbers = #tpu.dot_dimension_numbers<[1], [0], [0], [1], [0, 0, 1, 1], [], []>} : vector<16x8xf32>, vector<8x16xf32>, vector<16x16xf32> -> vector<16x16xf32>
    %cst_53 = arith.constant 0.353553385 : f32
    %105 = vector.broadcast %cst_53 : f32 to vector<16x16xf32>
    %106 = arith.mulf %104, %105 : vector<16x16xf32>
    %cst_54 = arith.constant dense<0xFF800000> : vector<16xf32>
    %107 = vector.multi_reduction <maximumf>, %106, %cst_54 [1] : vector<16x16xf32> to vector<16xf32>
    %108 = vector.shape_cast %107 : vector<16xf32> to vector<16x1xf32>
    %109 = vector.broadcast %108 : vector<16x1xf32> to vector<16x16xf32>
    %110 = arith.subf %106, %109 : vector<16x16xf32>
    %111 = math.exp %110 : vector<16x16xf32>
    %cst_55 = arith.constant dense<0.000000e+00> : vector<16xf32>
    %112 = vector.multi_reduction <add>, %111, %cst_55 [1] : vector<16x16xf32> to vector<16xf32>
    %113 = vector.shape_cast %112 : vector<16xf32> to vector<16x1xf32>
    %114 = tpu.reciprocal %113 {approx = true} : vector<16x1xf32> -> vector<16x1xf32>
    %115 = vector.broadcast %114 : vector<16x1xf32> to vector<16x16xf32>
    %116 = arith.mulf %111, %115 : vector<16x16xf32>
    %cst_56 = arith.constant dense<0.000000e+00> : vector<16x8xf32>
    %117 = tpu.matmul %116, %103, %cst_56 {dimension_numbers = #tpu.dot_dimension_numbers<[1], [0], [0], [1], [0, 0, 1, 1], [], []>} : vector<16x16xf32>, vector<16x8xf32>, vector<16x8xf32> -> vector<16x8xf32>
    %118 = vector.extract_strided_slice %37 {offsets = [2, 0, 0], sizes = [1, 8, 24], strides = [1, 1, 1]} : vector<4x8x24xf32> to vector<1x8x24xf32>
    %119 = vector.shape_cast %118 : vector<1x8x24xf32> to vector<8x24xf32>
    %cst_57 = arith.constant dense<0.000000e+00> : vector<16x24xf32>
    %120 = tpu.matmul %117, %119, %cst_57 {dimension_numbers = #tpu.dot_dimension_numbers<[1], [0], [0], [1], [0, 0, 1, 1], [], []>} : vector<16x8xf32>, vector<8x24xf32>, vector<16x24xf32> -> vector<16x24xf32>
    %121 = arith.addf %94, %120 : vector<16x24xf32>
    %122 = vector.extract_strided_slice %31 {offsets = [3, 0, 0], sizes = [1, 24, 8], strides = [1, 1, 1]} : vector<4x24x8xf32> to vector<1x24x8xf32>
    %123 = vector.shape_cast %122 : vector<1x24x8xf32> to vector<24x8xf32>
    %cst_58 = arith.constant dense<0.000000e+00> : vector<16x8xf32>
    %124 = tpu.matmul %29, %123, %cst_58 {dimension_numbers = #tpu.dot_dimension_numbers<[1], [0], [0], [1], [0, 0, 1, 1], [], []>} : vector<16x24xf32>, vector<24x8xf32>, vector<16x8xf32> -> vector<16x8xf32>
    %125 = vector.extract_strided_slice %33 {offsets = [3, 0, 0], sizes = [1, 8, 24], strides = [1, 1, 1]} : vector<4x8x24xf32> to vector<1x8x24xf32>
    %126 = vector.shape_cast %125 : vector<1x8x24xf32> to vector<8x24xf32>
    %cst_59 = arith.constant dense<0.000000e+00> : vector<8x16xf32>
    %127 = tpu.matmul %126, %29, %cst_59 {dimension_numbers = #tpu.dot_dimension_numbers<[1], [1], [0], [0], [0, 0, 1, 0], [], []>} : vector<8x24xf32>, vector<16x24xf32>, vector<8x16xf32> -> vector<8x16xf32>
    %128 = vector.extract_strided_slice %35 {offsets = [3, 0, 0], sizes = [1, 24, 8], strides = [1, 1, 1]} : vector<4x24x8xf32> to vector<1x24x8xf32>
    %129 = vector.shape_cast %128 : vector<1x24x8xf32> to vector<24x8xf32>
    %cst_60 = arith.constant dense<0.000000e+00> : vector<16x8xf32>
    %130 = tpu.matmul %29, %129, %cst_60 {dimension_numbers = #tpu.dot_dimension_numbers<[1], [0], [0], [1], [0, 0, 1, 1], [], []>} : vector<16x24xf32>, vector<24x8xf32>, vector<16x8xf32> -> vector<16x8xf32>
    %cst_61 = arith.constant dense<0.000000e+00> : vector<16x16xf32>
    %131 = tpu.matmul %124, %127, %cst_61 {dimension_numbers = #tpu.dot_dimension_numbers<[1], [0], [0], [1], [0, 0, 1, 1], [], []>} : vector<16x8xf32>, vector<8x16xf32>, vector<16x16xf32> -> vector<16x16xf32>
    %cst_62 = arith.constant 0.353553385 : f32
    %132 = vector.broadcast %cst_62 : f32 to vector<16x16xf32>
    %133 = arith.mulf %131, %132 : vector<16x16xf32>
    %cst_63 = arith.constant dense<0xFF800000> : vector<16xf32>
    %134 = vector.multi_reduction <maximumf>, %133, %cst_63 [1] : vector<16x16xf32> to vector<16xf32>
    %135 = vector.shape_cast %134 : vector<16xf32> to vector<16x1xf32>
    %136 = vector.broadcast %135 : vector<16x1xf32> to vector<16x16xf32>
    %137 = arith.subf %133, %136 : vector<16x16xf32>
    %138 = math.exp %137 : vector<16x16xf32>
    %cst_64 = arith.constant dense<0.000000e+00> : vector<16xf32>
    %139 = vector.multi_reduction <add>, %138, %cst_64 [1] : vector<16x16xf32> to vector<16xf32>
    %140 = vector.shape_cast %139 : vector<16xf32> to vector<16x1xf32>
    %141 = tpu.reciprocal %140 {approx = true} : vector<16x1xf32> -> vector<16x1xf32>
    %142 = vector.broadcast %141 : vector<16x1xf32> to vector<16x16xf32>
    %143 = arith.mulf %138, %142 : vector<16x16xf32>
    %cst_65 = arith.constant dense<0.000000e+00> : vector<16x8xf32>
    %144 = tpu.matmul %143, %130, %cst_65 {dimension_numbers = #tpu.dot_dimension_numbers<[1], [0], [0], [1], [0, 0, 1, 1], [], []>} : vector<16x16xf32>, vector<16x8xf32>, vector<16x8xf32> -> vector<16x8xf32>
    %145 = vector.extract_strided_slice %37 {offsets = [3, 0, 0], sizes = [1, 8, 24], strides = [1, 1, 1]} : vector<4x8x24xf32> to vector<1x8x24xf32>
    %146 = vector.shape_cast %145 : vector<1x8x24xf32> to vector<8x24xf32>
    %cst_66 = arith.constant dense<0.000000e+00> : vector<16x24xf32>
    %147 = tpu.matmul %144, %146, %cst_66 {dimension_numbers = #tpu.dot_dimension_numbers<[1], [0], [0], [1], [0, 0, 1, 1], [], []>} : vector<16x8xf32>, vector<8x24xf32>, vector<16x24xf32> -> vector<16x24xf32>
    %148 = arith.addf %121, %147 : vector<16x24xf32>
    %149 = arith.addf %3, %148 : vector<16x24xf32>
    %c0_67 = arith.constant 0 : index
    %c0_68 = arith.constant 0 : index
    %c0_69 = arith.constant 0 : index
    %150 = vector.load %arg18[%c0_67, %c0_68, %c0_69] : memref<1x1x24xf32, #tpu.memory_space<vmem>>, vector<1x1x24xf32>
    %151 = vector.shape_cast %150 : vector<1x1x24xf32> to vector<1x24xf32>
    %c0_70 = arith.constant 0 : index
    %c0_71 = arith.constant 0 : index
    %c0_72 = arith.constant 0 : index
    %152 = vector.load %arg19[%c0_70, %c0_71, %c0_72] : memref<1x1x24xf32, #tpu.memory_space<vmem>>, vector<1x1x24xf32>
    %153 = vector.shape_cast %152 : vector<1x1x24xf32> to vector<1x24xf32>
    %cst_73 = arith.constant dense<0.000000e+00> : vector<16xf32>
    %154 = vector.multi_reduction <add>, %149, %cst_73 [1] : vector<16x24xf32> to vector<16xf32>
    %155 = vector.shape_cast %154 : vector<16xf32> to vector<16x1xf32>
    %cst_74 = arith.constant 2.400000e+01 : f32
    %156 = vector.broadcast %cst_74 : f32 to vector<16x1xf32>
    %157 = arith.divf %155, %156 : vector<16x1xf32>
    %158 = vector.broadcast %157 : vector<16x1xf32> to vector<16x24xf32>
    %159 = arith.subf %149, %158 : vector<16x24xf32>
    %160 = arith.mulf %159, %159 : vector<16x24xf32>
    %cst_75 = arith.constant dense<0.000000e+00> : vector<16xf32>
    %161 = vector.multi_reduction <add>, %160, %cst_75 [1] : vector<16x24xf32> to vector<16xf32>
    %162 = vector.shape_cast %161 : vector<16xf32> to vector<16x1xf32>
    %cst_76 = arith.constant 2.400000e+01 : f32
    %163 = vector.broadcast %cst_76 : f32 to vector<16x1xf32>
    %164 = arith.divf %162, %163 : vector<16x1xf32>
    %165 = vector.broadcast %157 : vector<16x1xf32> to vector<16x24xf32>
    %166 = arith.subf %149, %165 : vector<16x24xf32>
    %cst_77 = arith.constant 9.99999974E-6 : f32
    %167 = vector.broadcast %cst_77 : f32 to vector<16x1xf32>
    %168 = arith.addf %164, %167 : vector<16x1xf32>
    %169 = math.rsqrt %168 : vector<16x1xf32>
    %170 = vector.broadcast %169 : vector<16x1xf32> to vector<16x24xf32>
    %171 = arith.mulf %166, %170 : vector<16x24xf32>
    %172 = vector.broadcast %151 : vector<1x24xf32> to vector<16x24xf32>
    %173 = arith.mulf %171, %172 : vector<16x24xf32>
    %174 = vector.broadcast %153 : vector<1x24xf32> to vector<16x24xf32>
    %175 = arith.addf %173, %174 : vector<16x24xf32>
    %c0_78 = arith.constant 0 : index
    %c0_79 = arith.constant 0 : index
    %c0_80 = arith.constant 0 : index
    %176 = vector.load %arg20[%c0_78, %c0_79, %c0_80] : memref<1x24x96xf32, #tpu.memory_space<vmem>>, vector<1x24x96xf32>
    %177 = vector.shape_cast %176 : vector<1x24x96xf32> to vector<24x96xf32>
    %cst_81 = arith.constant dense<0.000000e+00> : vector<16x96xf32>
    %178 = tpu.matmul %175, %177, %cst_81 {dimension_numbers = #tpu.dot_dimension_numbers<[1], [0], [0], [1], [0, 0, 1, 1], [], []>} : vector<16x24xf32>, vector<24x96xf32>, vector<16x96xf32> -> vector<16x96xf32>
    %c0_82 = arith.constant 0 : index
    %c0_83 = arith.constant 0 : index
    %c0_84 = arith.constant 0 : index
    %179 = vector.load %arg21[%c0_82, %c0_83, %c0_84] : memref<1x1x96xf32, #tpu.memory_space<vmem>>, vector<1x1x96xf32>
    %180 = vector.shape_cast %179 : vector<1x1x96xf32> to vector<1x96xf32>
    %181 = vector.broadcast %180 : vector<1x96xf32> to vector<16x96xf32>
    %182 = arith.addf %178, %181 : vector<16x96xf32>
    %183 = arith.mulf %182, %182 : vector<16x96xf32>
    %184 = arith.mulf %182, %183 : vector<16x96xf32>
    %cst_85 = arith.constant 4.471500e-02 : f32
    %185 = vector.broadcast %cst_85 : f32 to vector<16x96xf32>
    %186 = arith.mulf %185, %184 : vector<16x96xf32>
    %187 = arith.addf %182, %186 : vector<16x96xf32>
    %cst_86 = arith.constant 0.797884583 : f32
    %188 = vector.broadcast %cst_86 : f32 to vector<16x96xf32>
    %189 = arith.mulf %188, %187 : vector<16x96xf32>
    %190 = math.tanh %189 : vector<16x96xf32>
    %cst_87 = arith.constant 1.000000e+00 : f32
    %191 = vector.broadcast %cst_87 : f32 to vector<16x96xf32>
    %192 = arith.addf %191, %190 : vector<16x96xf32>
    %cst_88 = arith.constant 5.000000e-01 : f32
    %193 = vector.broadcast %cst_88 : f32 to vector<16x96xf32>
    %194 = arith.mulf %193, %192 : vector<16x96xf32>
    %195 = arith.mulf %182, %194 : vector<16x96xf32>
    %c0_89 = arith.constant 0 : index
    %c0_90 = arith.constant 0 : index
    %c0_91 = arith.constant 0 : index
    %196 = vector.load %arg22[%c0_89, %c0_90, %c0_91] : memref<1x96x24xf32, #tpu.memory_space<vmem>>, vector<1x96x24xf32>
    %197 = vector.shape_cast %196 : vector<1x96x24xf32> to vector<96x24xf32>
    %cst_92 = arith.constant dense<0.000000e+00> : vector<16x24xf32>
    %198 = tpu.matmul %195, %197, %cst_92 {dimension_numbers = #tpu.dot_dimension_numbers<[1], [0], [0], [1], [0, 0, 1, 1], [], []>} : vector<16x96xf32>, vector<96x24xf32>, vector<16x24xf32> -> vector<16x24xf32>
    %199 = arith.addf %149, %198 : vector<16x24xf32>
    %c0_93 = arith.constant 0 : index
    %c0_94 = arith.constant 0 : index
    %c0_95 = arith.constant 0 : index
    %200 = vector.load %arg23[%c0_93, %c0_94, %c0_95] : memref<1x1x24xf32, #tpu.memory_space<vmem>>, vector<1x1x24xf32>
    %201 = vector.shape_cast %200 : vector<1x1x24xf32> to vector<1x24xf32>
    %202 = vector.broadcast %201 : vector<1x24xf32> to vector<16x24xf32>
    %203 = arith.addf %199, %202 : vector<16x24xf32>
    %c0_96 = arith.constant 0 : index
    %c0_97 = arith.constant 0 : index
    %204 = vector.load %arg31[%c0_96, %c0_97] : memref<16x24xf32, #tpu.memory_space<vmem>>, vector<16x24xf32>
    tpu.vector_store %arg31[%c0_96, %c0_97], %203 {strides = array<i32>} : memref<16x24xf32, #tpu.memory_space<vmem>>, vector<16x24xf32>,
    %c0_i32_98 = arith.constant 0 : i32
    %205 = arith.cmpi eq, %arg1, %c0_i32_98 : i32
    %206 = arith.extui %205 : i1 to i32
    %c0_i32_99 = arith.constant 0 : i32
    %207 = arith.cmpi ne, %206, %c0_i32_99 : i32
    scf.if %207 {
      %208 = vector.extract_strided_slice %203 {offsets = [0, 0], sizes = [12, 24], strides = [1, 1]} : vector<16x24xf32> to vector<12x24xf32>
      %c0_100 = arith.constant 0 : index
      %c0_101 = arith.constant 0 : index
      %209 = vector.load %arg24[%c0_100, %c0_101] : memref<1x24xf32, #tpu.memory_space<vmem>>, vector<1x24xf32>
      %c0_102 = arith.constant 0 : index
      %c0_103 = arith.constant 0 : index
      %210 = vector.load %arg25[%c0_102, %c0_103] : memref<1x24xf32, #tpu.memory_space<vmem>>, vector<1x24xf32>
      %cst_104 = arith.constant dense<0.000000e+00> : vector<12xf32>
      %211 = vector.multi_reduction <add>, %208, %cst_104 [1] : vector<12x24xf32> to vector<12xf32>
      %212 = vector.shape_cast %211 : vector<12xf32> to vector<12x1xf32>
      %cst_105 = arith.constant 2.400000e+01 : f32
      %213 = vector.broadcast %cst_105 : f32 to vector<12x1xf32>
      %214 = arith.divf %212, %213 : vector<12x1xf32>
      %215 = vector.broadcast %214 : vector<12x1xf32> to vector<12x24xf32>
      %216 = arith.subf %208, %215 : vector<12x24xf32>
      %217 = arith.mulf %216, %216 : vector<12x24xf32>
      %cst_106 = arith.constant dense<0.000000e+00> : vector<12xf32>
      %218 = vector.multi_reduction <add>, %217, %cst_106 [1] : vector<12x24xf32> to vector<12xf32>
      %219 = vector.shape_cast %218 : vector<12xf32> to vector<12x1xf32>
      %cst_107 = arith.constant 2.400000e+01 : f32
      %220 = vector.broadcast %cst_107 : f32 to vector<12x1xf32>
      %221 = arith.divf %219, %220 : vector<12x1xf32>
      %222 = vector.broadcast %214 : vector<12x1xf32> to vector<12x24xf32>
      %223 = arith.subf %208, %222 : vector<12x24xf32>
      %cst_108 = arith.constant 9.99999974E-6 : f32
      %224 = vector.broadcast %cst_108 : f32 to vector<12x1xf32>
      %225 = arith.addf %221, %224 : vector<12x1xf32>
      %226 = math.rsqrt %225 : vector<12x1xf32>
      %227 = vector.broadcast %226 : vector<12x1xf32> to vector<12x24xf32>
      %228 = arith.mulf %223, %227 : vector<12x24xf32>
      %229 = vector.broadcast %209 : vector<1x24xf32> to vector<12x24xf32>
      %230 = arith.mulf %228, %229 : vector<12x24xf32>
      %231 = vector.broadcast %210 : vector<1x24xf32> to vector<12x24xf32>
      %232 = arith.addf %230, %231 : vector<12x24xf32>
      %c0_109 = arith.constant 0 : index
      %c0_110 = arith.constant 0 : index
      %233 = vector.load %arg26[%c0_109, %c0_110] : memref<24x24xf32, #tpu.memory_space<vmem>>, vector<24x24xf32>
      %cst_111 = arith.constant dense<0.000000e+00> : vector<12x24xf32>
      %234 = tpu.matmul %232, %233, %cst_111 {dimension_numbers = #tpu.dot_dimension_numbers<[1], [0], [0], [1], [0, 0, 1, 1], [], []>} : vector<12x24xf32>, vector<24x24xf32>, vector<12x24xf32> -> vector<12x24xf32>
      %c0_112 = arith.constant 0 : index
      %c0_113 = arith.constant 0 : index
      %235 = vector.load %arg27[%c0_112, %c0_113] : memref<1x24xf32, #tpu.memory_space<vmem>>, vector<1x24xf32>
      %236 = vector.broadcast %235 : vector<1x24xf32> to vector<12x24xf32>
      %237 = arith.addf %234, %236 : vector<12x24xf32>
      %c0_114 = arith.constant 0 : index
      %c0_115 = arith.constant 0 : index
      %c0_116 = arith.constant 0 : index
      %238 = vector.load %arg28[%c0_114, %c0_115, %c0_116] : memref<1x12x24xf32, #tpu.memory_space<vmem>>, vector<1x12x24xf32>
      %239 = vector.shape_cast %238 : vector<1x12x24xf32> to vector<12x24xf32>
      %240 = vector.shape_cast %237 : vector<12x24xf32> to vector<1x12x24xf32>
      tpu.vector_store %arg28[%c0_114, %c0_115, %c0_116], %240 {strides = array<i32>} : memref<1x12x24xf32, #tpu.memory_space<vmem>>, vector<1x12x24xf32>,
      %c0_117 = arith.constant 0 : index
      %c0_118 = arith.constant 0 : index
      %c0_119 = arith.constant 0 : index
      %241 = vector.load %arg4[%c0_117, %c0_118, %c0_119] : memref<1x16x16xf32, #tpu.memory_space<vmem>>, vector<1x16x16xf32>
      %242 = vector.shape_cast %241 : vector<1x16x16xf32> to vector<16x16xf32>
      %243 = vector.extract_strided_slice %242 {offsets = [0, 0], sizes = [12, 16], strides = [1, 1]} : vector<16x16xf32> to vector<12x16xf32>
      %c0_120 = arith.constant 0 : index
      %c0_121 = arith.constant 0 : index
      %c0_122 = arith.constant 0 : index
      %244 = vector.load %arg3[%c0_120, %c0_121, %c0_122] : memref<1x16x24xf32, #tpu.memory_space<vmem>>, vector<1x16x24xf32>
      %245 = vector.shape_cast %244 : vector<1x16x24xf32> to vector<16x24xf32>
      %cst_123 = arith.constant dense<0.000000e+00> : vector<12x24xf32>
      %246 = tpu.matmul %243, %245, %cst_123 {dimension_numbers = #tpu.dot_dimension_numbers<[1], [0], [0], [1], [0, 0, 1, 1], [], []>} : vector<12x16xf32>, vector<16x24xf32>, vector<12x24xf32> -> vector<12x24xf32>
      %c0_124 = arith.constant 0 : index
      %c0_125 = arith.constant 0 : index
      %c0_126 = arith.constant 0 : index
      %247 = vector.load %arg29[%c0_124, %c0_125, %c0_126] : memref<1x12x24xf32, #tpu.memory_space<vmem>>, vector<1x12x24xf32>
      %248 = vector.shape_cast %247 : vector<1x12x24xf32> to vector<12x24xf32>
      %249 = vector.shape_cast %246 : vector<12x24xf32> to vector<1x12x24xf32>
      tpu.vector_store %arg29[%c0_124, %c0_125, %c0_126], %249 {strides = array<i32>} : memref<1x12x24xf32, #tpu.memory_space<vmem>>, vector<1x12x24xf32>,
      %250 = arith.subf %237, %246 : vector<12x24xf32>
      %251 = arith.mulf %250, %250 : vector<12x24xf32>
      %252 = vector.shape_cast %251 : vector<12x24xf32> to vector<1x12x24xf32>
      %cst_127 = arith.constant dense<0.000000e+00> : vector<1xf32>
      %253 = vector.multi_reduction <add>, %252, %cst_127 [1, 2] : vector<1x12x24xf32> to vector<1xf32>
      %254 = vector.shape_cast %253 : vector<1xf32> to vector<1x1x1xf32>
      %255 = vector.extract %254[0, 0, 0] : f32 from vector<1x1x1xf32>
      %256 = vector.broadcast %255 : f32 to vector<1x1xf32>
      %c0_128 = arith.constant 0 : index
      %c0_129 = arith.constant 0 : index
      %c0_130 = arith.constant 0 : index
      %257 = vector.load %arg30[%c0_128, %c0_129, %c0_130] : memref<1x1x1xf32, #tpu.memory_space<vmem>>, vector<1x1x1xf32>
      %258 = vector.shape_cast %257 : vector<1x1x1xf32> to vector<1x1xf32>
      %259 = vector.shape_cast %256 : vector<1x1xf32> to vector<1x1x1xf32>
      tpu.vector_store %arg30[%c0_128, %c0_129, %c0_130], %259 {strides = array<i32>} : memref<1x1x1xf32, #tpu.memory_space<vmem>>, vector<1x1x1xf32>,
    } else {
    }
    return
  }
  func.func @transform_0(%arg0: i32, %arg1: i32) -> (i32, i32, i32) {
    %c0_i32 = arith.constant 0 : i32
    %c0_i32_0 = arith.constant 0 : i32
    %c0_i32_1 = arith.constant 0 : i32
    return %arg0, %c0_i32, %c0_i32_0 : i32, i32, i32
  }
  func.func @transform_1(%arg0: i32, %arg1: i32) -> (i32, i32, i32) {
    %c0_i32 = arith.constant 0 : i32
    %c0_i32_0 = arith.constant 0 : i32
    %c0_i32_1 = arith.constant 0 : i32
    return %arg0, %c0_i32, %c0_i32_0 : i32, i32, i32
  }
  func.func @transform_2(%arg0: i32, %arg1: i32) -> (i32, i32, i32) {
    %c0_i32 = arith.constant 0 : i32
    %c0_i32_0 = arith.constant 0 : i32
    %c0_i32_1 = arith.constant 0 : i32
    return %arg0, %c0_i32, %c0_i32_0 : i32, i32, i32
  }
  func.func @transform_3(%arg0: i32, %arg1: i32) -> (i32, i32) {
    %c0_i32 = arith.constant 0 : i32
    %c0_i32_0 = arith.constant 0 : i32
    %c0_i32_1 = arith.constant 0 : i32
    return %c0_i32, %c0_i32_0 : i32, i32
  }
  func.func @transform_4(%arg0: i32, %arg1: i32) -> (i32, i32) {
    %c0_i32 = arith.constant 0 : i32
    %c0_i32_0 = arith.constant 0 : i32
    %c0_i32_1 = arith.constant 0 : i32
    return %c0_i32, %c0_i32_0 : i32, i32
  }
  func.func @transform_5(%arg0: i32, %arg1: i32) -> (i32, i32) {
    %c0_i32 = arith.constant 0 : i32
    %c0_i32_0 = arith.constant 0 : i32
    %c0_i32_1 = arith.constant 0 : i32
    return %c0_i32, %c0_i32_0 : i32, i32
  }
  func.func @transform_6(%arg0: i32, %arg1: i32) -> (i32, i32) {
    %c0_i32 = arith.constant 0 : i32
    %c0_i32_0 = arith.constant 0 : i32
    %c0_i32_1 = arith.constant 0 : i32
    return %c0_i32, %c0_i32_0 : i32, i32
  }
  func.func @transform_7(%arg0: i32, %arg1: i32) -> (i32, i32) {
    %c0_i32 = arith.constant 0 : i32
    %c0_i32_0 = arith.constant 0 : i32
    %c0_i32_1 = arith.constant 0 : i32
    return %c0_i32, %c0_i32_0 : i32, i32
  }
  func.func @transform_8(%arg0: i32, %arg1: i32) -> (i32, i32) {
    %c0_i32 = arith.constant 0 : i32
    %c0_i32_0 = arith.constant 0 : i32
    %c0_i32_1 = arith.constant 0 : i32
    return %c0_i32, %c0_i32_0 : i32, i32
  }
  func.func @transform_9(%arg0: i32, %arg1: i32) -> (i32, i32, i32) {
    %c0_i32 = arith.constant 0 : i32
    %c0_i32_0 = arith.constant 0 : i32
    %c0_i32_1 = arith.constant 0 : i32
    return %arg1, %c0_i32, %c0_i32_0 : i32, i32, i32
  }
  func.func @transform_10(%arg0: i32, %arg1: i32) -> (i32, i32, i32) {
    %c0_i32 = arith.constant 0 : i32
    %c0_i32_0 = arith.constant 0 : i32
    %c0_i32_1 = arith.constant 0 : i32
    return %arg1, %c0_i32, %c0_i32_0 : i32, i32, i32
  }
  func.func @transform_11(%arg0: i32, %arg1: i32) -> (i32, i32, i32, i32) {
    %c0_i32 = arith.constant 0 : i32
    %c0_i32_0 = arith.constant 0 : i32
    %c0_i32_1 = arith.constant 0 : i32
    %c0_i32_2 = arith.constant 0 : i32
    return %arg1, %c0_i32, %c0_i32_0, %c0_i32_1 : i32, i32, i32, i32
  }
  func.func @transform_12(%arg0: i32, %arg1: i32) -> (i32, i32, i32, i32) {
    %c0_i32 = arith.constant 0 : i32
    %c0_i32_0 = arith.constant 0 : i32
    %c0_i32_1 = arith.constant 0 : i32
    %c0_i32_2 = arith.constant 0 : i32
    return %arg1, %c0_i32, %c0_i32_0, %c0_i32_1 : i32, i32, i32, i32
  }
  func.func @transform_13(%arg0: i32, %arg1: i32) -> (i32, i32, i32, i32) {
    %c0_i32 = arith.constant 0 : i32
    %c0_i32_0 = arith.constant 0 : i32
    %c0_i32_1 = arith.constant 0 : i32
    %c0_i32_2 = arith.constant 0 : i32
    return %arg1, %c0_i32, %c0_i32_0, %c0_i32_1 : i32, i32, i32, i32
  }
  func.func @transform_14(%arg0: i32, %arg1: i32) -> (i32, i32, i32, i32) {
    %c0_i32 = arith.constant 0 : i32
    %c0_i32_0 = arith.constant 0 : i32
    %c0_i32_1 = arith.constant 0 : i32
    %c0_i32_2 = arith.constant 0 : i32
    return %arg1, %c0_i32, %c0_i32_0, %c0_i32_1 : i32, i32, i32, i32
  }
  func.func @transform_15(%arg0: i32, %arg1: i32) -> (i32, i32, i32) {
    %c0_i32 = arith.constant 0 : i32
    %c0_i32_0 = arith.constant 0 : i32
    %c0_i32_1 = arith.constant 0 : i32
    return %arg1, %c0_i32, %c0_i32_0 : i32, i32, i32
  }
  func.func @transform_16(%arg0: i32, %arg1: i32) -> (i32, i32, i32) {
    %c0_i32 = arith.constant 0 : i32
    %c0_i32_0 = arith.constant 0 : i32
    %c0_i32_1 = arith.constant 0 : i32
    return %arg1, %c0_i32, %c0_i32_0 : i32, i32, i32
  }
  func.func @transform_17(%arg0: i32, %arg1: i32) -> (i32, i32, i32) {
    %c0_i32 = arith.constant 0 : i32
    %c0_i32_0 = arith.constant 0 : i32
    %c0_i32_1 = arith.constant 0 : i32
    return %arg1, %c0_i32, %c0_i32_0 : i32, i32, i32
  }
  func.func @transform_18(%arg0: i32, %arg1: i32) -> (i32, i32, i32) {
    %c0_i32 = arith.constant 0 : i32
    %c0_i32_0 = arith.constant 0 : i32
    %c0_i32_1 = arith.constant 0 : i32
    return %arg1, %c0_i32, %c0_i32_0 : i32, i32, i32
  }
  func.func @transform_19(%arg0: i32, %arg1: i32) -> (i32, i32, i32) {
    %c0_i32 = arith.constant 0 : i32
    %c0_i32_0 = arith.constant 0 : i32
    %c0_i32_1 = arith.constant 0 : i32
    return %arg1, %c0_i32, %c0_i32_0 : i32, i32, i32
  }
  func.func @transform_20(%arg0: i32, %arg1: i32) -> (i32, i32, i32) {
    %c0_i32 = arith.constant 0 : i32
    %c0_i32_0 = arith.constant 0 : i32
    %c0_i32_1 = arith.constant 0 : i32
    return %arg1, %c0_i32, %c0_i32_0 : i32, i32, i32
  }
  func.func @transform_21(%arg0: i32, %arg1: i32) -> (i32, i32, i32) {
    %c0_i32 = arith.constant 0 : i32
    %c0_i32_0 = arith.constant 0 : i32
    %c0_i32_1 = arith.constant 0 : i32
    return %arg1, %c0_i32, %c0_i32_0 : i32, i32, i32
  }
  func.func @transform_22(%arg0: i32, %arg1: i32) -> (i32, i32) {
    %c0_i32 = arith.constant 0 : i32
    %c0_i32_0 = arith.constant 0 : i32
    %c0_i32_1 = arith.constant 0 : i32
    return %c0_i32, %c0_i32_0 : i32, i32
  }
  func.func @transform_23(%arg0: i32, %arg1: i32) -> (i32, i32) {
    %c0_i32 = arith.constant 0 : i32
    %c0_i32_0 = arith.constant 0 : i32
    %c0_i32_1 = arith.constant 0 : i32
    return %c0_i32, %c0_i32_0 : i32, i32
  }
  func.func @transform_24(%arg0: i32, %arg1: i32) -> (i32, i32) {
    %c0_i32 = arith.constant 0 : i32
    %c0_i32_0 = arith.constant 0 : i32
    %c0_i32_1 = arith.constant 0 : i32
    return %c0_i32, %c0_i32_0 : i32, i32
  }
  func.func @transform_25(%arg0: i32, %arg1: i32) -> (i32, i32) {
    %c0_i32 = arith.constant 0 : i32
    %c0_i32_0 = arith.constant 0 : i32
    %c0_i32_1 = arith.constant 0 : i32
    return %c0_i32, %c0_i32_0 : i32, i32
  }
  func.func @transform_26(%arg0: i32, %arg1: i32) -> (i32, i32, i32) {
    %c0_i32 = arith.constant 0 : i32
    %c0_i32_0 = arith.constant 0 : i32
    %c0_i32_1 = arith.constant 0 : i32
    return %arg0, %c0_i32, %c0_i32_0 : i32, i32, i32
  }
  func.func @transform_27(%arg0: i32, %arg1: i32) -> (i32, i32, i32) {
    %c0_i32 = arith.constant 0 : i32
    %c0_i32_0 = arith.constant 0 : i32
    %c0_i32_1 = arith.constant 0 : i32
    return %arg0, %c0_i32, %c0_i32_0 : i32, i32, i32
  }
  func.func @transform_28(%arg0: i32, %arg1: i32) -> (i32, i32, i32) {
    %c0_i32 = arith.constant 0 : i32
    %c0_i32_0 = arith.constant 0 : i32
    %c0_i32_1 = arith.constant 0 : i32
    return %arg0, %c0_i32, %c0_i32_0 : i32, i32, i32
  }
}

</mosaic_0001>

<bundles_post_ra>
// kernel: dmae_forward.2
= control target key start
LH: loop header
LB: loop body
LE: loop exit
PB: predicated region body
PF: predicated region fallthrough
CT: control target
= control target key end

     0   :  { %s4019_s22 = smov 0   ;;  %s4021_s23 = smov 0   ;;  %s4490_s0 = inlined_call_operand.vmem [shape: f32[2,16,24], index: 0, kind: input, shape index: {}]   ;;  %s4491_s1 = inlined_call_operand.vmem [shape: f32[2,4,16], index: 1, kind: input, shape index: {}]   ;;  %s4492_s2 = inlined_call_operand.vmem [shape: f32[24,32], index: 2, kind: input, shape index: {}]   ;;  %s4493_s3 = inlined_call_operand.vmem [shape: f32[1,32], index: 3, kind: input, shape index: {}]   ;;  %s4494_s4 = inlined_call_operand.vmem [shape: f32[1,16,32], index: 4, kind: input, shape index: {}]   ;;  %s4495_s5 = inlined_call_operand.vmem [shape: f32[1,1,32], index: 5, kind: input, shape index: {}]   ;;  %s4496_s6 = inlined_call_operand.vmem [shape: f32[1,1,32], index: 6, kind: input, shape index: {}]   ;;  %s4497_s7 = inlined_call_operand.vmem [shape: f32[1,4,32,8], index: 7, kind: input, shape index: {}]   ;;  %s4498_s8 = inlined_call_operand.vmem [shape: f32[1,4,8,32], index: 8, kind: input, shape index: {}]   ;;  %s4499_s9 = inlined_call_operand.vmem [shape: f32[1,4,32,8], index: 9, kind: input, shape index: {}]   ;;  %s4500_s10 = inlined_call_operand.vmem [shape: f32[1,4,8,32], index: 10, kind: input, shape index: {}]   ;;  %s4501_s11 = inlined_call_operand.vmem [shape: f32[1,1,32], index: 11, kind: input, shape index: {}]   ;;  %s4502_s12 = inlined_call_operand.vmem [shape: f32[1,1,32], index: 12, kind: input, shape index: {}]   ;;  %s4503_s13 = inlined_call_operand.vmem [shape: f32[1,1,32], index: 13, kind: input, shape index: {}]   ;;  %s4504_s14 = inlined_call_operand.vmem [shape: f32[1,32,128], index: 14, kind: input, shape index: {}]   ;;  %s4505_s15 = inlined_call_operand.vmem [shape: f32[1,1,128], index: 15, kind: input, shape index: {}]   ;;  %s4506_s16 = inlined_call_operand.vmem [shape: f32[1,128,32], index: 16, kind: input, shape index: {}]   ;;  %s4507_s17 = inlined_call_operand.vmem [shape: f32[1,1,32], index: 17, kind: input, shape index: {}]   ;;  %s4508_s18 = inlined_call_operand.vmem [shape: f32[1,32], index: 18, kind: input, shape index: {}]   ;;  %s4509_s19 = inlined_call_operand.vmem [shape: f32[1,32], index: 19, kind: input, shape index: {}]   ;;  %s4510_s20 = inlined_call_operand.vmem [shape: f32[2,4,32], index: 20, kind: output, shape index: {}]  }
   0x1   :  { %4515 = sst [smem:[#allocation5_spill]] %s4490_s0 }
   0x2   :  { %4516 = sst [smem:[#allocation6_spill]] %s4491_s1  ;;  %s4017_s1 = smov 0  }
   0x3   :  { %4517 = sst [smem:[#allocation7_spill]] %s4492_s2 }
   0x4   :  { %4518 = sst [smem:[#allocation8_spill]] %s4493_s3 }
   0x5   :  { %4519 = sst [smem:[#allocation9_spill]] %s4494_s4 }
   0x6 LB: > { %4520 = sst [smem:[#allocation3_spill]] %s3904_s22  ;;  %s42_s24 = sadd.s32 1, %s3904_s22  ;;  %s3908_s23 = sphi %s4021_s23, %s30_s23   ;;  %s3904_s22 = sphi %s4019_s22, %s4528_s22   ;;  %s3900_s1 = sphi %s4017_s1, %s4527_s1  }
   0x7   : > { %p3450_p0 = scmp.ge.s32.totalorder %s3908_s23, 1  ;;  %p44_p1 = scmp.ge.s32.totalorder %s42_s24, 2 }
   0x8   : > { %p699_p2 = scmp.lt.s32.totalorder %s3908_s23, 3 }
   0x9   : > { %s4530_s24 = smov (%p44_p1, %s42_s24), 0 }
   0xa   : > { %4521 = sst [smem:[#allocation4_spill]] %s4530_s24  ;;  %p700_p3 = pnand %p3450_p0, %p699_p2 }
   0xb   : > { %s4522_s3 = sld [smem:[#allocation7_spill]] (!%p700_p3)  ;;  %p811_p4 = scmp.lt.s32.totalorder (!%p700_p3), %s3900_s1, 1 }
   0xc   : > { %703 = sbr.rel (%p700_p3) target bundleno = 5560 (0x15b8), region = 100  ;;  %s4523_s21 = sld [smem:[#allocation5_spill]] (!%p700_p3) }
   0xd   : > { %s4524_s27 = sld [smem:[#allocation8_spill]] (!%p700_p3) }
   0xe   : > { %s4525_s30 = sld [smem:[#allocation9_spill]] (!%p700_p3) }
   0xf   : > { %s4526_s24 = sld [smem:[#allocation6_spill]] (!%p700_p3) }
  0x11   : > { %v883_v0 = vld [vmem:[%s4522_s3 + $0x10] sm:$0xff]  ;;  %v882_v1 = vld [vmem:[%s4522_s3 + $0x8] sm:$0xff]  ;;  %v881_v2 = vld [vmem:[%s4522_s3] sm:$0xff]  ;;  %s4532_s1 = smov (!%p811_p4, %s3900_s1), 1  ;;  %vm891_vm0 = vcmask 195584   ;;  %v3910_v5 = vmov 0.0  }
  0x12   : > { %3606 = vmatprep.subr.mxu1 %v883_v0  ;;  %s3503_s29 = sshll.u32 %s4532_s1, 4  ;;  %3633 = vmatprep.subr.mxu0 %v3910_v5  ;;  %vm3911_vm1 = vmmov 0   ;;  %s3453_s28 = sshll.u32 %s4532_s1, 2  ;;  %vm978_vm2 = vcmask 130048   ;;  %vm1052_vm3 = vcmask 257024   ;;  %v1089_v25 = vld [vmem:[%s4497_s7 + $0x18] sm:$0xff] }
  0x13   : > { %3607 = vmatpush3.msra.mxu1 %v883_v0  ;;  %s815_s2 = scalar_lea.vmem %s4523_s21, %s3503_s29  ;;  %3635 = vmatprep.mubr.msk.f32.mxu0 %vm3911_vm1, %v3910_v5  ;;  %v3455_v6 = vld [vmem:[%s4524_s27] ss:$0 sm:$0xff]  ;;  %v1088_v26 = vld [vmem:[%s4497_s7 + $0x10] sm:$0xff]  ;;  %v1087_v27 = vld [vmem:[%s4497_s7 + $0x8] sm:$0xff]  ;;  %vm1127_vm4 = vcmask 261120   ;;  %vm1344_vm5 = vcmask 64512   ;;  %s874_s0 = scalar_lea.vmem %s4510_s20, %s3453_s28 }
  0x14   : > { %3608 = vmatprep.subr.mxu1 %v882_v1  ;;  %v879_v3 = vld [vmem:[%s815_s2] sm:$0xff]  ;;  %v880_v4 = vld [vmem:[%s815_s2 + $0x8] sm:$0xff]  ;;  %v1109_v38 = vld [vmem:[%s4499_s9 + $0x18] sm:$0xff]  ;;  %vm1435_vm6 = vcmask 1043456   ;;  %vm1419_vm7 = vcmask 27648   ;;  %vm1431_vm8 = vcmask 31744  }
  0x15   : > { %3609 = vmatpush3.msra.mxu1 %v882_v1  ;;  %3612 = vmatprep.mubr.msk.f32.mxu1 %vm891_vm0, %v879_v3  ;;  %v974_v8 = vld [vmem:[%s4525_s30 + $0x8] sm:$0xff]  ;;  %v973_v11 = vld [vmem:[%s4525_s30] sm:$0xff]  ;;  %s819_s22 = scalar_lea.vmem %s4526_s24, %s3453_s28  ;;  %v1108_v39 = vld [vmem:[%s4499_s9 + $0x10] sm:$0xff] }
  0x16   : > { %3610 = vmatprep.subr.mxu1 %v881_v2  ;;  %v977_v15 = vld [vmem:[%s819_s22] sm:$0xf]  ;;  %v1107_v41 = vld [vmem:[%s4499_s9 + $0x8] sm:$0xff]  ;;  %v1093_v62 = vld [vmem:[%s4497_s7 + $0x38] sm:$0xff] }
  0x17   : > { %3611 = vmatpush3.msra.mxu1 %v881_v2  ;;  %v1086_v28 = vld [vmem:[%s4497_s7] sm:$0xff]  ;;  %v1092_v63 = vld [vmem:[%s4497_s7 + $0x30] sm:$0xff]  ;;  %v1091_v0 = vld [vmem:[%s4497_s7 + $0x28] sm:$0xff] }
  0x18   : > { %3613 = vmatmul.mubr.msk.f32.vlgmr.msra.gmra.mxu1 %vm891_vm0, %v880_v4  ;;  %3615 = vmatprep.subr.mxu1 %v3910_v5  ;;  %v3459_v33 = vld [vmem:[%s4495_s5] ss:$0 sm:$0xff]  ;;  %v1103_v4 = vld [vmem:[%s4498_s8 + $0x8] sm:$0xff] }
  0x19   : > { %3619 = vmatprep.mubr.msk.f32.mxu1 %vm3911_vm1, %v3910_v5  ;;  %v3460_v35 = vld [vmem:[%s4496_s6] ss:$0 sm:$0xff] }
  0x1a   : > { %v1102_v40 = vld [vmem:[%s4498_s8] sm:$0xff] }
  0x1b   : > { %v1106_v42 = vld [vmem:[%s4499_s9] sm:$0xff] }
  0x1c   : > { %v1122_v58 = vld [vmem:[%s4500_s10] sm:$0xff] }
  0x1d   : > { %v1090_v1 = vld [vmem:[%s4497_s7 + $0x20] sm:$0xff] }
  0xd8   : > { %v3614_v7 = vpop.f32.mrf.mxu1 }
  0xd9   : > { %v970_v9 = vadd.f32 %v3614_v7, %v3455_v6  ;;  %v1112_v7 = vld [vmem:[%s4499_s9 + $0x30] sm:$0xff] }
  0xda   : > { %v964_v10 = vpop.f32.mrf.mxu1 }
  0xdb   : > { %v976_v12 = vadd.f32 %v974_v8, %v970_v9  ;;  %v965_v13 = vadd.f32 %v3455_v6, %v964_v10  ;;  %v1113_v6 = vld [vmem:[%s4499_s9 + $0x38] sm:$0xff]  ;;  %v1111_v8 = vld [vmem:[%s4499_s9 + $0x28] sm:$0xff]  ;;  %v1110_v10 = vld [vmem:[%s4499_s9 + $0x20] sm:$0xff] }
  0xdd   : > { %v975_v14 = vadd.f32 %v973_v11, %v965_v13  ;;  %3616 = vmatpush3.msra.mxu1 %v976_v12 }
  0xde   : > { %3617 = vmatprep.subr.mxu1 %v3910_v5 }
  0xdf   : > { %3618 = vmatpush3.msra.mxu1 %v975_v14 }
  0xe0   : > { %3620 = vmatmul.mubr.msk.f32.vlgmr.msra.gmra.mxu1 %vm978_vm2, %v977_v15  ;;  %3622 = vmatprep.subr.mxu1 %v3910_v5 }
  0xe1   : > { %3630 = vmatprep.mubr.msk.f32.mxu1 %vm3911_vm1, %v3910_v5  ;;  %3623 = vmatpush3.msra.mxu1 %v1089_v25 }
  0xe2   : > { %3624 = vmatprep.subr.mxu1 %v3910_v5 }
  0xe3   : > { %3625 = vmatpush3.msra.mxu1 %v1088_v26 }
  0xe4   : > { %3626 = vmatprep.subr.mxu1 %v3910_v5 }
  0xe5   : > { %3627 = vmatpush3.msra.mxu1 %v1087_v27 }
  0xe6   : > { %3628 = vmatprep.subr.mxu1 %v3910_v5 }
  0xe7   : > { %3629 = vmatpush3.msra.mxu1 %v1086_v28  ;;  %v1123_v28 = vld [vmem:[%s4500_s10 + $0x8] sm:$0xff] }
  0xe8   : > { %3638 = vmatprep.subr.mxu1 %v3910_v5 }
 0x1a0   : > { %v1048_v16 = vpop.f32.mrf.mxu1 }
 0x1a1   : > { %1053 = vst.msk [vmem:[#allocation2] sm:$0xf] %vm1052_vm3, %v1048_v16 }
 0x1a2   : > { %v3621_v17 = vpop.f32.mrf.mxu1 }
 0x1a8   : > { %v4076_v18 = vld [vmem:[#allocation2] sm:$0xf] }
 0x1a9   : > { %v1058_v19 = vsel %vm1052_vm3, %v4076_v18, 0.0 }
 0x1aa   : > { %1059 = vadd.xlane.f32.xlu0 %v1058_v19 }
 0x233   : > { %v1060_v20 = vpop.xlane.xlu0 %1059 }
 0x234   : > { %v1062_v21 = vmul.f32 0.03125, %v1060_v20 }
 0x236   : > { %v1063_v22 = vsub.f32 %v4076_v18, %v1062_v21 }
 0x238   : > { %v1064_v23 = vmul.f32 %v1063_v22, %v1063_v22 }
 0x23a   : > { %v1065_v24 = vsel %vm1052_vm3, %v1064_v23, 0.0 }
 0x23b   : > { %1066 = vadd.xlane.f32.xlu0 %v1065_v24 }
 0x2c4   : > { %v1067_v29 = vpop.xlane.xlu0 %1066 }
 0x2c5   : > { %v1068_v30 = vmul.f32 0.03125, %v1067_v29 }
 0x2c7   : > { %v1069_v31 = vadd.f32 1e-05, %v1068_v30 }
 0x2c9   : > { %3862 = vrsqrt.f32 %v1069_v31 }
 0x2d6   : > { %v3863_v32 = vpop.eup %3862 }
 0x2d7   : > { %v1071_v34 = vmul.f32 %v3863_v32, %v1063_v22  ;;  %v1097_v32 = vld [vmem:[%s4497_s7 + $0x58] sm:$0xff] }
 0x2d9   : > { %v1078_v36 = vmul.f32 %v3459_v33, %v1071_v34  ;;  %v1096_v33 = vld [vmem:[%s4497_s7 + $0x50] sm:$0xff]  ;;  %v1095_v34 = vld [vmem:[%s4497_s7 + $0x48] sm:$0xff] }
 0x2db   : > { %v4104_v37 = vadd.f32 %v3460_v35, %v1078_v36  ;;  %v1094_v35 = vld [vmem:[%s4497_s7 + $0x40] sm:$0xff] }
 0x2dd   : > { %3631 = vmatmul.mubr.msk.f32.vlgmr.msra.gmra.mxu1 %vm1127_vm4, %v4104_v37  ;;  %3634 = vmatpush3.xpose.msk.msra.mxu0 %vm1127_vm4, %v4104_v37 }
 0x2de   : > { %3639 = vmatpush3.msra.mxu1 %v1109_v38  ;;  %3646 = vmatprep.mubr.msk.f32.mxu1 %vm3911_vm1, %v3910_v5 }
 0x2df   : > { %3640 = vmatprep.subr.mxu1 %v3910_v5  ;;  %3659 = vmatprep.subr.mxu0 %v3910_v5 }
 0x2e0   : > { %3641 = vmatpush3.msra.mxu1 %v1108_v39  ;;  %3636 = vmatmul.mubr.msk.f32.vlgmr.msra.gmra.mxu0 %vm1127_vm4, %v1102_v40  ;;  %v1104_v39 = vld [vmem:[%s4498_s8 + $0x10] sm:$0xff]  ;;  %v1117_v40 = vld [vmem:[%s4499_s9 + $0x58] sm:$0xff] }
 0x2e1   : > { %3642 = vmatprep.subr.mxu1 %v3910_v5  ;;  %3661 = vmatprep.mubr.msk.f32.mxu0 %vm3911_vm1, %v3910_v5 }
 0x2e2   : > { %3643 = vmatpush3.msra.mxu1 %v1107_v41  ;;  %3660 = vmatpush3.msra.mxu0 %v1122_v58  ;;  %v1116_v41 = vld [vmem:[%s4499_s9 + $0x50] sm:$0xff] }
 0x2e3   : > { %3644 = vmatprep.subr.mxu1 %v3910_v5  ;;  %3675 = vmatprep.subr.mxu0 %v3910_v5 }
 0x2e4   : > { %3645 = vmatpush3.msra.mxu1 %v1106_v42  ;;  %v1115_v42 = vld [vmem:[%s4499_s9 + $0x48] sm:$0xff] }
 0x2e5   : > { %3647 = vmatmul.mubr.msk.f32.vlgmr.msra.gmra.mxu1 %vm1127_vm4, %v4104_v37  ;;  %3649 = vmatprep.subr.mxu1 %v3910_v5 }
 0x2e6   : > { %3651 = vmatprep.mubr.msk.f32.mxu1 %vm3911_vm1, %v3910_v5 }
 0x39d   : > { %v1197_v43 = vpop.f32.mrf.mxu1 }
 0x39f   : > { %v3632_v44 = vpop.f32.mrf.mxu1 }
 0x3a0   : > { %v1270_v45 = vpop.f32.mrf.mxu0  ;;  %v1114_v44 = vld [vmem:[%s4499_s9 + $0x40] sm:$0xff] }
 0x3a1   : > { %3650 = vmatpush3.msra.mxu1 %v1270_v45 }
 0x3a2   : > { %v3637_v46 = vpop.f32.mrf.mxu0  ;;  %3652 = vmatmul.mubr.msk.f32.vlgmr.msra.gmra.mxu1 %vm1344_vm5, %v1197_v43  ;;  %3654 = vmatprep.subr.mxu1 %v3910_v5 }
 0x3a3   : > { %3656 = vmatprep.mubr.msk.f32.mxu1 %vm3911_vm1, %v3910_v5  ;;  %v3469_v46 = vld [vmem:[%s4501_s11] ss:$0 sm:$0xff] }
 0x3a5   : > { %v1340_v47 = vpop.f32.mrf.mxu1 }
 0x3a6   : > { %3655 = vmatpush3.msk.msra.mxu1 %vm1435_vm6, %v1340_v47 }
 0x3a7   : > { %v3648_v48 = vpop.f32.mrf.mxu1  ;;  %3664 = vmatprep.subr.mxu1 %v3910_v5 }
 0x462   : > { %v1414_v49 = vpop.f32.mrf.mxu1 }
 0x463   : > { %v1418_v50 = vmul.f32 0.35355338, %v1414_v49 }
 0x464   : > { %v3653_v51 = vpop.f32.mrf.mxu1 }
 0x465   : > { %v1420_v52 = vsel %vm1419_vm7, %v1418_v50, -inf }
 0x466   : > { %1421 = vmax.xlane.f32.xlu1 %v1420_v52 }
 0x4ef   : > { %v1422_v53 = vpop.xlane.xlu1 %1421 }
 0x4f0   : > { %v1423_v54 = vsub.f32 %v1418_v50, %v1422_v53 }
 0x4f2   : > { %v1424_v55 = vmul.f32 1.442695, %v1423_v54 }
 0x4f4   : > { %3864 = vpow2.f32 %v1424_v55 }
 0x501   : > { %v3865_v56 = vpop.eup %3864 }
 0x502   : > { %v1426_v57 = vsel %vm1419_vm7, %v3865_v56, 0.0 }
 0x503   : > { %1427 = vadd.xlane.f32.xlu1 %v1426_v57 }
 0x58c   : > { %v1428_v59 = vpop.xlane.xlu1 %1427 }
 0x58d   : > { %3866 = vrcp.f32 %v1428_v59 }
 0x59a   : > { %v3867_v60 = vpop.eup %3866 }
 0x59b   : > { %v1430_v61 = vmul.f32 %v3867_v60, %v3865_v56 }
 0x59d   : > { %3657 = vmatmul.mubr.msk.f32.vlgmr.msra.gmra.mxu1 %vm1431_vm8, %v1430_v61 }
 0x59e   : > { %3665 = vmatpush3.msra.mxu1 %v1093_v62  ;;  %3672 = vmatprep.mubr.msk.f32.mxu1 %vm3911_vm1, %v3910_v5 }
 0x59f   : > { %3666 = vmatprep.subr.mxu1 %v3910_v5 }
 0x5a0   : > { %3667 = vmatpush3.msra.mxu1 %v1092_v63 }
 0x5a1   : > { %3668 = vmatprep.subr.mxu1 %v3910_v5 }
 0x5a2   : > { %3669 = vmatpush3.msra.mxu1 %v1091_v0  ;;  %v1124_v0 = vld [vmem:[%s4500_s10 + $0x10] sm:$0xff] }
 0x5a3   : > { %3670 = vmatprep.subr.mxu1 %v3910_v5 }
 0x5a4   : > { %3671 = vmatpush3.msra.mxu1 %v1090_v1 }
 0x5a5   : > { %3673 = vmatmul.mubr.msk.f32.vlgmr.msra.gmra.mxu1 %vm1127_vm4, %v4104_v37  ;;  %3691 = vmatprep.subr.mxu1 %v3910_v5 }
 0x5a6   : > { %3693 = vmatprep.mubr.msk.f32.mxu1 %vm3911_vm1, %v3910_v5 }
 0x65d   : > { %v1505_v2 = vpop.f32.mrf.mxu1 }
 0x65e   : > { %3662 = vmatmul.mubr.msk.f32.vlgmr.msra.gmra.mxu0 %vm1344_vm5, %v1505_v2 }
 0x65f   : > { %3676 = vmatpush3.xpose.msk.msra.mxu0 %vm1127_vm4, %v4104_v37  ;;  %v3658_v3 = vpop.f32.mrf.mxu1  ;;  %3677 = vmatprep.mubr.msk.f32.mxu0 %vm3911_vm1, %v3910_v5 }
 0x660   : > { %3680 = vmatprep.subr.mxu0 %v3910_v5 }
 0x662   : > { %3678 = vmatmul.mubr.msk.f32.vlgmr.msra.gmra.mxu0 %vm1127_vm4, %v1103_v4  ;;  %v1101_v4 = vld [vmem:[%s4497_s7 + $0x78] sm:$0xff] }
 0x663   : > { %3681 = vmatpush3.msra.mxu0 %v1113_v6  ;;  %3688 = vmatprep.mubr.msk.f32.mxu0 %vm3911_vm1, %v3910_v5  ;;  %v1100_v6 = vld [vmem:[%s4497_s7 + $0x70] sm:$0xff] }
 0x664   : > { %3682 = vmatprep.subr.mxu0 %v3910_v5 }
 0x665   : > { %v1655_v9 = vpop.f32.mrf.mxu1  ;;  %3683 = vmatpush3.msra.mxu0 %v1112_v7  ;;  %v1099_v7 = vld [vmem:[%s4497_s7 + $0x68] sm:$0xff] }
 0x666   : > { %3684 = vmatprep.subr.mxu0 %v3910_v5 }
 0x667   : > { %v3674_v11 = vpop.f32.mrf.mxu1  ;;  %3685 = vmatpush3.msra.mxu0 %v1111_v8  ;;  %v1098_v8 = vld [vmem:[%s4497_s7 + $0x60] sm:$0xff] }
 0x668   : > { %3686 = vmatprep.subr.mxu0 %v3910_v5  ;;  %v1105_v11 = vld [vmem:[%s4498_s8 + $0x18] sm:$0xff] }
 0x669   : > { %3687 = vmatpush3.msra.mxu0 %v1110_v10 }
 0x66a   : > { %3689 = vmatmul.mubr.msk.f32.vlgmr.msra.gmra.mxu0 %vm1127_vm4, %v4104_v37  ;;  %3701 = vmatprep.subr.mxu0 %v3910_v5 }
 0x66b   : > { %3703 = vmatprep.mubr.msk.f32.mxu0 %vm3911_vm1, %v3910_v5  ;;  %3702 = vmatpush3.msra.mxu0 %v1123_v28 }
 0x66c   : > { %3717 = vmatprep.subr.mxu0 %v3910_v5 }
 0x71e   : > { %v4206_v12 = vpop.f32.mrf.mxu0 }
 0x71f   : > { %v1588_v47 = vadd.f32 %v3469_v46, %v4206_v12  ;;  %v1121_v12 = vld [vmem:[%s4499_s9 + $0x78] sm:$0xff] }
 0x720   : > { %v3663_v13 = vpop.f32.mrf.mxu0 }
 0x721   : > { %v1120_v13 = vld [vmem:[%s4499_s9 + $0x70] sm:$0xff] }
 0x722   : > { %v1728_v14 = vpop.f32.mrf.mxu0 }
 0x723   : > { %3692 = vmatpush3.msra.mxu1 %v1728_v14  ;;  %v1119_v14 = vld [vmem:[%s4499_s9 + $0x68] sm:$0xff] }
 0x724   : > { %v3679_v15 = vpop.f32.mrf.mxu0  ;;  %3694 = vmatmul.mubr.msk.f32.vlgmr.msra.gmra.mxu1 %vm1344_vm5, %v1655_v9  ;;  %3696 = vmatprep.subr.mxu1 %v3910_v5 }
 0x725   : > { %3698 = vmatprep.mubr.msk.f32.mxu1 %vm3911_vm1, %v3910_v5 }
 0x72a   : > { %v1798_v16 = vpop.f32.mrf.mxu0 }
 0x72b   : > { %3697 = vmatpush3.msk.msra.mxu1 %vm1435_vm6, %v1798_v16  ;;  %v1118_v16 = vld [vmem:[%s4499_s9 + $0x60] sm:$0xff] }
 0x72c   : > { %v3690_v17 = vpop.f32.mrf.mxu0  ;;  %3706 = vmatprep.subr.mxu1 %v3910_v5 }
 0x7e4   : > { %v1871_v19 = vpop.f32.mrf.mxu1 }
 0x7e5   : > { %v1875_v20 = vmul.f32 0.35355338, %v1871_v19 }
 0x7e6   : > { %v3695_v21 = vpop.f32.mrf.mxu1 }
 0x7e7   : > { %v1876_v22 = vsel %vm1419_vm7, %v1875_v20, -inf }
 0x7e8   : > { %1877 = vmax.xlane.f32.xlu0 %v1876_v22 }
 0x871   : > { %v1878_v23 = vpop.xlane.xlu0 %1877 }
 0x872   : > { %v1879_v24 = vsub.f32 %v1875_v20, %v1878_v23 }
 0x874   : > { %v1880_v25 = vmul.f32 1.442695, %v1879_v24 }
 0x876   : > { %3868 = vpow2.f32 %v1880_v25 }
 0x883   : > { %v3869_v26 = vpop.eup %3868 }
 0x884   : > { %v1882_v27 = vsel %vm1419_vm7, %v3869_v26, 0.0 }
 0x885   : > { %1883 = vadd.xlane.f32.xlu1 %v1882_v27 }
 0x90e   : > { %v1884_v29 = vpop.xlane.xlu1 %1883 }
 0x90f   : > { %3870 = vrcp.f32 %v1884_v29 }
 0x91c   : > { %v3871_v30 = vpop.eup %3870 }
 0x91d   : > { %v1886_v31 = vmul.f32 %v3871_v30, %v3869_v26 }
 0x91f   : > { %3699 = vmatmul.mubr.msk.f32.vlgmr.msra.gmra.mxu1 %vm1431_vm8, %v1886_v31 }
 0x920   : > { %3707 = vmatpush3.msra.mxu1 %v1097_v32  ;;  %3714 = vmatprep.mubr.msk.f32.mxu1 %vm3911_vm1, %v3910_v5 }
 0x921   : > { %3708 = vmatprep.subr.mxu1 %v3910_v5 }
 0x922   : > { %3709 = vmatpush3.msra.mxu1 %v1096_v33 }
 0x923   : > { %3710 = vmatprep.subr.mxu1 %v3910_v5 }
 0x924   : > { %3711 = vmatpush3.msra.mxu1 %v1095_v34 }
 0x925   : > { %3712 = vmatprep.subr.mxu1 %v3910_v5 }
 0x926   : > { %3713 = vmatpush3.msra.mxu1 %v1094_v35 }
 0x927   : > { %3715 = vmatmul.mubr.msk.f32.vlgmr.msra.gmra.mxu1 %vm1127_vm4, %v4104_v37  ;;  %3733 = vmatprep.subr.mxu1 %v3910_v5 }
 0x928   : > { %3735 = vmatprep.mubr.msk.f32.mxu1 %vm3911_vm1, %v3910_v5 }
 0x9df   : > { %v1959_v36 = vpop.f32.mrf.mxu1 }
 0x9e0   : > { %3704 = vmatmul.mubr.msk.f32.vlgmr.msra.gmra.mxu0 %vm1344_vm5, %v1959_v36 }
 0x9e1   : > { %3718 = vmatpush3.xpose.msk.msra.mxu0 %vm1127_vm4, %v4104_v37  ;;  %v3700_v38 = vpop.f32.mrf.mxu1  ;;  %3719 = vmatprep.mubr.msk.f32.mxu0 %vm3911_vm1, %v3910_v5 }
 0x9e2   : > { %3722 = vmatprep.subr.mxu0 %v3910_v5  ;;  %v1125_v38 = vld [vmem:[%s4500_s10 + $0x18] sm:$0xff] }
 0x9e4   : > { %3720 = vmatmul.mubr.msk.f32.vlgmr.msra.gmra.mxu0 %vm1127_vm4, %v1104_v39 }
 0x9e5   : > { %3723 = vmatpush3.msra.mxu0 %v1117_v40  ;;  %3730 = vmatprep.mubr.msk.f32.mxu0 %vm3911_vm1, %v3910_v5 }
 0x9e6   : > { %3724 = vmatprep.subr.mxu0 %v3910_v5 }
 0x9e7   : > { %v2103_v43 = vpop.f32.mrf.mxu1  ;;  %3725 = vmatpush3.msra.mxu0 %v1116_v41 }
 0x9e8   : > { %3726 = vmatprep.subr.mxu0 %v3910_v5 }
 0x9e9   : > { %v3716_v45 = vpop.f32.mrf.mxu1  ;;  %3727 = vmatpush3.msra.mxu0 %v1115_v42 }
 0x9ea   : > { %3728 = vmatprep.subr.mxu0 %v3910_v5 }
 0x9eb   : > { %3729 = vmatpush3.msra.mxu0 %v1114_v44 }
 0x9ec   : > { %3731 = vmatmul.mubr.msk.f32.vlgmr.msra.gmra.mxu0 %vm1127_vm4, %v4104_v37  ;;  %3743 = vmatprep.subr.mxu0 %v3910_v5 }
 0x9ed   : > { %3745 = vmatprep.mubr.msk.f32.mxu0 %vm3911_vm1, %v3910_v5  ;;  %3744 = vmatpush3.msra.mxu0 %v1124_v0  ;;  %v3070_v0 = vld [vmem:[%s4506_s16 + $0x70] sm:$0xff] }
 0x9ee   : > { %3759 = vmatprep.subr.mxu0 %v3910_v5 }
 0xaa0   : > { %v2032_v48 = vpop.f32.mrf.mxu0 }
 0xaa1   : > { %v4279_v49 = vadd.f32 %v2032_v48, %v1588_v47 }
 0xaa2   : > { %v3705_v50 = vpop.f32.mrf.mxu0 }
 0xaa4   : > { %v2176_v51 = vpop.f32.mrf.mxu0 }
 0xaa5   : > { %3734 = vmatpush3.msra.mxu1 %v2176_v51  ;;  %v2966_v51 = vld [vmem:[%s4504_s14 + $0x18] sm:$0xff] }
 0xaa6   : > { %v3721_v52 = vpop.f32.mrf.mxu0  ;;  %3736 = vmatmul.mubr.msk.f32.vlgmr.msra.gmra.mxu1 %vm1344_vm5, %v2103_v43  ;;  %3738 = vmatprep.subr.mxu1 %v3910_v5 }
 0xaa7   : > { %3740 = vmatprep.mubr.msk.f32.mxu1 %vm3911_vm1, %v3910_v5  ;;  %v2964_v52 = vld [vmem:[%s4504_s14 + $0x8] sm:$0xff] }
 0xaac   : > { %v2246_v53 = vpop.f32.mrf.mxu0 }
 0xaad   : > { %3739 = vmatpush3.msk.msra.mxu1 %vm1435_vm6, %v2246_v53  ;;  %v2963_v53 = vld [vmem:[%s4504_s14] sm:$0xff] }
 0xaae   : > { %v3732_v54 = vpop.f32.mrf.mxu0  ;;  %3748 = vmatprep.subr.mxu1 %v3910_v5 }
 0xb66   : > { %v2319_v55 = vpop.f32.mrf.mxu1 }
 0xb67   : > { %v2323_v56 = vmul.f32 0.35355338, %v2319_v55 }
 0xb68   : > { %v3737_v57 = vpop.f32.mrf.mxu1 }
 0xb69   : > { %v2324_v58 = vsel %vm1419_vm7, %v2323_v56, -inf }
 0xb6a   : > { %2325 = vmax.xlane.f32.xlu0 %v2324_v58  ;;  %v3494_v58 = vld [vmem:[%s4502_s12] ss:$0 sm:$0xff] }
 0xbf3   : > { %v2326_v59 = vpop.xlane.xlu0 %2325 }
 0xbf4   : > { %v2327_v60 = vsub.f32 %v2323_v56, %v2326_v59 }
 0xbf6   : > { %v2328_v61 = vmul.f32 1.442695, %v2327_v60  ;;  %v3495_v60 = vld [vmem:[%s4503_s13] ss:$0 sm:$0xff] }
 0xbf8   : > { %3872 = vpow2.f32 %v2328_v61 }
 0xc05   : > { %v3873_v62 = vpop.eup %3872 }
 0xc06   : > { %v2330_v63 = vsel %vm1419_vm7, %v3873_v62, 0.0 }
 0xc07   : > { %2331 = vadd.xlane.f32.xlu1 %v2330_v63  ;;  %v3071_v63 = vld [vmem:[%s4506_s16 + $0x78] sm:$0xff] }
 0xc90   : > { %v2332_v1 = vpop.xlane.xlu1 %2331 }
 0xc91   : > { %3874 = vrcp.f32 %v2332_v1  ;;  %v3069_v1 = vld [vmem:[%s4506_s16 + $0x68] sm:$0xff] }
 0xc9e   : > { %v3875_v2 = vpop.eup %3874 }
 0xc9f   : > { %v2334_v3 = vmul.f32 %v3875_v2, %v3873_v62  ;;  %v3068_v2 = vld [vmem:[%s4506_s16 + $0x60] sm:$0xff] }
 0xca1   : > { %3741 = vmatmul.mubr.msk.f32.vlgmr.msra.gmra.mxu1 %vm1431_vm8, %v2334_v3  ;;  %v3067_v3 = vld [vmem:[%s4506_s16 + $0x58] sm:$0xff] }
 0xca2   : > { %3749 = vmatpush3.msra.mxu1 %v1101_v4  ;;  %3756 = vmatprep.mubr.msk.f32.mxu1 %vm3911_vm1, %v3910_v5  ;;  %v3066_v4 = vld [vmem:[%s4506_s16 + $0x50] sm:$0xff] }
 0xca3   : > { %3750 = vmatprep.subr.mxu1 %v3910_v5 }
 0xca4   : > { %3751 = vmatpush3.msra.mxu1 %v1100_v6  ;;  %v3065_v6 = vld [vmem:[%s4506_s16 + $0x48] sm:$0xff] }
 0xca5   : > { %3752 = vmatprep.subr.mxu1 %v3910_v5 }
 0xca6   : > { %3753 = vmatpush3.msra.mxu1 %v1099_v7  ;;  %v3064_v7 = vld [vmem:[%s4506_s16 + $0x40] sm:$0xff] }
 0xca7   : > { %3754 = vmatprep.subr.mxu1 %v3910_v5 }
 0xca8   : > { %3755 = vmatpush3.msra.mxu1 %v1098_v8  ;;  %v3063_v8 = vld [vmem:[%s4506_s16 + $0x38] sm:$0xff] }
 0xca9   : > { %3757 = vmatmul.mubr.msk.f32.vlgmr.msra.gmra.mxu1 %vm1127_vm4, %v4104_v37  ;;  %3775 = vmatprep.subr.mxu1 %v3910_v5 }
 0xcaa   : > { %3777 = vmatprep.mubr.msk.f32.mxu1 %vm3911_vm1, %v3910_v5 }
 0xd61   : > { %v2407_v9 = vpop.f32.mrf.mxu1 }
 0xd62   : > { %3746 = vmatmul.mubr.msk.f32.vlgmr.msra.gmra.mxu0 %vm1344_vm5, %v2407_v9  ;;  %v3062_v9 = vld [vmem:[%s4506_s16 + $0x30] sm:$0xff] }
 0xd63   : > { %3760 = vmatpush3.xpose.msk.msra.mxu0 %vm1127_vm4, %v4104_v37  ;;  %v3742_v10 = vpop.f32.mrf.mxu1  ;;  %3761 = vmatprep.mubr.msk.f32.mxu0 %vm3911_vm1, %v3910_v5 }
 0xd64   : > { %3764 = vmatprep.subr.mxu0 %v3910_v5  ;;  %v3061_v10 = vld [vmem:[%s4506_s16 + $0x28] sm:$0xff] }
 0xd66   : > { %3762 = vmatmul.mubr.msk.f32.vlgmr.msra.gmra.mxu0 %vm1127_vm4, %v1105_v11  ;;  %v3060_v11 = vld [vmem:[%s4506_s16 + $0x20] sm:$0xff] }
 0xd67   : > { %3765 = vmatpush3.msra.mxu0 %v1121_v12  ;;  %3772 = vmatprep.mubr.msk.f32.mxu0 %vm3911_vm1, %v3910_v5  ;;  %v3059_v12 = vld [vmem:[%s4506_s16 + $0x18] sm:$0xff] }
 0xd68   : > { %3766 = vmatprep.subr.mxu0 %v3910_v5 }
 0xd69   : > { %v2551_v15 = vpop.f32.mrf.mxu1  ;;  %3767 = vmatpush3.msra.mxu0 %v1120_v13  ;;  %v3058_v13 = vld [vmem:[%s4506_s16 + $0x10] sm:$0xff] }
 0xd6a   : > { %3768 = vmatprep.subr.mxu0 %v3910_v5 }
 0xd6b   : > { %v3758_v17 = vpop.f32.mrf.mxu1  ;;  %3769 = vmatpush3.msra.mxu0 %v1119_v14  ;;  %v3057_v14 = vld [vmem:[%s4506_s16 + $0x8] sm:$0xff] }
 0xd6c   : > { %3770 = vmatprep.subr.mxu0 %v3910_v5 }
 0xd6d   : > { %3771 = vmatpush3.msra.mxu0 %v1118_v16  ;;  %v3496_v16 = vld [vmem:[%s4505_s15] ss:$0 sm:$0xff] }
 0xd6e   : > { %3773 = vmatmul.mubr.msk.f32.vlgmr.msra.gmra.mxu0 %vm1127_vm4, %v4104_v37  ;;  %3785 = vmatprep.subr.mxu0 %v3910_v5 }
 0xd6f   : > { %3787 = vmatprep.mubr.msk.f32.mxu0 %vm3911_vm1, %v3910_v5  ;;  %3786 = vmatpush3.msra.mxu0 %v1125_v38 }
 0xd70   : > { %3801 = vmatprep.subr.mxu0 %v3910_v5 }
 0xe22   : > { %v2480_v19 = vpop.f32.mrf.mxu0 }
 0xe23   : > { %v2484_v20 = vadd.f32 %v2480_v19, %v4279_v49 }
 0xe24   : > { %v3747_v21 = vpop.f32.mrf.mxu0 }
 0xe26   : > { %v2624_v22 = vpop.f32.mrf.mxu0 }
 0xe27   : > { %3776 = vmatpush3.msra.mxu1 %v2624_v22 }
 0xe28   : > { %v3763_v23 = vpop.f32.mrf.mxu0  ;;  %3778 = vmatmul.mubr.msk.f32.vlgmr.msra.gmra.mxu1 %vm1344_vm5, %v2551_v15  ;;  %3780 = vmatprep.subr.mxu1 %v3910_v5  ;;  %v3056_v15 = vld [vmem:[%s4506_s16] sm:$0xff] }
 0xe29   : > { %3782 = vmatprep.mubr.msk.f32.mxu1 %vm3911_vm1, %v3910_v5 }
 0xe2e   : > { %v2694_v37 = vpop.f32.mrf.mxu0 }
 0xe2f   : > { %3781 = vmatpush3.msk.msra.mxu1 %vm1435_vm6, %v2694_v37 }
 0xe30   : > { %v3774_v24 = vpop.f32.mrf.mxu0  ;;  %3790 = vmatprep.subr.mxu1 %v3910_v5 }
 0xee8   : > { %v2767_v25 = vpop.f32.mrf.mxu1 }
 0xee9   : > { %v2771_v26 = vmul.f32 0.35355338, %v2767_v25 }
 0xeea   : > { %v3779_v27 = vpop.f32.mrf.mxu1 }
 0xeeb   : > { %v2772_v28 = vsel %vm1419_vm7, %v2771_v26, -inf }
 0xeec   : > { %2773 = vmax.xlane.f32.xlu0 %v2772_v28 }
 0xf75   : > { %v2774_v29 = vpop.xlane.xlu0 %2773 }
 0xf76   : > { %v2775_v30 = vsub.f32 %v2771_v26, %v2774_v29  ;;  %v3498_v29 = vld [vmem:[%s4507_s17] ss:$0 sm:$0xff] }
 0xf78   : > { %v2776_v31 = vmul.f32 1.442695, %v2775_v30 }
 0xf7a   : > { %3876 = vpow2.f32 %v2776_v31 }
 0xf87   : > { %v3877_v32 = vpop.eup %3876 }
 0xf88   : > { %v2778_v33 = vsel %vm1419_vm7, %v3877_v32, 0.0 }
 0xf89   : > { %2779 = vadd.xlane.f32.xlu1 %v2778_v33 }
0x1012   : > { %v2780_v34 = vpop.xlane.xlu1 %2779 }
0x1013   : > { %3878 = vrcp.f32 %v2780_v34 }
0x1020   : > { %v3879_v35 = vpop.eup %3878 }
0x1021   : > { %v2782_v36 = vmul.f32 %v3879_v35, %v3877_v32 }
0x1023   : > { %3783 = vmatmul.mubr.msk.f32.vlgmr.msra.gmra.mxu1 %vm1431_vm8, %v2782_v36 }
0x1024   : > { %3798 = vmatprep.mubr.msk.f32.mxu1 %vm3911_vm1, %v3910_v5  ;;  %3791 = vmatpush3.msra.mxu1 %v2966_v51 }
0x1025   : > { %3792 = vmatprep.subr.mxu1 %v3910_v5 }
0x10e3   : > { %v2855_v39 = vpop.f32.mrf.mxu1 }
0x10e4   : > { %3788 = vmatmul.mubr.msk.f32.vlgmr.msra.gmra.mxu0 %vm1344_vm5, %v2855_v39 }
0x10e5   : > { %v3784_v40 = vpop.f32.mrf.mxu1  ;;  %3833 = vmatprep.mubr.msk.f32.mxu0 %vm3911_vm1, %v3910_v5  ;;  %3802 = vmatpush3.msra.mxu0 %v3071_v63 }
0x10e6   : > { %3803 = vmatprep.subr.mxu0 %v3910_v5 }
0x10e7   : > { %3804 = vmatpush3.msra.mxu0 %v3070_v0 }
0x10e8   : > { %3805 = vmatprep.subr.mxu0 %v3910_v5 }
0x10e9   : > { %3806 = vmatpush3.msra.mxu0 %v3069_v1 }
0x10ea   : > { %3807 = vmatprep.subr.mxu0 %v3910_v5 }
0x10eb   : > { %3808 = vmatpush3.msra.mxu0 %v3068_v2 }
0x10ec   : > { %3809 = vmatprep.subr.mxu0 %v3910_v5 }
0x10ed   : > { %3810 = vmatpush3.msra.mxu0 %v3067_v3 }
0x10ee   : > { %3811 = vmatprep.subr.mxu0 %v3910_v5 }
0x10ef   : > { %3812 = vmatpush3.msra.mxu0 %v3066_v4 }
0x10f0   : > { %3813 = vmatprep.subr.mxu0 %v3910_v5 }
0x10f1   : > { %3814 = vmatpush3.msra.mxu0 %v3065_v6 }
0x10f2   : > { %3815 = vmatprep.subr.mxu0 %v3910_v5 }
0x10f3   : > { %3816 = vmatpush3.msra.mxu0 %v3064_v7 }
0x10f4   : > { %3817 = vmatprep.subr.mxu0 %v3910_v5 }
0x10f5   : > { %3818 = vmatpush3.msra.mxu0 %v3063_v8 }
0x10f6   : > { %3819 = vmatprep.subr.mxu0 %v3910_v5 }
0x10f7   : > { %3820 = vmatpush3.msra.mxu0 %v3062_v9 }
0x10f8   : > { %3821 = vmatprep.subr.mxu0 %v3910_v5 }
0x10f9   : > { %3822 = vmatpush3.msra.mxu0 %v3061_v10 }
0x10fa   : > { %3823 = vmatprep.subr.mxu0 %v3910_v5 }
0x10fb   : > { %3824 = vmatpush3.msra.mxu0 %v3060_v11 }
0x10fc   : > { %3825 = vmatprep.subr.mxu0 %v3910_v5 }
0x10fd   : > { %3826 = vmatpush3.msra.mxu0 %v3059_v12 }
0x10fe   : > { %3827 = vmatprep.subr.mxu0 %v3910_v5 }
0x10ff   : > { %3828 = vmatpush3.msra.mxu0 %v3058_v13 }
0x1100   : > { %3829 = vmatprep.subr.mxu0 %v3910_v5 }
0x1101   : > { %3830 = vmatpush3.msra.mxu0 %v3057_v14 }
0x1102   : > { %3831 = vmatprep.subr.mxu0 %v3910_v5 }
0x1103   : > { %3832 = vmatpush3.msra.mxu0 %v3056_v15 }
0x11a4   : > { %v2928_v41 = vpop.f32.mrf.mxu0 }
0x11a5   : > { %v2932_v42 = vadd.f32 %v2928_v41, %v2484_v20 }
0x11a6   : > { %v3789_v43 = vpop.f32.mrf.mxu0 }
0x11a7   : > { %v4368_v44 = vadd.f32 %v2932_v42, %v4076_v18  ;;  %v2965_v18 = vld [vmem:[%s4504_s14 + $0x10] sm:$0xff] }
0x11a8   : > { %3793 = vmatpush3.msra.mxu1 %v2965_v18 }
0x11a9   : > { %v2936_v45 = vsel %vm1052_vm3, %v4368_v44, 0.0  ;;  %3794 = vmatprep.subr.mxu1 %v3910_v5 }
0x11aa   : > { %2937 = vadd.xlane.f32.xlu0 %v2936_v45  ;;  %3795 = vmatpush3.msra.mxu1 %v2964_v52 }
0x11ab   : > { %3796 = vmatprep.subr.mxu1 %v3910_v5 }
0x11ac   : > { %3797 = vmatpush3.msra.mxu1 %v2963_v53 }
0x1233   : > { %v2938_v46 = vpop.xlane.xlu0 %2937 }
0x1234   : > { %v2939_v47 = vmul.f32 0.03125, %v2938_v46  ;;  %v3500_v46 = vld [vmem:[%s4509_s19] ss:$0 sm:$0xff] }
0x1236   : > { %v2940_v48 = vsub.f32 %v4368_v44, %v2939_v47 }
0x1238   : > { %v2941_v49 = vmul.f32 %v2940_v48, %v2940_v48 }
0x123a   : > { %v2942_v50 = vsel %vm1052_vm3, %v2941_v49, 0.0 }
0x123b   : > { %2943 = vadd.xlane.f32.xlu1 %v2942_v50 }
0x12c4   : > { %v2944_v54 = vpop.xlane.xlu1 %2943 }
0x12c5   : > { %v2945_v55 = vmul.f32 0.03125, %v2944_v54 }
0x12c7   : > { %v2946_v56 = vadd.f32 1e-05, %v2945_v55 }
0x12c9   : > { %3880 = vrsqrt.f32 %v2946_v56 }
0x12d6   : > { %v3881_v57 = vpop.eup %3880 }
0x12d7   : > { %v2948_v59 = vmul.f32 %v3881_v57, %v2940_v48 }
0x12d9   : > { %v2955_v61 = vmul.f32 %v3494_v58, %v2948_v59 }
0x12db   : > { %v2962_v62 = vadd.f32 %v3495_v60, %v2955_v61 }
0x12dd   : > { %3799 = vmatmul.mubr.msk.f32.vlgmr.msra.gmra.mxu1 %vm1127_vm4, %v2962_v62 }
0x139d   : > { %v3043_v17 = vpop.f32.mrf.mxu1 }
0x139e   : > { %v3044_v19 = vadd.f32 %v3496_v16, %v3043_v17 }
0x139f   : > { %v3800_v20 = vpop.f32.mrf.mxu1 }
0x13a0   : > { %v3047_v21 = vmul.f32 %v3044_v19, %v3044_v19 }
0x13a2   : > { %v3048_v22 = vmul.f32 %v3047_v21, %v3044_v19 }
0x13a4   : > { %v3049_v23 = vmul.f32 0.044715, %v3048_v22 }
0x13a6   : > { %v3050_v37 = vadd.f32 %v3049_v23, %v3044_v19 }
0x13a8   : > { %v3051_v24 = vmul.f32 0.7978846, %v3050_v37 }
0x13aa   : > { %3882 = vtanh.f32 %v3051_v24 }
0x13b7   : > { %v3883_v25 = vpop.eup %3882 }
0x13b8   : > { %v3053_v26 = vadd.f32 1.0, %v3883_v25 }
0x13ba   : > { %v3054_v27 = vmul.f32 0.5, %v3053_v26 }
0x13bc   : > { %v3055_v28 = vmul.f32 %v3054_v27, %v3044_v19 }
0x13be   : > { %3834 = vmatmul.mubr.f32.vlgmr.msra.gmra.mxu0 %v3055_v28 }
0x147e   : > { %v3138_v5 = vpop.f32.mrf.mxu0 }
0x147f   : > { %v3142_v30 = vadd.f32 %v3138_v5, %v4368_v44  ;;  %v3499_v44 = vld [vmem:[%s4508_s18] ss:$0 sm:$0xff] }
0x1480   : > { %v3835_v31 = vpop.f32.mrf.mxu0 }
0x1481   : > { %v3150_v32 = vadd.f32 %v3498_v29, %v3142_v30 }
0x1483   : > { %3151 = vst.msk [vmem:[#allocation2] sm:$0xf] %vm1052_vm3, %v3150_v32  ;;  %v3157_v33 = vsel %vm1052_vm3, %v3150_v32, 0.0 }
0x1484   : > { %3158 = vadd.xlane.f32.xlu0 %v3157_v33 }
0x150d   : > { %v3159_v34 = vpop.xlane.xlu0 %3158 }
0x150e   : > { %v3160_v35 = vmul.f32 0.03125, %v3159_v34 }
0x1510   : > { %v3161_v36 = vsub.f32 %v3150_v32, %v3160_v35 }
0x1512   : > { %v3162_v38 = vmul.f32 %v3161_v36, %v3161_v36 }
0x1514   : > { %v3163_v39 = vsel %vm1052_vm3, %v3162_v38, 0.0 }
0x1515   : > { %3164 = vadd.xlane.f32.xlu1 %v3163_v39 }
0x159e   : > { %v3165_v40 = vpop.xlane.xlu1 %3164 }
0x159f   : > { %v3166_v41 = vmul.f32 0.03125, %v3165_v40 }
0x15a1   : > { %v3167_v42 = vadd.f32 1e-05, %v3166_v41 }
0x15a3   : > { %3884 = vrsqrt.f32 %v3167_v42 }
0x15b0   : > { %v3885_v43 = vpop.eup %3884 }
0x15b1   : > { %v3169_v45 = vmul.f32 %v3885_v43, %v3161_v36 }
0x15b3   : > { %v3176_v47 = vmul.f32 %v3499_v44, %v3169_v45 }
0x15b5   : > { %v3183_v48 = vadd.f32 %v3500_v46, %v3176_v47 }
0x15b7   : > { %3184 = vst.msk [vmem:[%s874_s0] sm:$0xf] %vm1052_vm3, %v3183_v48 }
0x15b8 PF: > { %s30_s23 = sadd.s32 1, %s3908_s23   ;;  %s4527_s1 = sld [smem:[#allocation3_spill]] }
0x15b9   : > { %p27_p5 = scmp.ge.s32.totalorder %s30_s23, 4   ;;  %s4528_s22 = sld [smem:[#allocation4_spill]] }
0x15bb   :  { %29 = sbr.rel (!%p27_p5) target bundleno = 6 (0x6), region = 180 }

// kernel: dmae_forward.3
= control target key start
LH: loop header
LB: loop body
LE: loop exit
PB: predicated region body
PF: predicated region fallthrough
CT: control target
= control target key end

     0   :  { %s5512_s0 = inlined_call_operand.vmem [shape: f32[2,4,32], index: 0, kind: input, shape index: {}]   ;;  %s5513_s1 = inlined_call_operand.vmem [shape: f32[2,16,24], index: 1, kind: input, shape index: {}]   ;;  %s5514_s2 = inlined_call_operand.vmem [shape: f32[2,16,16], index: 2, kind: input, shape index: {}]   ;;  %s5515_s3 = inlined_call_operand.vmem [shape: f32[16,4], index: 3, kind: input, shape index: {}]   ;;  %s5516_s4 = inlined_call_operand.vmem [shape: f32[16,1], index: 4, kind: input, shape index: {}]   ;;  %s5517_s5 = inlined_call_operand.vmem [shape: f32[32,24], index: 5, kind: input, shape index: {}]   ;;  %s5518_s6 = inlined_call_operand.vmem [shape: f32[1,24], index: 6, kind: input, shape index: {}]   ;;  %s5519_s7 = inlined_call_operand.vmem [shape: f32[1,24], index: 7, kind: input, shape index: {}]   ;;  %s5520_s8 = inlined_call_operand.vmem [shape: f32[16,24], index: 8, kind: input, shape index: {}]   ;;  %s5521_s9 = inlined_call_operand.vmem [shape: f32[1,1,24], index: 9, kind: input, shape index: {}]   ;;  %s5522_s10 = inlined_call_operand.vmem [shape: f32[1,1,24], index: 10, kind: input, shape index: {}]   ;;  %s5523_s11 = inlined_call_operand.vmem [shape: f32[1,4,24,8], index: 11, kind: input, shape index: {}]   ;;  %s5524_s12 = inlined_call_operand.vmem [shape: f32[1,4,8,24], index: 12, kind: input, shape index: {}]   ;;  %s5525_s13 = inlined_call_operand.vmem [shape: f32[1,4,24,8], index: 13, kind: input, shape index: {}]   ;;  %s5526_s14 = inlined_call_operand.vmem [shape: f32[1,4,8,24], index: 14, kind: input, shape index: {}]   ;;  %s5527_s15 = inlined_call_operand.vmem [shape: f32[1,1,24], index: 15, kind: input, shape index: {}]   ;;  %s5528_s16 = inlined_call_operand.vmem [shape: f32[1,1,24], index: 16, kind: input, shape index: {}]   ;;  %s5529_s17 = inlined_call_operand.vmem [shape: f32[1,1,24], index: 17, kind: input, shape index: {}]   ;;  %s5530_s18 = inlined_call_operand.vmem [shape: f32[1,24,96], index: 18, kind: input, shape index: {}]   ;;  %s5531_s19 = inlined_call_operand.vmem [shape: f32[1,1,96], index: 19, kind: input, shape index: {}]   ;;  %s5532_s20 = inlined_call_operand.vmem [shape: f32[1,96,24], index: 20, kind: input, shape index: {}]   ;;  %s5533_s21 = inlined_call_operand.vmem [shape: f32[1,1,24], index: 21, kind: input, shape index: {}]   ;;  %s5534_s22 = inlined_call_operand.vmem [shape: f32[1,24], index: 22, kind: input, shape index: {}]   ;;  %s5535_s23 = inlined_call_operand.vmem [shape: f32[1,24], index: 23, kind: input, shape index: {}]   ;;  %s5536_s24 = inlined_call_operand.vmem [shape: f32[24,24], index: 24, kind: input, shape index: {}]   ;;  %s5537_s25 = inlined_call_operand.vmem [shape: f32[1,24], index: 25, kind: input, shape index: {}]   ;;  %s5538_s26 = inlined_call_operand.vmem [shape: f32[2,12,24], index: 26, kind: output, shape index: {0}]   ;;  %s5539_s27 = inlined_call_operand.vmem [shape: f32[2,12,24], index: 27, kind: output, shape index: {1}]   ;;  %s5540_s28 = inlined_call_operand.vmem [shape: f32[2,1,1], index: 28, kind: output, shape index: {2}]  }
   0x1   :  { %5553 = sst [smem:[#allocation5_spill]] %s5512_s0 }
   0x2   :  { %5554 = sst [smem:[#allocation6_spill]] %s5513_s1 }
   0x3   :  { %5555 = sst [smem:[#allocation7_spill]] %s5514_s2 }
   0x4   :  { %5556 = sst [smem:[#allocation8_spill]] %s5515_s3 }
   0x5   :  { %5557 = sst [smem:[#allocation9_spill]] %s5516_s4 }
   0x6   :  { %5558 = sst [smem:[#allocation10_spill]] %s5517_s5  ;;  %s5054_s5 = smov 0  }
   0x7   :  { %5559 = sst [smem:[#allocation11_spill]] %s5518_s6 }
   0x8   :  { %5560 = sst [smem:[#allocation12_spill]] %s5519_s7 }
   0x9   :  { %5561 = sst [smem:[#allocation13_spill]] %s5520_s8  ;;  %s5052_s8 = smov 0  }
   0xa   :  { %5562 = sst [smem:[#allocation14_spill]] %s5521_s9  ;;  %s5056_s9 = smov 0  }
   0xb   :  { %5563 = sst [smem:[#allocation15_spill]] %s5522_s10 }
   0xc   :  { %5564 = sst [smem:[#allocation16_spill]] %s5523_s11 }
   0xd   :  { %5565 = sst [smem:[#allocation17_spill]] %s5524_s12 }
   0xe LB: > { %5566 = sst [smem:[#allocation3_spill]] %s4898_s5  ;;  %s51_s30 = sadd.s32 1, %s4898_s5  ;;  %s4902_s9 = sphi %s5056_s9, %s39_s9   ;;  %s4898_s5 = sphi %s5054_s5, %s5582_s5   ;;  %s4894_s8 = sphi %s5052_s8, %s5581_s8  }
   0xf   : > { %p4333_p0 = scmp.ge.s32.totalorder %s4902_s9, 1  ;;  %p53_p1 = scmp.ge.s32.totalorder %s51_s30, 2 }
  0x10   : > { %p914_p2 = scmp.lt.s32.totalorder %s4902_s9, 3 }
  0x11   : > { %s5584_s30 = smov (%p53_p1, %s51_s30), 0 }
  0x12   : > { %5567 = sst [smem:[#allocation4_spill]] %s5584_s30  ;;  %p915_p3 = pnand %p4333_p0, %p914_p2 }
  0x13   : > { %s5568_s10 = sld [smem:[#allocation10_spill]] (!%p915_p3)  ;;  %p1056_p4 = scmp.lt.s32.totalorder (!%p915_p3), %s4894_s8, 1 }
  0x14   : > { %918 = sbr.rel (%p915_p3) target bundleno = 6041 (0x1799), region = 124  ;;  %s5569_s6 = sld [smem:[#allocation5_spill]] (!%p915_p3) }
  0x15   : > { %s5570_s2 = sld [smem:[#allocation8_spill]] (!%p915_p3) }
  0x16   : > { %s5571_s1 = sld [smem:[#allocation9_spill]] (!%p915_p3) }
  0x17   : > { %s5572_s29 = sld [smem:[#allocation11_spill]] (!%p915_p3) }
  0x18   : > { %s5573_s12 = sld [smem:[#allocation7_spill]] (!%p915_p3) }
  0x19   : > { %v1142_v0 = vld [vmem:[%s5568_s10 + $0x18] sm:$0xff]  ;;  %v4904_v1 = vmov 0.0   ;;  %v1141_v2 = vld [vmem:[%s5568_s10 + $0x10] sm:$0xff]  ;;  %vm4905_vm0 = vmmov 0   ;;  %s5586_s8 = smov (!%p1056_p4, %s4894_s8), 1  ;;  %v1140_v3 = vld [vmem:[%s5568_s10 + $0x8] sm:$0xff] }
  0x1a   : > { %4559 = vmatprep.subr.mxu0 %v4904_v1  ;;  %4567 = vmatprep.mubr.msk.f32.mxu0 %vm4905_vm0, %v4904_v1  ;;  %s4334_s7 = sshll.u32 %s5586_s8, 2  ;;  %v1139_v4 = vld [vmem:[%s5568_s10] sm:$0xff]  ;;  %vm1150_vm1 = vcmask 261120   ;;  %vm1230_vm2 = vcmask 31744   ;;  %v4906_v8 = vmov 0   ;;  %vm1237_vm3 = vcmask 1043456  }
  0x1b   : > { %4560 = vmatpush3.msra.mxu0 %v1142_v0  ;;  %s1059_s0 = scalar_lea.vmem %s5569_s6, %s4334_s7  ;;  %v1228_v6 = vld [vmem:[%s5570_s2] sm:$0xff]  ;;  %4831 = vset.pattern.permute.xlu0 %v4906_v8  ;;  %s5108_s6 = sshll.u32 %s5586_s8, 4  ;;  %v1229_v14 = vld [vmem:[%s5570_s2 + $0x8] sm:$0xff]  ;;  %vm1316_vm4 = vcmask 130048   ;;  %vm1421_vm5 = vcmask 195584   ;;  %v1490_v49 = vld [vmem:[%s5525_s13 + $0x10] sm:$0xff] }
  0x1c   : > { %4561 = vmatprep.subr.mxu0 %v4904_v1  ;;  %v1138_v5 = vld [vmem:[%s1059_s0] sm:$0xf]  ;;  %4572 = vmatprep.mubr.msk.f32.mxu1 %vm1230_vm2, %v1228_v6  ;;  %v1399_v7 = vld [vmem:[%s5571_s1 + $0x8] sm:$0xff]  ;;  %s5574_s0 = sld [smem:[#allocation13_spill]]  ;;  %vm1734_vm6 = vcmask 64512   ;;  %vm3654_vm7 = vcmask 785408  }
  0x1d   : > { %4562 = vmatpush3.msra.mxu0 %v1141_v2  ;;  %1408 = vperm.xlu0 %4831, %v1399_v7   ;;  %v1398_v9 = vld [vmem:[%s5571_s1] sm:$0xff]  ;;  %s5576_s4 = sld [smem:[#allocation16_spill]]  ;;  %vm3757_vm8 = vcmask 191488   ;;  %vm3994_vm9 = vcmask 0  }
  0x1e   : > { %4563 = vmatprep.subr.mxu0 %v4904_v1  ;;  %v4343_v10 = vld [vmem:[%s5572_s29] ss:$0 sm:$0xff]  ;;  %s5117_s30 = scalar_lea.vmem %s5573_s12, %s5108_s6  ;;  %s5575_s29 = sld [smem:[#allocation12_spill]] }
  0x1f   : > { %4564 = vmatpush3.msra.mxu0 %v1140_v3  ;;  %v1226_v16 = vld [vmem:[%s5117_s30] sm:$0xff]  ;;  %v1227_v18 = vld [vmem:[%s5117_s30 + $0x8] sm:$0xff]  ;;  %s5577_s3 = sld [smem:[#allocation14_spill]]  ;;  %s1130_s12 = scalar_lea.vmem %s5539_s27, %s5108_s6 }
  0x20   : > { %4565 = vmatprep.subr.mxu0 %v4904_v1  ;;  %s5578_s5 = sld [smem:[#allocation15_spill]]  ;;  %v1489_v3 = vld [vmem:[%s5525_s13 + $0x8] sm:$0xff] }
  0x21   : > { %4566 = vmatpush3.msra.mxu0 %v1139_v4  ;;  %1403 = vperm.xlu0 %4831, %v1398_v9   ;;  %s5580_s2 = sld [smem:[#allocation6_spill]] }
  0x22   : > { %4568 = vmatmul.mubr.msk.f32.vlgmr.msra.gmra.mxu0 %vm1150_vm1, %v1138_v5  ;;  %4591 = vmatprep.subr.mxu0 %v4904_v1  ;;  %v1225_v15 = vld [vmem:[%s5574_s0 + $0x8] sm:$0xff]  ;;  %v1224_v17 = vld [vmem:[%s5574_s0] sm:$0xff] }
  0x23   : > { %4595 = vmatprep.mubr.msk.f32.mxu0 %vm4905_vm0, %v4904_v1  ;;  %v1474_v46 = vld [vmem:[%s5576_s4 + $0x10] sm:$0xff]  ;;  %v1473_v47 = vld [vmem:[%s5576_s4 + $0x8] sm:$0xff]  ;;  %v1472_v48 = vld [vmem:[%s5576_s4] sm:$0xff] }
  0x24   : > { %v4350_v20 = vld [vmem:[%s5575_s29] ss:$0 sm:$0xff]  ;;  %s1125_s29 = scalar_lea.vmem %s5538_s26, %s5108_s6 }
  0x25   : > { %v4351_v57 = vld [vmem:[%s5577_s3] ss:$0 sm:$0xff]  ;;  %s5579_s3 = sld [smem:[#allocation17_spill]] }
  0x26   : > { %v4352_v59 = vld [vmem:[%s5578_s5] ss:$0 sm:$0xff] }
  0x27   : > { %v1488_v5 = vld [vmem:[%s5525_s13] sm:$0xff] }
  0x2b   : > { %v1484_v4 = vld [vmem:[%s5579_s3] sm:$0xff] }
  0x98   : > { %v1409_v19 = vpop.permute.xlu0 %1408 }
  0x99   : > { %v1418_v23 = vmul.f32 %v4350_v20, %v1409_v19 }
  0x9c   : > { %v1404_v24 = vpop.permute.xlu0 %1403 }
  0x9d   : > { %v1417_v28 = vmul.f32 %v4350_v20, %v1404_v24 }
  0xe2   : > { %v1220_v11 = vpop.f32.mrf.mxu0 }
  0xe3   : > { %v1221_v12 = vadd.f32 %v4343_v10, %v1220_v11 }
  0xe4   : > { %v4569_v13 = vpop.f32.mrf.mxu0 }
  0xe5   : > { %4570 = vmatprep.subr.msk.mxu1 %vm1237_vm3, %v1221_v12 }
  0xe6   : > { %4571 = vmatpush3.msk.msra.mxu1 %vm1237_vm3, %v1221_v12 }
  0xe7   : > { %4573 = vmatmul.mubr.msk.f32.vlgmr.msra.gmra.mxu1 %vm1230_vm2, %v1229_v14  ;;  %4575 = vmatprep.subr.mxu1 %v1225_v15 }
  0xe8   : > { %4576 = vmatpush3.msra.mxu1 %v1225_v15  ;;  %4579 = vmatprep.mubr.msk.f32.mxu1 %vm1316_vm4, %v1226_v16 }
  0xe9   : > { %4577 = vmatprep.subr.mxu1 %v1224_v17 }
  0xea   : > { %4578 = vmatpush3.msra.mxu1 %v1224_v17 }
  0xeb   : > { %4580 = vmatmul.mubr.msk.f32.vlgmr.msra.gmra.mxu1 %vm1316_vm4, %v1227_v18  ;;  %4582 = vmatprep.subr.mxu1 %v1474_v46 }
  0xec   : > { %4583 = vmatpush3.msra.mxu1 %v1474_v46  ;;  %v1485_v46 = vld [vmem:[%s5579_s3 + $0x8] sm:$0xff] }
  0xed   : > { %4584 = vmatprep.subr.mxu1 %v1473_v47 }
  0xee   : > { %4585 = vmatpush3.msra.mxu1 %v1473_v47 }
  0xef   : > { %4586 = vmatprep.subr.mxu1 %v1472_v48 }
  0xf0   : > { %4587 = vmatpush3.msra.mxu1 %v1472_v48 }
  0xf1   : > { %4598 = vmatprep.subr.mxu1 %v1490_v49 }
 0x1a7   : > { %v4574_v21 = vpop.f32.mrf.mxu1 }
 0x1a9   : > { %v1307_v22 = vpop.f32.mrf.mxu1 }
 0x1ab   : > { %v4581_v25 = vpop.f32.mrf.mxu1 }
 0x1ac   : > { %v1395_v26 = vadd.f32 %v4581_v25, %v4574_v21 }
 0x1ad   : > { %v1389_v27 = vpop.f32.mrf.mxu1 }
 0x1ae   : > { %v1420_v29 = vadd.f32 %v1418_v23, %v1395_v26  ;;  %v1390_v30 = vadd.f32 %v1389_v27, %v1307_v22 }
 0x1b0   : > { %1423 = vst.msk [vmem:[#allocation2 + $0x8] sm:$0xff] %vm1421_vm5, %v1420_v29  ;;  %v1419_v31 = vadd.f32 %v1417_v28, %v1390_v30  ;;  %v1477_v28 = vld [vmem:[%s5576_s4 + $0x28] sm:$0xff] }
 0x1b2   : > { %1422 = vst.msk [vmem:[#allocation2] sm:$0xff] %vm1421_vm5, %v1419_v31 }
 0x1b7   : > { %v5138_v32 = vld [vmem:[#allocation2 + $0x8] sm:$0xff] }
 0x1b8   : > { %v1432_v33 = vsel %vm1421_vm5, %v5138_v32, 0.0 }
 0x1b9   : > { %1433 = vadd.xlane.f32.xlu1 %v1432_v33  ;;  %v5142_v34 = vld [vmem:[#allocation2] sm:$0xff] }
 0x1ba   : > { %v1429_v35 = vsel %vm1421_vm5, %v5142_v34, 0.0 }
 0x1bd   : > { %1430 = vadd.xlane.f32.xlu1 %v1429_v35 }
 0x242   : > { %v1434_v36 = vpop.xlane.xlu1 %1433 }
 0x243   : > { %v1437_v37 = vmul.f32 0.041666668, %v1434_v36 }
 0x245   : > { %v1439_v38 = vsub.f32 %v5138_v32, %v1437_v37  ;;  %v1476_v37 = vld [vmem:[%s5576_s4 + $0x20] sm:$0xff] }
 0x246   : > { %v1431_v39 = vpop.xlane.xlu1 %1430 }
 0x247   : > { %v1436_v40 = vmul.f32 0.041666668, %v1431_v39  ;;  %v1441_v41 = vmul.f32 %v1439_v38, %v1439_v38  ;;  %v1493_v39 = vld [vmem:[%s5525_s13 + $0x28] sm:$0xff] }
 0x249   : > { %v1438_v42 = vsub.f32 %v5142_v34, %v1436_v40  ;;  %v1445_v43 = vsel %vm1421_vm5, %v1441_v41, 0.0  ;;  %v1492_v40 = vld [vmem:[%s5525_s13 + $0x20] sm:$0xff]  ;;  %v1491_v41 = vld [vmem:[%s5525_s13 + $0x18] sm:$0xff] }
 0x24a   : > { %1446 = vadd.xlane.f32.xlu0 %v1445_v43 }
 0x24b   : > { %v1440_v44 = vmul.f32 %v1438_v42, %v1438_v42 }
 0x24d   : > { %v1442_v45 = vsel %vm1421_vm5, %v1440_v44, 0.0 }
 0x24e   : > { %1443 = vadd.xlane.f32.xlu1 %v1442_v45 }
 0x2d3   : > { %v1447_v50 = vpop.xlane.xlu0 %1446 }
 0x2d4   : > { %v1449_v51 = vmul.f32 0.041666668, %v1447_v50 }
 0x2d6   : > { %v1451_v52 = vadd.f32 1e-05, %v1449_v51 }
 0x2d7   : > { %v1444_v53 = vpop.xlane.xlu1 %1443 }
 0x2d8   : > { %4832 = vrsqrt.f32 %v1451_v52  ;;  %v1448_v54 = vmul.f32 0.041666668, %v1444_v53 }
 0x2da   : > { %v1450_v55 = vadd.f32 1e-05, %v1448_v54 }
 0x2dc   : > { %4834 = vrsqrt.f32 %v1450_v55 }
 0x2e5   : > { %v4833_v56 = vpop.eup %4832 }
 0x2e6   : > { %v1455_v58 = vmul.f32 %v4833_v56, %v1439_v38  ;;  %v1475_v38 = vld [vmem:[%s5576_s4 + $0x18] sm:$0xff] }
 0x2e8   : > { %v1463_v60 = vmul.f32 %v4351_v57, %v1455_v58 }
 0x2e9   : > { %v4835_v61 = vpop.eup %4834 }
 0x2ea   : > { %v5168_v62 = vadd.f32 %v4352_v59, %v1463_v60  ;;  %v1454_v63 = vmul.f32 %v4835_v61, %v1438_v42  ;;  %v1500_v42 = vld [vmem:[%s5526_s14] sm:$0xff] }
 0x2ec   : > { %v1462_v0 = vmul.f32 %v4351_v57, %v1454_v63  ;;  %4592 = vmatpush3.xpose.msk.msra.mxu0 %vm1421_vm5, %v5168_v62 }
 0x2ed   : > { %4593 = vmatprep.subr.mxu0 %v4904_v1 }
 0x2ee   : > { %v5173_v2 = vadd.f32 %v4352_v59, %v1462_v0 }
 0x2f0   : > { %4588 = vmatprep.mubr.msk.f32.mxu1 %vm1421_vm5, %v5173_v2  ;;  %4594 = vmatpush3.xpose.msk.msra.mxu0 %vm1421_vm5, %v5173_v2 }
 0x2f1   : > { %4589 = vmatmul.mubr.msk.f32.vlgmr.msra.gmra.mxu1 %vm1421_vm5, %v5168_v62  ;;  %4619 = vmatprep.subr.mxu0 %v1500_v42 }
 0x2f2   : > { %4599 = vmatpush3.msra.mxu1 %v1490_v49  ;;  %4604 = vmatprep.mubr.msk.f32.mxu1 %vm1421_vm5, %v5173_v2 }
 0x2f3   : > { %4600 = vmatprep.subr.mxu1 %v1489_v3  ;;  %4596 = vmatmul.mubr.msk.f32.vlgmr.msra.gmra.mxu0 %vm1421_vm5, %v1484_v4 }
 0x2f4   : > { %4601 = vmatpush3.msra.mxu1 %v1489_v3  ;;  %4620 = vmatpush3.msra.mxu0 %v1500_v42 }
 0x2f5   : > { %4602 = vmatprep.subr.mxu1 %v1488_v5  ;;  %4633 = vmatprep.subr.mxu0 %v4904_v1 }
 0x2f6   : > { %4603 = vmatpush3.msra.mxu1 %v1488_v5 }
 0x2f7   : > { %4605 = vmatmul.mubr.msk.f32.vlgmr.msra.gmra.mxu1 %vm1421_vm5, %v5168_v62 }
 0x3b1   : > { %v4590_v6 = vpop.f32.mrf.mxu1 }
 0x3b3   : > { %v1577_v7 = vpop.f32.mrf.mxu1  ;;  %v1655_v8 = vpop.f32.mrf.mxu0 }
 0x3b4   : > { %4607 = vmatprep.subr.mxu1 %v1655_v8  ;;  %4609 = vmatprep.mubr.msk.f32.mxu1 %vm1734_vm6, %v1577_v7 }
 0x3b5   : > { %v4597_v9 = vpop.f32.mrf.mxu0  ;;  %4608 = vmatpush3.msra.mxu1 %v1655_v8 }
 0x3b6   : > { %4610 = vmatmul.mubr.msk.f32.vlgmr.msra.gmra.mxu1 %vm1734_vm6, %v4590_v6  ;;  %v1480_v9 = vld [vmem:[%s5576_s4 + $0x40] sm:$0xff] }
 0x3b7   : > { %v4606_v10 = vpop.f32.mrf.mxu1 }
 0x3b8   : > { %4612 = vmatprep.subr.mxu1 %v4606_v10 }
 0x3b9   : > { %v1725_v11 = vpop.f32.mrf.mxu1  ;;  %4613 = vmatpush3.msra.mxu1 %v4606_v10 }
 0x3ba   : > { %4614 = vmatprep.subr.mxu1 %v1725_v11 }
 0x3bb   : > { %4615 = vmatpush3.msra.mxu1 %v1725_v11 }
 0x3bc   : > { %4624 = vmatprep.subr.mxu1 %v1477_v28 }
 0x476   : > { %v4611_v12 = vpop.f32.mrf.mxu1 }
 0x477   : > { %v1817_v15 = vmul.f32 0.35355338, %v4611_v12 }
 0x478   : > { %v1807_v13 = vpop.f32.mrf.mxu1 }
 0x479   : > { %v1816_v14 = vmul.f32 0.35355338, %v1807_v13  ;;  %v1822_v17 = vsel %vm1316_vm4, %v1817_v15, -inf }
 0x47b   : > { %v1819_v16 = vsel %vm1316_vm4, %v1816_v14, -inf }
 0x47c   : > { %1820 = vmax.xlane.f32.xlu1 %v1819_v16  ;;  %v1479_v16 = vld [vmem:[%s5576_s4 + $0x38] sm:$0xff] }
 0x480   : > { %1823 = vmax.xlane.f32.xlu1 %v1822_v17  ;;  %v1478_v17 = vld [vmem:[%s5576_s4 + $0x30] sm:$0xff] }
 0x505   : > { %v1821_v18 = vpop.xlane.xlu1 %1820 }
 0x506   : > { %v1825_v19 = vsub.f32 %v1816_v14, %v1821_v18  ;;  %v1496_v18 = vld [vmem:[%s5525_s13 + $0x40] sm:$0xff] }
 0x508   : > { %v1827_v20 = vmul.f32 1.442695, %v1825_v19  ;;  %v1495_v19 = vld [vmem:[%s5525_s13 + $0x38] sm:$0xff] }
 0x509   : > { %v1824_v21 = vpop.xlane.xlu1 %1823 }
 0x50a   : > { %4836 = vpow2.f32 %v1827_v20  ;;  %v1826_v22 = vsub.f32 %v1817_v15, %v1824_v21  ;;  %v1494_v20 = vld [vmem:[%s5525_s13 + $0x30] sm:$0xff]  ;;  %v1501_v21 = vld [vmem:[%s5526_s14 + $0x8] sm:$0xff] }
 0x50c   : > { %v1829_v23 = vmul.f32 1.442695, %v1826_v22 }
 0x50e   : > { %4838 = vpow2.f32 %v1829_v23 }
 0x517   : > { %v4837_v24 = vpop.eup %4836 }
 0x518   : > { %v1831_v25 = vsel %vm1316_vm4, %v4837_v24, 0.0 }
 0x519   : > { %1832 = vadd.xlane.f32.xlu1 %v1831_v25  ;;  %v1486_v25 = vld [vmem:[%s5579_s3 + $0x10] sm:$0xff] }
 0x51b   : > { %v4839_v26 = vpop.eup %4838 }
 0x51c   : > { %v1834_v27 = vsel %vm1316_vm4, %v4839_v26, 0.0 }
 0x51d   : > { %1835 = vadd.xlane.f32.xlu1 %v1834_v27 }
 0x5a2   : > { %v1833_v29 = vpop.xlane.xlu1 %1832 }
 0x5a3   : > { %4840 = vrcp.f32 %v1833_v29  ;;  %v4366_v29 = vld [vmem:[%s5527_s15] ss:$0 sm:$0xff] }
 0x5a6   : > { %v1836_v30 = vpop.xlane.xlu1 %1835 }
 0x5a7   : > { %4842 = vrcp.f32 %v1836_v30 }
 0x5b0   : > { %v4841_v31 = vpop.eup %4840 }
 0x5b1   : > { %v1839_v33 = vmul.f32 %v4841_v31, %v4837_v24 }
 0x5b3   : > { %4616 = vmatprep.mubr.msk.f32.mxu1 %vm1316_vm4, %v1839_v33 }
 0x5b4   : > { %v4843_v35 = vpop.eup %4842 }
 0x5b5   : > { %v1840_v36 = vmul.f32 %v4843_v35, %v4839_v26 }
 0x5b7   : > { %4617 = vmatmul.mubr.msk.f32.vlgmr.msra.gmra.mxu1 %vm1316_vm4, %v1840_v36 }
 0x5b8   : > { %4625 = vmatpush3.msra.mxu1 %v1477_v28  ;;  %4630 = vmatprep.mubr.msk.f32.mxu1 %vm1421_vm5, %v5173_v2 }
 0x5b9   : > { %4626 = vmatprep.subr.mxu1 %v1476_v37 }
 0x5ba   : > { %4627 = vmatpush3.msra.mxu1 %v1476_v37 }
 0x5bb   : > { %4628 = vmatprep.subr.mxu1 %v1475_v38 }
 0x5bc   : > { %4629 = vmatpush3.msra.mxu1 %v1475_v38 }
 0x5bd   : > { %4631 = vmatmul.mubr.msk.f32.vlgmr.msra.gmra.mxu1 %vm1421_vm5, %v5168_v62  ;;  %4640 = vmatprep.subr.mxu1 %v1493_v39 }
 0x5be   : > { %4641 = vmatpush3.msra.mxu1 %v1493_v39  ;;  %4646 = vmatprep.mubr.msk.f32.mxu1 %vm1421_vm5, %v5173_v2 }
 0x5bf   : > { %4642 = vmatprep.subr.mxu1 %v1492_v40 }
 0x5c0   : > { %4643 = vmatpush3.msra.mxu1 %v1492_v40 }
 0x5c1   : > { %4644 = vmatprep.subr.mxu1 %v1491_v41 }
 0x5c2   : > { %4645 = vmatpush3.msra.mxu1 %v1491_v41 }
 0x5c3   : > { %4647 = vmatmul.mubr.msk.f32.vlgmr.msra.gmra.mxu1 %vm1421_vm5, %v5168_v62 }
 0x677   : > { %v4618_v43 = vpop.f32.mrf.mxu1 }
 0x679   : > { %v1913_v44 = vpop.f32.mrf.mxu1 }
 0x67a   : > { %4621 = vmatprep.mubr.msk.f32.mxu0 %vm1734_vm6, %v1913_v44 }
 0x67b   : > { %4622 = vmatmul.mubr.msk.f32.vlgmr.msra.gmra.mxu0 %vm1734_vm6, %v4618_v43 }
 0x67c   : > { %4634 = vmatpush3.xpose.msk.msra.mxu0 %vm1421_vm5, %v5168_v62  ;;  %4637 = vmatprep.mubr.msk.f32.mxu0 %vm4905_vm0, %v4904_v1 }
 0x67d   : > { %v4632_v45 = vpop.f32.mrf.mxu1  ;;  %4635 = vmatprep.subr.mxu0 %v4904_v1 }
 0x67f   : > { %v2077_v47 = vpop.f32.mrf.mxu1 }
 0x680   : > { %4636 = vmatpush3.xpose.msk.msra.mxu0 %vm1421_vm5, %v5173_v2 }
 0x683   : > { %4638 = vmatmul.mubr.msk.f32.vlgmr.msra.gmra.mxu0 %vm1421_vm5, %v1485_v46  ;;  %v4648_v48 = vpop.f32.mrf.mxu1 }
 0x684   : > { %4651 = vmatprep.mubr.msk.f32.mxu0 %vm1734_vm6, %v2077_v47  ;;  %4654 = vmatprep.subr.mxu1 %v4648_v48 }
 0x685   : > { %v2225_v49 = vpop.f32.mrf.mxu1  ;;  %4655 = vmatpush3.msra.mxu1 %v4648_v48 }
 0x686   : > { %4656 = vmatprep.subr.mxu1 %v2225_v49 }
 0x687   : > { %4657 = vmatpush3.msra.mxu1 %v2225_v49 }
 0x688   : > { %4666 = vmatprep.subr.mxu1 %v1480_v9 }
 0x73b   : > { %v5247_v50 = vpop.f32.mrf.mxu0 }
 0x73c   : > { %v2010_v30 = vadd.f32 %v5247_v50, %v4366_v29 }
 0x73d   : > { %v5249_v51 = vpop.f32.mrf.mxu0 }
 0x73e   : > { %v2009_v33 = vadd.f32 %v4366_v29, %v5249_v51 }
 0x743   : > { %v2155_v52 = vpop.f32.mrf.mxu0 }
 0x744   : > { %4649 = vmatprep.subr.mxu0 %v2155_v52 }
 0x745   : > { %v4639_v53 = vpop.f32.mrf.mxu0  ;;  %4650 = vmatpush3.msra.mxu0 %v2155_v52 }
 0x746   : > { %4652 = vmatmul.mubr.msk.f32.vlgmr.msra.gmra.mxu0 %vm1734_vm6, %v4632_v45  ;;  %4661 = vmatprep.subr.mxu0 %v1501_v21 }
 0x747   : > { %4662 = vmatpush3.msra.mxu0 %v1501_v21 }
 0x748   : > { %4675 = vmatprep.subr.mxu0 %v4904_v1 }
 0x806   : > { %v4653_v54 = vpop.f32.mrf.mxu0 }
 0x807   : > { %v2316_v57 = vmul.f32 0.35355338, %v4653_v54 }
 0x808   : > { %v2306_v55 = vpop.f32.mrf.mxu0 }
 0x809   : > { %v2315_v56 = vmul.f32 0.35355338, %v2306_v55  ;;  %v2320_v59 = vsel %vm1316_vm4, %v2316_v57, -inf }
 0x80b   : > { %v2317_v58 = vsel %vm1316_vm4, %v2315_v56, -inf }
 0x80c   : > { %2318 = vmax.xlane.f32.xlu1 %v2317_v58 }
 0x810   : > { %2321 = vmax.xlane.f32.xlu1 %v2320_v59 }
 0x895   : > { %v2319_v60 = vpop.xlane.xlu1 %2318 }
 0x896   : > { %v2323_v61 = vsub.f32 %v2315_v56, %v2319_v60  ;;  %v1483_v56 = vld [vmem:[%s5576_s4 + $0x58] sm:$0xff] }
 0x898   : > { %v2325_v63 = vmul.f32 1.442695, %v2323_v61 }
 0x899   : > { %v2322_v0 = vpop.xlane.xlu1 %2321 }
 0x89a   : > { %4844 = vpow2.f32 %v2325_v63  ;;  %v2324_v3 = vsub.f32 %v2316_v57, %v2322_v0  ;;  %v1482_v0 = vld [vmem:[%s5576_s4 + $0x50] sm:$0xff] }
 0x89c   : > { %v2327_v4 = vmul.f32 1.442695, %v2324_v3  ;;  %v1481_v3 = vld [vmem:[%s5576_s4 + $0x48] sm:$0xff] }
 0x89e   : > { %4846 = vpow2.f32 %v2327_v4  ;;  %v1499_v4 = vld [vmem:[%s5525_s13 + $0x58] sm:$0xff] }
 0x8a7   : > { %v4845_v5 = vpop.eup %4844 }
 0x8a8   : > { %v2329_v6 = vsel %vm1316_vm4, %v4845_v5, 0.0 }
 0x8a9   : > { %2330 = vadd.xlane.f32.xlu1 %v2329_v6  ;;  %v1497_v6 = vld [vmem:[%s5525_s13 + $0x48] sm:$0xff] }
 0x8ab   : > { %v4847_v7 = vpop.eup %4846 }
 0x8ac   : > { %v2332_v8 = vsel %vm1316_vm4, %v4847_v7, 0.0 }
 0x8ad   : > { %2333 = vadd.xlane.f32.xlu0 %v2332_v8 }
 0x932   : > { %v2331_v10 = vpop.xlane.xlu1 %2330 }
 0x933   : > { %4848 = vrcp.f32 %v2331_v10 }
 0x936   : > { %v2334_v11 = vpop.xlane.xlu0 %2333 }
 0x937   : > { %4850 = vrcp.f32 %v2334_v11  ;;  %v1487_v11 = vld [vmem:[%s5579_s3 + $0x18] sm:$0xff]  ;;  %s1064_s3 = scalar_lea.vmem %s5580_s2, %s5108_s6  ;;  %s1133_s2 = scalar_lea.vmem %s5540_s28, %s5586_s8 }
 0x940   : > { %v4849_v12 = vpop.eup %4848 }
 0x941   : > { %v2337_v13 = vmul.f32 %v4849_v12, %v4845_v5  ;;  %v1498_v5 = vld [vmem:[%s5525_s13 + $0x50] sm:$0xff] }
 0x943   : > { %4658 = vmatprep.mubr.msk.f32.mxu1 %vm1316_vm4, %v2337_v13 }
 0x944   : > { %v4851_v14 = vpop.eup %4850 }
 0x945   : > { %v2338_v15 = vmul.f32 %v4851_v14, %v4847_v7  ;;  %v1502_v7 = vld [vmem:[%s5526_s14 + $0x10] sm:$0xff] }
 0x947   : > { %4659 = vmatmul.mubr.msk.f32.vlgmr.msra.gmra.mxu1 %vm1316_vm4, %v2338_v15 }
 0x948   : > { %4667 = vmatpush3.msra.mxu1 %v1480_v9  ;;  %4672 = vmatprep.mubr.msk.f32.mxu1 %vm1421_vm5, %v5173_v2 }
 0x949   : > { %4668 = vmatprep.subr.mxu1 %v1479_v16 }
 0x94a   : > { %4669 = vmatpush3.msra.mxu1 %v1479_v16 }
 0x94b   : > { %4670 = vmatprep.subr.mxu1 %v1478_v17 }
 0x94c   : > { %4671 = vmatpush3.msra.mxu1 %v1478_v17 }
 0x94d   : > { %4673 = vmatmul.mubr.msk.f32.vlgmr.msra.gmra.mxu1 %vm1421_vm5, %v5168_v62  ;;  %4682 = vmatprep.subr.mxu1 %v1496_v18 }
 0x94e   : > { %4683 = vmatpush3.msra.mxu1 %v1496_v18  ;;  %4688 = vmatprep.mubr.msk.f32.mxu1 %vm1421_vm5, %v5173_v2 }
 0x94f   : > { %4684 = vmatprep.subr.mxu1 %v1495_v19 }
 0x950   : > { %4685 = vmatpush3.msra.mxu1 %v1495_v19 }
 0x951   : > { %4686 = vmatprep.subr.mxu1 %v1494_v20 }
 0x952   : > { %4687 = vmatpush3.msra.mxu1 %v1494_v20 }
 0x953   : > { %4689 = vmatmul.mubr.msk.f32.vlgmr.msra.gmra.mxu1 %vm1421_vm5, %v5168_v62 }
 0xa07   : > { %v4660_v22 = vpop.f32.mrf.mxu1 }
 0xa09   : > { %v2411_v23 = vpop.f32.mrf.mxu1 }
 0xa0a   : > { %4663 = vmatprep.mubr.msk.f32.mxu0 %vm1734_vm6, %v2411_v23 }
 0xa0b   : > { %4664 = vmatmul.mubr.msk.f32.vlgmr.msra.gmra.mxu0 %vm1734_vm6, %v4660_v22 }
 0xa0c   : > { %4676 = vmatpush3.xpose.msk.msra.mxu0 %vm1421_vm5, %v5168_v62  ;;  %4679 = vmatprep.mubr.msk.f32.mxu0 %vm4905_vm0, %v4904_v1 }
 0xa0d   : > { %v4674_v24 = vpop.f32.mrf.mxu1  ;;  %4677 = vmatprep.subr.mxu0 %v4904_v1 }
 0xa0f   : > { %v2569_v26 = vpop.f32.mrf.mxu1 }
 0xa10   : > { %4678 = vmatpush3.xpose.msk.msra.mxu0 %vm1421_vm5, %v5173_v2 }
 0xa13   : > { %4680 = vmatmul.mubr.msk.f32.vlgmr.msra.gmra.mxu0 %vm1421_vm5, %v1486_v25  ;;  %v4690_v27 = vpop.f32.mrf.mxu1 }
 0xa14   : > { %4693 = vmatprep.mubr.msk.f32.mxu0 %vm1734_vm6, %v2569_v26  ;;  %4696 = vmatprep.subr.mxu1 %v4690_v27 }
 0xa15   : > { %v2717_v28 = vpop.f32.mrf.mxu1  ;;  %4697 = vmatpush3.msra.mxu1 %v4690_v27 }
 0xa16   : > { %4698 = vmatprep.subr.mxu1 %v2717_v28 }
 0xa17   : > { %4699 = vmatpush3.msra.mxu1 %v2717_v28 }
 0xa18   : > { %4708 = vmatprep.subr.mxu1 %v1483_v56 }
 0xacb   : > { %v4665_v31 = vpop.f32.mrf.mxu0 }
 0xacc   : > { %v5307_v35 = vadd.f32 %v4665_v31, %v2010_v30 }
 0xacd   : > { %v2492_v36 = vpop.f32.mrf.mxu0 }
 0xace   : > { %v5309_v37 = vadd.f32 %v2492_v36, %v2009_v33 }
 0xad3   : > { %v2647_v38 = vpop.f32.mrf.mxu0 }
 0xad4   : > { %4691 = vmatprep.subr.mxu0 %v2647_v38 }
 0xad5   : > { %v4681_v39 = vpop.f32.mrf.mxu0  ;;  %4692 = vmatpush3.msra.mxu0 %v2647_v38 }
 0xad6   : > { %4694 = vmatmul.mubr.msk.f32.vlgmr.msra.gmra.mxu0 %vm1734_vm6, %v4674_v24  ;;  %4703 = vmatprep.subr.mxu0 %v1502_v7 }
 0xad7   : > { %4704 = vmatpush3.msra.mxu0 %v1502_v7 }
 0xad8   : > { %4717 = vmatprep.subr.mxu0 %v4904_v1 }
 0xb96   : > { %v4695_v40 = vpop.f32.mrf.mxu0 }
 0xb97   : > { %v2808_v41 = vmul.f32 0.35355338, %v4695_v40 }
 0xb98   : > { %v2798_v42 = vpop.f32.mrf.mxu0 }
 0xb99   : > { %v2807_v43 = vmul.f32 0.35355338, %v2798_v42  ;;  %v2812_v44 = vsel %vm1316_vm4, %v2808_v41, -inf  ;;  %v1503_v42 = vld [vmem:[%s5526_s14 + $0x18] sm:$0xff] }
 0xb9a   : > { %2813 = vmax.xlane.f32.xlu0 %v2812_v44 }
 0xb9b   : > { %v2809_v45 = vsel %vm1316_vm4, %v2807_v43, -inf }
 0xb9c   : > { %2810 = vmax.xlane.f32.xlu1 %v2809_v45 }
 0xc23   : > { %v2814_v46 = vpop.xlane.xlu0 %2813 }
 0xc24   : > { %v2816_v47 = vsub.f32 %v2808_v41, %v2814_v46 }
 0xc25   : > { %v2811_v48 = vpop.xlane.xlu1 %2810 }
 0xc26   : > { %v2819_v49 = vmul.f32 1.442695, %v2816_v47  ;;  %v2815_v50 = vsub.f32 %v2807_v43, %v2811_v48 }
 0xc28   : > { %4852 = vpow2.f32 %v2819_v49  ;;  %v2817_v51 = vmul.f32 1.442695, %v2815_v50 }
 0xc2a   : > { %4854 = vpow2.f32 %v2817_v51 }
 0xc35   : > { %v4853_v52 = vpop.eup %4852 }
 0xc36   : > { %v2824_v53 = vsel %vm1316_vm4, %v4853_v52, 0.0 }
 0xc37   : > { %v4855_v54 = vpop.eup %4854  ;;  %2825 = vadd.xlane.f32.xlu0 %v2824_v53 }
 0xc38   : > { %v2821_v55 = vsel %vm1316_vm4, %v4855_v54, 0.0 }
 0xc39   : > { %2822 = vadd.xlane.f32.xlu1 %v2821_v55 }
 0xcc0   : > { %v2826_v57 = vpop.xlane.xlu0 %2825 }
 0xcc1   : > { %4856 = vrcp.f32 %v2826_v57 }
 0xcc2   : > { %v2823_v58 = vpop.xlane.xlu1 %2822 }
 0xcc3   : > { %4858 = vrcp.f32 %v2823_v58 }
 0xcce   : > { %v4857_v59 = vpop.eup %4856 }
 0xccf   : > { %v2830_v63 = vmul.f32 %v4857_v59, %v4853_v52 }
 0xcd0   : > { %v4859_v60 = vpop.eup %4858 }
 0xcd1   : > { %v2829_v61 = vmul.f32 %v4859_v60, %v4855_v54 }
 0xcd3   : > { %4700 = vmatprep.mubr.msk.f32.mxu1 %vm1316_vm4, %v2829_v61  ;;  %v3535_v61 = vld [vmem:[%s5530_s18 + $0x10] sm:$0xff] }
 0xcd4   : > { %4701 = vmatmul.mubr.msk.f32.vlgmr.msra.gmra.mxu1 %vm1316_vm4, %v2830_v63  ;;  %v3534_v63 = vld [vmem:[%s5530_s18 + $0x8] sm:$0xff] }
 0xcd5   : > { %4709 = vmatpush3.msra.mxu1 %v1483_v56  ;;  %4714 = vmatprep.mubr.msk.f32.mxu1 %vm1421_vm5, %v5173_v2 }
 0xcd6   : > { %4710 = vmatprep.subr.mxu1 %v1482_v0 }
 0xcd7   : > { %4711 = vmatpush3.msra.mxu1 %v1482_v0  ;;  %v3533_v0 = vld [vmem:[%s5530_s18] sm:$0xff] }
 0xcd8   : > { %4712 = vmatprep.subr.mxu1 %v1481_v3 }
 0xcd9   : > { %4713 = vmatpush3.msra.mxu1 %v1481_v3 }
 0xcda   : > { %4715 = vmatmul.mubr.msk.f32.vlgmr.msra.gmra.mxu1 %vm1421_vm5, %v5168_v62  ;;  %4724 = vmatprep.subr.mxu1 %v1499_v4 }
 0xcdb   : > { %4725 = vmatpush3.msra.mxu1 %v1499_v4  ;;  %4730 = vmatprep.mubr.msk.f32.mxu1 %vm1421_vm5, %v5173_v2 }
 0xcdc   : > { %4726 = vmatprep.subr.mxu1 %v1498_v5 }
 0xcdd   : > { %4727 = vmatpush3.msra.mxu1 %v1498_v5 }
 0xcde   : > { %4728 = vmatprep.subr.mxu1 %v1497_v6 }
 0xcdf   : > { %4729 = vmatpush3.msra.mxu1 %v1497_v6 }
 0xce0   : > { %4731 = vmatmul.mubr.msk.f32.vlgmr.msra.gmra.mxu1 %vm1421_vm5, %v5168_v62 }
 0xd94   : > { %v4702_v8 = vpop.f32.mrf.mxu1 }
 0xd96   : > { %v2903_v9 = vpop.f32.mrf.mxu1 }
 0xd97   : > { %4705 = vmatprep.mubr.msk.f32.mxu0 %vm1734_vm6, %v2903_v9 }
 0xd98   : > { %4706 = vmatmul.mubr.msk.f32.vlgmr.msra.gmra.mxu0 %vm1734_vm6, %v4702_v8 }
 0xd99   : > { %4718 = vmatpush3.xpose.msk.msra.mxu0 %vm1421_vm5, %v5168_v62  ;;  %4721 = vmatprep.mubr.msk.f32.mxu0 %vm4905_vm0, %v4904_v1 }
 0xd9a   : > { %v4716_v10 = vpop.f32.mrf.mxu1  ;;  %4719 = vmatprep.subr.mxu0 %v4904_v1 }
 0xd9c   : > { %v3061_v12 = vpop.f32.mrf.mxu1 }
 0xd9d   : > { %4720 = vmatpush3.xpose.msk.msra.mxu0 %vm1421_vm5, %v5173_v2 }
 0xda0   : > { %4722 = vmatmul.mubr.msk.f32.vlgmr.msra.gmra.mxu0 %vm1421_vm5, %v1487_v11  ;;  %v4732_v13 = vpop.f32.mrf.mxu1 }
 0xda1   : > { %4735 = vmatprep.mubr.msk.f32.mxu0 %vm1734_vm6, %v3061_v12  ;;  %4738 = vmatprep.subr.mxu1 %v4732_v13 }
 0xda2   : > { %v3209_v62 = vpop.f32.mrf.mxu1  ;;  %4739 = vmatpush3.msra.mxu1 %v4732_v13 }
 0xda3   : > { %4740 = vmatprep.subr.mxu1 %v3209_v62 }
 0xda4   : > { %4741 = vmatpush3.msra.mxu1 %v3209_v62 }
 0xda5   : > { %4750 = vmatprep.subr.mxu1 %v3535_v61 }
 0xe58   : > { %v4707_v14 = vpop.f32.mrf.mxu0 }
 0xe59   : > { %v2994_v1 = vadd.f32 %v4707_v14, %v5307_v35  ;;  %v4407_v14 = vld [vmem:[%s5529_s17] ss:$0 sm:$0xff] }
 0xe5a   : > { %v2984_v15 = vpop.f32.mrf.mxu0 }
 0xe5b   : > { %v2993_v2 = vadd.f32 %v2984_v15, %v5309_v37 }
 0xe60   : > { %v3139_v16 = vpop.f32.mrf.mxu0 }
 0xe61   : > { %4733 = vmatprep.subr.mxu0 %v3139_v16 }
 0xe62   : > { %v4723_v17 = vpop.f32.mrf.mxu0  ;;  %4734 = vmatpush3.msra.mxu0 %v3139_v16  ;;  %v3653_v16 = vld [vmem:[%s5532_s20 + $0x58] sm:$0xff] }
 0xe63   : > { %4736 = vmatmul.mubr.msk.f32.vlgmr.msra.gmra.mxu0 %vm1734_vm6, %v4716_v10  ;;  %4745 = vmatprep.subr.mxu0 %v1503_v42  ;;  %v4406_v10 = vld [vmem:[%s5528_s16] ss:$0 sm:$0xff]  ;;  %v3652_v17 = vld [vmem:[%s5532_s20 + $0x50] sm:$0xff] }
 0xe64   : > { %4746 = vmatpush3.msra.mxu0 %v1503_v42 }
 0xe65   : > { %4759 = vmatprep.subr.mxu0 %v3653_v16 }
 0xf23   : > { %v4737_v18 = vpop.f32.mrf.mxu0 }
 0xf24   : > { %v3300_v19 = vmul.f32 0.35355338, %v4737_v18  ;;  %v3651_v18 = vld [vmem:[%s5532_s20 + $0x48] sm:$0xff] }
 0xf25   : > { %v3290_v20 = vpop.f32.mrf.mxu0 }
 0xf26   : > { %v3299_v21 = vmul.f32 0.35355338, %v3290_v20  ;;  %v3304_v22 = vsel %vm1316_vm4, %v3300_v19, -inf  ;;  %v3649_v20 = vld [vmem:[%s5532_s20 + $0x38] sm:$0xff] }
 0xf27   : > { %3305 = vmax.xlane.f32.xlu0 %v3304_v22  ;;  %v3647_v22 = vld [vmem:[%s5532_s20 + $0x28] sm:$0xff] }
 0xf28   : > { %v3301_v23 = vsel %vm1316_vm4, %v3299_v21, -inf }
 0xf29   : > { %3302 = vmax.xlane.f32.xlu1 %v3301_v23  ;;  %v3646_v23 = vld [vmem:[%s5532_s20 + $0x20] sm:$0xff] }
 0xfb0   : > { %v3306_v24 = vpop.xlane.xlu0 %3305 }
 0xfb1   : > { %v3308_v25 = vsub.f32 %v3300_v19, %v3306_v24  ;;  %v3650_v19 = vld [vmem:[%s5532_s20 + $0x40] sm:$0xff]  ;;  %v3645_v24 = vld [vmem:[%s5532_s20 + $0x18] sm:$0xff] }
 0xfb2   : > { %v3303_v26 = vpop.xlane.xlu1 %3302 }
 0xfb3   : > { %v3311_v27 = vmul.f32 1.442695, %v3308_v25  ;;  %v3307_v28 = vsub.f32 %v3299_v21, %v3303_v26  ;;  %v3648_v21 = vld [vmem:[%s5532_s20 + $0x30] sm:$0xff]  ;;  %v3643_v26 = vld [vmem:[%s5532_s20 + $0x8] sm:$0xff] }
 0xfb4   : > { %v3644_v25 = vld [vmem:[%s5532_s20 + $0x10] sm:$0xff] }
 0xfb5   : > { %4860 = vpow2.f32 %v3311_v27  ;;  %v3309_v29 = vmul.f32 1.442695, %v3307_v28  ;;  %v3642_v27 = vld [vmem:[%s5532_s20] sm:$0xff] }
 0xfb6   : > { %v4408_v28 = vld [vmem:[%s5531_s19] ss:$0 sm:$0xff] }
 0xfb7   : > { %4862 = vpow2.f32 %v3309_v29 }
 0xfc2   : > { %v4861_v30 = vpop.eup %4860 }
 0xfc3   : > { %v3316_v31 = vsel %vm1316_vm4, %v4861_v30, 0.0 }
 0xfc4   : > { %v4863_v33 = vpop.eup %4862  ;;  %3317 = vadd.xlane.f32.xlu0 %v3316_v31 }
 0xfc5   : > { %v3313_v35 = vsel %vm1316_vm4, %v4863_v33, 0.0 }
 0xfc6   : > { %3314 = vadd.xlane.f32.xlu1 %v3313_v35 }
0x104d   : > { %v3318_v36 = vpop.xlane.xlu0 %3317 }
0x104e   : > { %4864 = vrcp.f32 %v3318_v36 }
0x104f   : > { %v3315_v37 = vpop.xlane.xlu1 %3314 }
0x1050   : > { %4866 = vrcp.f32 %v3315_v37 }
0x105b   : > { %v4865_v38 = vpop.eup %4864 }
0x105c   : > { %v3322_v41 = vmul.f32 %v4865_v38, %v4861_v30 }
0x105d   : > { %v4867_v39 = vpop.eup %4866 }
0x105e   : > { %v3321_v40 = vmul.f32 %v4867_v39, %v4863_v33 }
0x1060   : > { %4742 = vmatprep.mubr.msk.f32.mxu1 %vm1316_vm4, %v3321_v40 }
0x1061   : > { %4743 = vmatmul.mubr.msk.f32.vlgmr.msra.gmra.mxu1 %vm1316_vm4, %v3322_v41 }
0x1062   : > { %4751 = vmatpush3.msra.mxu1 %v3535_v61 }
0x1063   : > { %4752 = vmatprep.subr.mxu1 %v3534_v63 }
0x1064   : > { %4753 = vmatpush3.msra.mxu1 %v3534_v63 }
0x1065   : > { %4754 = vmatprep.subr.mxu1 %v3533_v0 }
0x1066   : > { %4755 = vmatpush3.msra.mxu1 %v3533_v0 }
0x1121   : > { %v4744_v43 = vpop.f32.mrf.mxu1 }
0x1123   : > { %v3395_v44 = vpop.f32.mrf.mxu1 }
0x1124   : > { %4747 = vmatprep.mubr.msk.f32.mxu0 %vm1734_vm6, %v3395_v44 }
0x1125   : > { %4748 = vmatmul.mubr.msk.f32.vlgmr.msra.gmra.mxu0 %vm1734_vm6, %v4744_v43 }
0x1126   : > { %4760 = vmatpush3.msra.mxu0 %v3653_v16 }
0x1127   : > { %4761 = vmatprep.subr.mxu0 %v3652_v17 }
0x1128   : > { %4762 = vmatpush3.msra.mxu0 %v3652_v17  ;;  %v4414_v17 = vld [vmem:[%s5534_s22] ss:$0 sm:$0xff] }
0x1129   : > { %4763 = vmatprep.subr.mxu0 %v3651_v18 }
0x112a   : > { %4764 = vmatpush3.msra.mxu0 %v3651_v18 }
0x112b   : > { %4765 = vmatprep.subr.mxu0 %v3650_v19 }
0x112c   : > { %4766 = vmatpush3.msra.mxu0 %v3650_v19 }
0x112d   : > { %4767 = vmatprep.subr.mxu0 %v3649_v20 }
0x112e   : > { %4768 = vmatpush3.msra.mxu0 %v3649_v20 }
0x112f   : > { %4769 = vmatprep.subr.mxu0 %v3648_v21 }
0x1130   : > { %4770 = vmatpush3.msra.mxu0 %v3648_v21 }
0x1131   : > { %4771 = vmatprep.subr.mxu0 %v3647_v22 }
0x1132   : > { %4772 = vmatpush3.msra.mxu0 %v3647_v22  ;;  %v4415_v22 = vld [vmem:[%s5535_s23] ss:$0 sm:$0xff] }
0x1133   : > { %4773 = vmatprep.subr.mxu0 %v3646_v23 }
0x1134   : > { %4774 = vmatpush3.msra.mxu0 %v3646_v23 }
0x1135   : > { %4775 = vmatprep.subr.mxu0 %v3645_v24 }
0x1136   : > { %4776 = vmatpush3.msra.mxu0 %v3645_v24 }
0x1137   : > { %4777 = vmatprep.subr.mxu0 %v3644_v25 }
0x1138   : > { %4778 = vmatpush3.msra.mxu0 %v3644_v25 }
0x1139   : > { %4779 = vmatprep.subr.mxu0 %v3643_v26 }
0x113a   : > { %4780 = vmatpush3.msra.mxu0 %v3643_v26  ;;  %v3890_v26 = vld [vmem:[%s5117_s30] sm:$0xff] }
0x113b   : > { %4781 = vmatprep.subr.mxu0 %v3642_v27 }
0x113c   : > { %4782 = vmatpush3.msra.mxu0 %v3642_v27  ;;  %v3892_v27 = vld [vmem:[%s1064_s3] sm:$0xff] }
0x11e5   : > { %v4749_v45 = vpop.f32.mrf.mxu0 }
0x11e6   : > { %v3486_v46 = vadd.f32 %v4749_v45, %v2994_v1 }
0x11e7   : > { %v3476_v47 = vpop.f32.mrf.mxu0 }
0x11e8   : > { %v5377_v48 = vadd.f32 %v3486_v46, %v5138_v32  ;;  %v3485_v49 = vadd.f32 %v3476_v47, %v2993_v2 }
0x11ea   : > { %v5380_v50 = vadd.f32 %v3485_v49, %v5142_v34  ;;  %v3494_v51 = vsel %vm1421_vm5, %v5377_v48, 0.0 }
0x11eb   : > { %3495 = vadd.xlane.f32.xlu0 %v3494_v51 }
0x11ec   : > { %v3491_v52 = vsel %vm1421_vm5, %v5380_v50, 0.0 }
0x11ed   : > { %3492 = vadd.xlane.f32.xlu1 %v3491_v52 }
0x1274   : > { %v3496_v53 = vpop.xlane.xlu0 %3495 }
0x1275   : > { %v3498_v54 = vmul.f32 0.041666668, %v3496_v53 }
0x1276   : > { %v3493_v55 = vpop.xlane.xlu1 %3492 }
0x1277   : > { %v3500_v56 = vsub.f32 %v5377_v48, %v3498_v54  ;;  %v3497_v57 = vmul.f32 0.041666668, %v3493_v55 }
0x1279   : > { %v3499_v32 = vsub.f32 %v5380_v50, %v3497_v57  ;;  %v3502_v58 = vmul.f32 %v3500_v56, %v3500_v56 }
0x127b   : > { %v3506_v34 = vsel %vm1421_vm5, %v3502_v58, 0.0  ;;  %v3501_v59 = vmul.f32 %v3499_v32, %v3499_v32 }
0x127c   : > { %3507 = vadd.xlane.f32.xlu0 %v3506_v34 }
0x127d   : > { %v3503_v60 = vsel %vm1421_vm5, %v3501_v59, 0.0 }
0x127e   : > { %3504 = vadd.xlane.f32.xlu1 %v3503_v60 }
0x1305   : > { %v3508_v3 = vpop.xlane.xlu0 %3507 }
0x1306   : > { %v3510_v4 = vmul.f32 0.041666668, %v3508_v3 }
0x1307   : > { %v3505_v5 = vpop.xlane.xlu1 %3504 }
0x1308   : > { %v3512_v6 = vadd.f32 1e-05, %v3510_v4  ;;  %v3509_v7 = vmul.f32 0.041666668, %v3505_v5 }
0x130a   : > { %4868 = vrsqrt.f32 %v3512_v6  ;;  %v3511_v8 = vadd.f32 1e-05, %v3509_v7 }
0x130c   : > { %4870 = vrsqrt.f32 %v3511_v8 }
0x1317   : > { %v4869_v9 = vpop.eup %4868 }
0x1318   : > { %v3516_v11 = vmul.f32 %v4869_v9, %v3500_v56  ;;  %v4413_v56 = vld [vmem:[%s5533_s21] ss:$0 sm:$0xff]  ;;  %v3799_v9 = vld [vmem:[%s5536_s24 + $0x10] sm:$0xff] }
0x1319   : > { %v4871_v12 = vpop.eup %4870  ;;  %4786 = vmatprep.subr.mxu1 %v3799_v9 }
0x131a   : > { %v3515_v13 = vmul.f32 %v4871_v12, %v3499_v32  ;;  %v3524_v62 = vmul.f32 %v4406_v10, %v3516_v11  ;;  %v3797_v11 = vld [vmem:[%s5536_s24] sm:$0xff]  ;;  %v3893_v12 = vld [vmem:[%s1064_s3 + $0x8] sm:$0xff] }
0x131c   : > { %v3523_v1 = vmul.f32 %v4406_v10, %v3515_v13  ;;  %v3532_v2 = vadd.f32 %v4407_v14, %v3524_v62  ;;  %v3798_v10 = vld [vmem:[%s5536_s24 + $0x8] sm:$0xff] }
0x131e   : > { %v3531_v15 = vadd.f32 %v4407_v14, %v3523_v1 }
0x1320   : > { %4756 = vmatprep.mubr.msk.f32.mxu1 %vm1421_vm5, %v3531_v15 }
0x1321   : > { %4757 = vmatmul.mubr.msk.f32.vlgmr.msra.gmra.mxu1 %vm1421_vm5, %v3532_v2 }
0x1322   : > { %4787 = vmatpush3.msra.mxu1 %v3799_v9 }
0x1323   : > { %4788 = vmatprep.subr.mxu1 %v3798_v10 }
0x1324   : > { %4789 = vmatpush3.msra.mxu1 %v3798_v10 }
0x1325   : > { %4790 = vmatprep.subr.mxu1 %v3797_v11 }
0x1326   : > { %4791 = vmatpush3.msra.mxu1 %v3797_v11 }
0x1327   : > { %4795 = vmatprep.subr.mxu1 %v3893_v12 }
0x13e1   : > { %v4758_v29 = vpop.f32.mrf.mxu1 }
0x13e2   : > { %v3621_v30 = vadd.f32 %v4758_v29, %v4408_v28  ;;  %v4416_v29 = vld [vmem:[%s5537_s25] ss:$0 sm:$0xff] }
0x13e3   : > { %v3615_v31 = vpop.f32.mrf.mxu1 }
0x13e4   : > { %v3625_v33 = vmul.f32 %v3621_v30, %v3621_v30  ;;  %v3616_v35 = vadd.f32 %v4408_v28, %v3615_v31  ;;  %v3891_v28 = vld [vmem:[%s5117_s30 + $0x8] sm:$0xff] }
0x13e6   : > { %v3627_v36 = vmul.f32 %v3625_v33, %v3621_v30  ;;  %v3624_v37 = vmul.f32 %v3616_v35, %v3616_v35 }
0x13e8   : > { %v3629_v38 = vmul.f32 0.044715, %v3627_v36  ;;  %v3626_v39 = vmul.f32 %v3624_v37, %v3616_v35 }
0x13ea   : > { %v3631_v40 = vadd.f32 %v3629_v38, %v3621_v30  ;;  %v3628_v41 = vmul.f32 0.044715, %v3626_v39 }
0x13ec   : > { %v3633_v42 = vmul.f32 0.7978846, %v3631_v40  ;;  %v3630_v43 = vadd.f32 %v3628_v41, %v3616_v35 }
0x13ee   : > { %4872 = vtanh.f32 %v3633_v42  ;;  %v3632_v44 = vmul.f32 0.7978846, %v3630_v43 }
0x13f0   : > { %4874 = vtanh.f32 %v3632_v44 }
0x13fb   : > { %v4873_v45 = vpop.eup %4872 }
0x13fc   : > { %v3637_v46 = vadd.f32 1.0, %v4873_v45 }
0x13fd   : > { %v4875_v47 = vpop.eup %4874 }
0x13fe   : > { %v3636_v49 = vadd.f32 1.0, %v4875_v47  ;;  %v3639_v51 = vmul.f32 0.5, %v3637_v46 }
0x1400   : > { %v3638_v52 = vmul.f32 0.5, %v3636_v49  ;;  %v3641_v54 = vmul.f32 %v3639_v51, %v3621_v30 }
0x1402   : > { %v3640_v53 = vmul.f32 %v3638_v52, %v3616_v35 }
0x1404   : > { %4783 = vmatprep.mubr.msk.f32.mxu0 %vm3654_vm7, %v3640_v53 }
0x1405   : > { %4784 = vmatmul.mubr.msk.f32.vlgmr.msra.gmra.mxu0 %vm3654_vm7, %v3641_v54 }
0x14c5   : > { %v4785_v55 = vpop.f32.mrf.mxu0 }
0x14c6   : > { %v3737_v57 = vadd.f32 %v4785_v55, %v5377_v48 }
0x14c7   : > { %v3727_v32 = vpop.f32.mrf.mxu0 }
0x14c8   : > { %v3746_v58 = vadd.f32 %v4413_v56, %v3737_v57  ;;  %v3736_v34 = vadd.f32 %v3727_v32, %v5380_v50 }
0x14ca   : > { %3748 = vst.msk [vmem:[#allocation2 + $0x8] sm:$0xff] %vm1421_vm5, %v3746_v58  ;;  %v3745_v59 = vadd.f32 %v4413_v56, %v3736_v34  ;;  %v3758_v60 = vsel %vm3757_vm8, %v3746_v58, 0.0 }
0x14cb   : > { %3759 = vadd.xlane.f32.xlu0 %v3758_v60 }
0x14cc   : > { %3747 = vst.msk [vmem:[#allocation2] sm:$0xff] %vm1421_vm5, %v3745_v59  ;;  %v3754_v61 = vsel %vm1421_vm5, %v3745_v59, 0.0 }
0x14cd   : > { %3755 = vadd.xlane.f32.xlu1 %v3754_v61 }
0x1554   : > { %v3760_v63 = vpop.xlane.xlu0 %3759 }
0x1555   : > { %v3762_v0 = vmul.f32 0.041666668, %v3760_v63 }
0x1556   : > { %v3756_v3 = vpop.xlane.xlu1 %3755 }
0x1557   : > { %v3764_v48 = vsub.f32 %v3746_v58, %v3762_v0  ;;  %v3761_v4 = vmul.f32 0.041666668, %v3756_v3 }
0x1559   : > { %v3763_v5 = vsub.f32 %v3745_v59, %v3761_v4  ;;  %v3766_v6 = vmul.f32 %v3764_v48, %v3764_v48 }
0x155b   : > { %v3770_v50 = vsel %vm3757_vm8, %v3766_v6, 0.0  ;;  %v3765_v7 = vmul.f32 %v3763_v5, %v3763_v5 }
0x155c   : > { %3771 = vadd.xlane.f32.xlu0 %v3770_v50 }
0x155d   : > { %v3767_v8 = vsel %vm1421_vm5, %v3765_v7, 0.0 }
0x155e   : > { %3768 = vadd.xlane.f32.xlu1 %v3767_v8 }
0x15e5   : > { %v3772_v13 = vpop.xlane.xlu0 %3771 }
0x15e6   : > { %v3774_v62 = vmul.f32 0.041666668, %v3772_v13 }
0x15e7   : > { %v3769_v14 = vpop.xlane.xlu1 %3768 }
0x15e8   : > { %v3776_v1 = vadd.f32 1e-05, %v3774_v62  ;;  %v3773_v15 = vmul.f32 0.041666668, %v3769_v14 }
0x15ea   : > { %4876 = vrsqrt.f32 %v3776_v1  ;;  %v3775_v2 = vadd.f32 1e-05, %v3773_v15 }
0x15ec   : > { %4878 = vrsqrt.f32 %v3775_v2 }
0x15f7   : > { %v4877_v16 = vpop.eup %4876 }
0x15f8   : > { %v3780_v18 = vmul.f32 %v4877_v16, %v3764_v48 }
0x15f9   : > { %v4879_v19 = vpop.eup %4878 }
0x15fa   : > { %v3779_v20 = vmul.f32 %v4879_v19, %v3763_v5  ;;  %v3788_v21 = vmul.f32 %v4414_v17, %v3780_v18 }
0x15fc   : > { %v3787_v23 = vmul.f32 %v4414_v17, %v3779_v20  ;;  %v3796_v25 = vadd.f32 %v4415_v22, %v3788_v21 }
0x15fe   : > { %v3795_v24 = vadd.f32 %v4415_v22, %v3787_v23 }
0x1600   : > { %4792 = vmatprep.mubr.msk.f32.mxu1 %vm1421_vm5, %v3795_v24 }
0x1601   : > { %4793 = vmatmul.mubr.msk.f32.vlgmr.msra.gmra.mxu1 %vm1421_vm5, %v3796_v25 }
0x1602   : > { %4796 = vmatpush3.msra.mxu1 %v3893_v12  ;;  %4799 = vmatprep.mubr.msk.f32.mxu1 %vm1316_vm4, %v3890_v26 }
0x1603   : > { %4797 = vmatprep.subr.mxu1 %v3892_v27 }
0x1604   : > { %4798 = vmatpush3.msra.mxu1 %v3892_v27 }
0x1605   : > { %4800 = vmatmul.mubr.msk.f32.vlgmr.msra.gmra.mxu1 %vm1316_vm4, %v3891_v28 }
0x16c1   : > { %v4794_v30 = vpop.f32.mrf.mxu1 }
0x16c2   : > { %v3885_v31 = vadd.f32 %v4794_v30, %v4416_v29 }
0x16c3   : > { %v3879_v33 = vpop.f32.mrf.mxu1 }
0x16c4   : > { %3889 = vst.msk [vmem:[%s1125_s29 + $0x8] sm:$0xf] %vm3757_vm8, %v3885_v31  ;;  %v3880_v35 = vadd.f32 %v4416_v29, %v3879_v33 }
0x16c5   : > { %v4801_v36 = vpop.f32.mrf.mxu1 }
0x16c6   : > { %3888 = vst.msk [vmem:[%s1125_s29] sm:$0xff] %vm1421_vm5, %v3880_v35  ;;  %v3978_v37 = vsub.f32 %v3885_v31, %v4801_v36 }
0x16c7   : > { %3976 = vst.msk [vmem:[%s1130_s12 + $0x8] sm:$0xf] %vm3757_vm8, %v4801_v36  ;;  %v3966_v38 = vpop.f32.mrf.mxu1 }
0x16c8   : > { %v3980_v39 = vmul.f32 %v3978_v37, %v3978_v37  ;;  %3975 = vst.msk [vmem:[%s1130_s12] sm:$0xff] %vm1421_vm5, %v3966_v38  ;;  %v3977_v40 = vsub.f32 %v3880_v35, %v3966_v38 }
0x16ca   : > { %v3979_v41 = vmul.f32 %v3977_v40, %v3977_v40  ;;  %v3982_v43 = vsel %vm3757_vm8, %v3980_v39, 0.0 }
0x16cc   : > { %v3981_v42 = vsel %vm1421_vm5, %v3979_v41, 0.0 }
0x16cd   : > { %v3983_v44 = vadd.f32 %v3982_v43, %v3981_v42 }
0x16cf   : > { %3984 = vadd.xlane.f32.xlu1 %v3983_v44 }
0x1758   : > { %v3985_v45 = vpop.xlane.xlu1 %3984 }
0x1759   : > { %v3986_v46 = vrot.slane %v3985_v45, 4 }
0x175b   : > { %v3987_v47 = vadd.f32 %v3986_v46, %v3985_v45 }
0x175d   : > { %v3988_v49 = vrot.slane %v3987_v47, 2 }
0x175f   : > { %v3989_v51 = vadd.f32 %v3988_v49, %v3987_v47 }
0x1761   : > { %v3990_v52 = vrot.slane %v3989_v51, 1 }
0x1763   : > { %v3991_v53 = vadd.f32 %v3990_v52, %v3989_v51 }
0x1765   : > { %4802 = vpush %v3991_v53 }
0x1796   : > { %s4803_s0 = spop %4802 }
0x1797   : > { %v3993_v54 = vstv %s4803_s0 }
0x1798   : > { %3995 = vst.msk [vmem:[%s1133_s2] sm:$0x1] %vm3994_vm9, %v3993_v54 }
0x1799 PF: > { %s39_s9 = sadd.s32 1, %s4902_s9   ;;  %s5581_s8 = sld [smem:[#allocation3_spill]] }
0x179a   : > { %p36_p5 = scmp.ge.s32.totalorder %s39_s9, 4   ;;  %s5582_s5 = sld [smem:[#allocation4_spill]] }
0x179c   :  { %38 = sbr.rel (!%p36_p5) target bundleno = 14 (0xe), region = 231 }

</bundles_post_ra>
